<compile_context>
chip_gen: v7x
topology: tpu7x:2x2x1
jax: 0.10.0
libtpu: 0.0.40
codegen_flags: <defaults>
</compile_context>

<pallas_src>
import functools

import jax
import jax.numpy as jnp
from jax import lax
from jax.experimental import pallas as pl
from jax.experimental.pallas import tpu as pltpu


# -----------------------------------------------------------------------------
# Model hyper-parameters (small, consistent with the module defaults' structure)
# -----------------------------------------------------------------------------
BATCH = 2
SEQ = 8
INPUT_DIM = 16
HIDDEN_DIM = 32
LATENT_DIM = 16
GRU_DIMS = [32, 16]          # gru_layer_dims
OUTPUT_DIM = 2
DROP_RATE = 0.5
BN_EPS = 1e-5
LN_EPS = 1e-5

LANE = 128
ENC_W = INPUT_DIM + 2 * LATENT_DIM        # packed encoder payload: [x_recon | mu | logvar]
_VMEM = pl.BlockSpec(memory_space=pltpu.MemorySpace.VMEM)


# -----------------------------------------------------------------------------
# Packed, lane-dense parameter layouts (static Python metadata used in-kernel)
# Weight slab entry: (row_off, n_rows, lane_off, n_cols)
# -----------------------------------------------------------------------------
def _weight_layout():
    d1, d2 = GRU_DIMS
    L = LATENT_DIM
    layout = {
        # rows 0:16
        "wih1": (0, L, 0, 3 * d1),                     # fused [r|z|n]  L -> 3*d1   lanes 0:96
        "wmu":  (0, INPUT_DIM, 3 * d1, L),             # lanes 96:112
        "wdec": (0, L, 3 * d1 + L, INPUT_DIM),         # lanes 112:128
        # rows 16:48
        "whh1": (16, d1, 0, 3 * d1),                   # fused [r|z|n]  d1 -> 3*d1  lanes 0:96
        "w2":   (16, HIDDEN_DIM, 3 * d1, L),           # lanes 96:112
        # rows 48:96
        "wl2":  (48, d1 + d2, 0, 4 * d2),              # [[Wih2_r|Wih2_z|Wih2_n|0],[Whh2_r|Whh2_z|0|Whh2_n]]
        "w1":   (48, INPUT_DIM, 4 * d2, HIDDEN_DIM),   # rows 48:64, lanes 64:96
        # rows 96:112
        "wfc":  (96, d2, 0, LANE),                     # zero-padded beyond OUTPUT_DIM (lane-dense v)
    }
    rows = 112
    for _, (r0, nr, c0, nc) in layout.items():
        assert r0 % 8 == 0 and nr % 8 == 0 and c0 + nc <= LANE
    return layout, rows


def _vector_layout():
    d1, d2 = GRU_DIMS
    specs = [
        ("b1", HIDDEN_DIM), ("b2", LATENT_DIM), ("bmu", LATENT_DIM),
        ("bn_gamma", LATENT_DIM), ("bn_beta", LATENT_DIM), ("bdec", INPUT_DIM),
        ("bi1", 3 * d1),        # bih1 + [bhh1_r | bhh1_z | 0]  (hh biases folded for r,z)
        ("bhh1_n", d1),         # kept separate: it sits inside the r * (.) term
        ("ln1_gamma", d1), ("ln1_beta", d1),
        ("b2g", 4 * d2),        # [bih2_r+bhh2_r | bih2_z+bhh2_z | bih2_n | bhh2_n]
        ("ln2_gamma", d2), ("ln2_beta", d2),
        ("bfc", LANE),          # zero-padded to lane width
    ]
    layout = {name: (i, c) for i, (name, c) in enumerate(specs)}
    rows = ((len(specs) + 7) // 8) * 8
    return layout, rows


W_LAYOUT, W_ROWS = _weight_layout()
V_LAYOUT, V_ROWS = _vector_layout()


# -----------------------------------------------------------------------------
# Single fused kernel: encoder + reparameterize + decoder + GRU recurrence + head
# All inputs/outputs are batch-major (row = b*S + t) -> wrapper needs no transposes.
# -----------------------------------------------------------------------------
def aegru_kernel(x_ref, eps_ref, w_ref, vec_ref, drop_ref,
                 enc_ref, v_ref, *, seq_len, batch, d1, d2):
    f32 = jnp.float32

    def W(name):                                         # weight block from the packed slab
        r0, nr, c0, nc = W_LAYOUT[name]
        return w_ref[r0:r0 + nr, c0:c0 + nc]

    vecs = vec_ref[...]                                  # whole vector slab: a few vregs

    def V(name):                                         # (1, c) bias / gamma / beta row
        row, c = V_LAYOUT[name]
        return vecs[row:row + 1, :c]

    def mm(a, b):
        return jnp.dot(a, b, preferred_element_type=jnp.float32)

    def layer_norm(v, g, b):
        # mean and mean-of-squares computed concurrently (independent XLU reductions)
        m = jnp.mean(v, axis=-1, keepdims=True)
        ms = jnp.mean(v * v, axis=-1, keepdims=True)
        return g * (v - m) * lax.rsqrt(ms - m * m + LN_EPS) + b

    # ------------------- Encoder + reparameterize + Decoder -------------------
    n_rows = batch * seq_len
    x = x_ref[...]                                       # (B*S, Din), batch-major rows
    # TODO(synk): torch softplus uses an x>20 identity threshold; logaddexp is the exact form.
    xl = jnp.log(jnp.logaddexp(x, 0.0))                  # softplus(x).log()

    h = jnp.maximum(mm(xl, W("w1")) + V("b1"), 0.0)
    logvar = mm(h, W("w2")) + V("b2")

    mu_lin = mm(xl, W("wmu")) + V("bmu")
    mean = jnp.mean(mu_lin, axis=0, keepdims=True)       # BatchNorm1d training-mode stats
    var = jnp.mean((mu_lin - mean) ** 2, axis=0, keepdims=True)   # biased, like PyTorch BN fwd
    mu = V("bn_gamma") * (mu_lin - mean) * lax.rsqrt(var + BN_EPS) + V("bn_beta")
    mu = jnp.clip(mu, -10.0, 10.0)

    z = mu + eps_ref[...] * jnp.exp(0.5 * logvar)        # (B*S, L) — stays in VMEM

    x_recon = jnp.exp(mm(z, W("wdec")) + V("bdec"))

    # Lane-dense packed output store: [x_recon | mu | logvar | 0-pad] as one (N,128) slab.
    pad = jnp.zeros((n_rows, LANE - ENC_W), f32)
    enc_ref[...] = jnp.concatenate([x_recon, mu, logvar, pad], axis=-1)

    # ------------------- Stacked GRUCell + LayerNorm recurrence -------------------
    # Fused recurrent weights (hoisted once; ~10 vregs live across the loop).
    whh1 = W("whh1")                                     # (d1, 3*d1)  [r|z|n]
    wl2 = W("wl2")                                       # (d1+d2, 4*d2)

    # Layer-1 input projection hoisted out of the loop: one fused matmul over all
    # timesteps.  bih1 + bhh1 folded for the r/z gates; bhh1_n stays separate.
    gi1 = mm(z, W("wih1")) + V("bi1")                    # (B*S, 3*d1)

    # Pre-broadcast every per-step (1,d) row to (batch,d) ONCE (JAX does not CSE
    # broadcast_in_dim; keep it off the serial critical path).
    bhh1_n = jnp.broadcast_to(V("bhh1_n"), (batch, d1))
    bias2 = jnp.broadcast_to(V("b2g"), (batch, 4 * d2))
    ln1_g = jnp.broadcast_to(V("ln1_gamma"), (batch, d1))
    ln1_b = jnp.broadcast_to(V("ln1_beta"), (batch, d1))
    ln2_g = jnp.broadcast_to(V("ln2_gamma"), (batch, d2))
    ln2_b = jnp.broadcast_to(V("ln2_beta"), (batch, d2))

    h1 = jnp.zeros((batch, d1), f32)
    h2 = jnp.zeros((batch, d2), f32)

    # Fully unrolled: seq_len is a small static constant, so the scheduler sees the
    # whole serial chain at once; the gi1 row gathers depend only on z and overlap
    # with the MXU latency of the recurrence.
    for t in range(seq_len):
        # rows {b*S + t} of the batch-major hoisted projection (static sublane slices)
        gi = jnp.concatenate(
            [gi1[b * seq_len + t:b * seq_len + t + 1, :] for b in range(batch)], axis=0)

        # --- GRU layer 1 (input = z[t]), one fused hidden matmul, torch gate order r,z,n ---
        gh = mm(h1, whh1)                                # (batch, 3*d1)
        r1 = jax.nn.sigmoid(gi[:, :d1] + gh[:, :d1])
        z1 = jax.nn.sigmoid(gi[:, d1:2 * d1] + gh[:, d1:2 * d1])
        n1 = jnp.tanh(gi[:, 2 * d1:] + r1 * (gh[:, 2 * d1:] + bhh1_n))
        h1 = layer_norm((1.0 - z1) * n1 + z1 * h1, ln1_g, ln1_b)

        # --- GRU layer 2 (input = h1): single block matmul [h1|h2] @ wl2 ---
        g2 = mm(jnp.concatenate([h1, h2], axis=-1), wl2) + bias2     # (batch, 4*d2)
        r2 = jax.nn.sigmoid(g2[:, :d2])
        z2 = jax.nn.sigmoid(g2[:, d2:2 * d2])
        n2 = jnp.tanh(g2[:, 2 * d2:3 * d2] + r2 * g2[:, 3 * d2:])
        h2 = layer_norm((1.0 - z2) * n2 + z2 * h2, ln2_g, ln2_b)

    # ------------------- Dropout + final Linear head (lane-dense write) -------------------
    dropped = h2 * drop_ref[...]
    v_ref[...] = mm(dropped, W("wfc")) + V("bfc")        # (B, 128) lane-dense store


# -----------------------------------------------------------------------------
# Wrapper — no transposes, only reshapes/slices around the call.
# -----------------------------------------------------------------------------
def aegru_forward(x, w_slab, v_slab, eps_noise, drop_mask):
    """x: (B, S, Din) f32. Returns (v, x_reconstructed, mu, logvar)."""
    B, S, Din = x.shape
    L = LATENT_DIM
    N = B * S
    d1, d2 = GRU_DIMS

    x_bm = x.reshape(N, Din)                 # batch-major rows (pure reshape, no transpose)
    eps_bm = eps_noise.reshape(N, L)

    kernel = functools.partial(aegru_kernel, seq_len=S, batch=B, d1=d1, d2=d2)
    enc_out, v_pad = pl.pallas_call(
        kernel,
        out_shape=(
            jax.ShapeDtypeStruct((N, LANE), jnp.float32),   # [x_recon | mu | logvar | pad]
            jax.ShapeDtypeStruct((B, LANE), jnp.float32),   # lane-padded v
        ),
        in_specs=[_VMEM] * 5,
        out_specs=(_VMEM, _VMEM),
    )(x_bm, eps_bm, w_slab, v_slab, drop_mask)

    enc = enc_out.reshape(B, S, LANE)
    x_recon = enc[:, :, :Din]
    mu = enc[:, :, Din:Din + L]
    logvar = enc[:, :, Din + L:Din + 2 * L]
    v = v_pad[:, :OUTPUT_DIM]
    return v, x_recon, mu, logvar


# -----------------------------------------------------------------------------
# Parameter packing: many tiny tensors -> two lane-packed 128-wide slabs (2 DMAs)
# -----------------------------------------------------------------------------
def pack_params(p):
    d1, d2 = GRU_DIMS
    f32 = jnp.float32

    def gsplit(mat, hid):        # torch fused-gate order along columns: r, z, n
        return mat[:, :hid], mat[:, hid:2 * hid], mat[:, 2 * hid:3 * hid]

    # ---- weight blocks ----
    wih2_r, wih2_z, wih2_n = gsplit(p["wih2"], d2)
    whh2_r, whh2_z, whh2_n = gsplit(p["whh2"], d2)
    wl2 = jnp.concatenate([
        jnp.concatenate([wih2_r, wih2_z, wih2_n, jnp.zeros((d1, d2), f32)], axis=1),
        jnp.concatenate([whh2_r, whh2_z, jnp.zeros((d2, d2), f32), whh2_n], axis=1),
    ], axis=0)                                                    # (d1+d2, 4*d2)
    wfc_pad = jnp.zeros((d2, LANE), f32).at[:, :OUTPUT_DIM].set(p["wfc"])

    wblocks = {
        "wih1": p["wih1"], "whh1": p["whh1"], "wl2": wl2,
        "w1": p["w1"], "w2": p["w2"], "wmu": p["wmu"], "wdec": p["wdec"],
        "wfc": wfc_pad,
    }
    w_slab = jnp.zeros((W_ROWS, LANE), f32)
    for name, (r0, nr, c0, nc) in W_LAYOUT.items():
        blk = wblocks[name].astype(f32)
        assert blk.shape == (nr, nc), (name, blk.shape, (nr, nc))
        w_slab = w_slab.at[r0:r0 + nr, c0:c0 + nc].set(blk)

    # ---- vector blocks (per-gate hh biases pre-folded where legal) ----
    bih1_r, bih1_z, bih1_n = gsplit(p["bih1"], d1)
    bhh1_r, bhh1_z, bhh1_n = gsplit(p["bhh1"], d1)
    bi1 = jnp.concatenate([bih1_r + bhh1_r, bih1_z + bhh1_z, bih1_n], axis=1)        # (1, 3*d1)
    bih2_r, bih2_z, bih2_n = gsplit(p["bih2"], d2)
    bhh2_r, bhh2_z, bhh2_n = gsplit(p["bhh2"], d2)
    b2g = jnp.concatenate([bih2_r + bhh2_r, bih2_z + bhh2_z, bih2_n, bhh2_n], axis=1)  # (1, 4*d2)
    bfc_pad = jnp.zeros((1, LANE), f32).at[:, :OUTPUT_DIM].set(p["bfc"])

    vblocks = {
        "b1": p["b1"], "b2": p["b2"], "bmu": p["bmu"],
        "bn_gamma": p["bn_gamma"], "bn_beta": p["bn_beta"], "bdec": p["bdec"],
        "bi1": bi1, "bhh1_n": bhh1_n,
        "ln1_gamma": p["ln1_gamma"], "ln1_beta": p["ln1_beta"],
        "b2g": b2g, "ln2_gamma": p["ln2_gamma"], "ln2_beta": p["ln2_beta"],
        "bfc": bfc_pad,
    }
    v_slab = jnp.zeros((V_ROWS, LANE), f32)
    for name, (row, c) in V_LAYOUT.items():
        blk = vblocks[name].astype(f32)
        assert blk.shape == (1, c), (name, blk.shape, c)
        v_slab = v_slab.at[row:row + 1, :c].set(blk)

    return w_slab, v_slab


# -----------------------------------------------------------------------------
# Deterministic synthetic parameter initialization (PyTorch-style fused gates)
# -----------------------------------------------------------------------------
def init_params(key):
    d1, d2 = GRU_DIMS
    keys = jax.random.split(key, 16)

    def w(k, shape, scale=0.1):
        return (scale * jax.random.normal(k, shape)).astype(jnp.float32)

    params = {
        # Encoder
        "w1":  w(keys[0], (INPUT_DIM, HIDDEN_DIM)),
        "b1":  w(keys[1], (1, HIDDEN_DIM)),
        "w2":  w(keys[2], (HIDDEN_DIM, LATENT_DIM)),
        "b2":  w(keys[3], (1, LATENT_DIM)),
        "wmu": w(keys[4], (INPUT_DIM, LATENT_DIM)),
        "bmu": w(keys[5], (1, LATENT_DIM)),
        "bn_gamma": jnp.ones((1, LATENT_DIM), jnp.float32),
        "bn_beta":  jnp.zeros((1, LATENT_DIM), jnp.float32),
        # Decoder
        "wdec": w(keys[6], (LATENT_DIM, INPUT_DIM)),
        "bdec": w(keys[7], (1, INPUT_DIM)),
        # GRU layer 1: input LATENT_DIM -> hidden d1 (stored transposed vs torch)
        "wih1": w(keys[8], (LATENT_DIM, 3 * d1)),
        "whh1": w(keys[9], (d1, 3 * d1)),
        "bih1": w(keys[10], (1, 3 * d1)),
        "bhh1": w(keys[11], (1, 3 * d1)),
        "ln1_gamma": jnp.ones((1, d1), jnp.float32),
        "ln1_beta":  jnp.zeros((1, d1), jnp.float32),
        # GRU layer 2: input d1 -> hidden d2
        "wih2": w(keys[12], (d1, 3 * d2)),
        "whh2": w(keys[13], (d2, 3 * d2)),
        "bih2": w(keys[14], (1, 3 * d2)),
        "bhh2": w(keys[15], (1, 3 * d2)),
        "ln2_gamma": jnp.ones((1, d2), jnp.float32),
        "ln2_beta":  jnp.zeros((1, d2), jnp.float32),
        # Final FC head
        "wfc": w(jax.random.fold_in(key, 100), (d2, OUTPUT_DIM)),
        "bfc": w(jax.random.fold_in(key, 101), (1, OUTPUT_DIM)),
    }
    return params


# -----------------------------------------------------------------------------
# Plain-JAX reference (same math, used only to sanity-check the kernel)
# -----------------------------------------------------------------------------
def reference_forward(x, p, eps_noise, drop_mask):
    B, S, Din = x.shape
    xl = jnp.log(jnp.logaddexp(x, 0.0))
    h = jnp.maximum(xl @ p["w1"] + p["b1"], 0.0)
    logvar = h @ p["w2"] + p["b2"]
    mu_lin = xl @ p["wmu"] + p["bmu"]
    flat = mu_lin.reshape(-1, LATENT_DIM)
    mean = jnp.mean(flat, axis=0)
    var = jnp.mean((flat - mean) ** 2, axis=0)
    mu = p["bn_gamma"] * (mu_lin - mean) / jnp.sqrt(var + BN_EPS) + p["bn_beta"]
    mu = jnp.clip(mu, -10.0, 10.0)
    z = mu + eps_noise * jnp.exp(0.5 * logvar)
    x_recon = jnp.exp(z @ p["wdec"] + p["bdec"])

    d1, d2 = GRU_DIMS
    h1 = jnp.zeros((B, d1)); h2 = jnp.zeros((B, d2))

    def cell(xt, hp, wih, whh, bih, bhh, hid):
        gi = xt @ wih + bih
        gh = hp @ whh + bhh
        r = jax.nn.sigmoid(gi[:, :hid] + gh[:, :hid])
        zg = jax.nn.sigmoid(gi[:, hid:2 * hid] + gh[:, hid:2 * hid])
        n = jnp.tanh(gi[:, 2 * hid:] + r * gh[:, 2 * hid:])
        return (1 - zg) * n + zg * hp

    def ln(v, g, b):
        m = jnp.mean(v, -1, keepdims=True)
        s = jnp.mean((v - m) ** 2, -1, keepdims=True)
        return g * (v - m) / jnp.sqrt(s + LN_EPS) + b

    for t in range(S):
        h1 = ln(cell(z[:, t, :], h1, p["wih1"], p["whh1"], p["bih1"], p["bhh1"], d1),
                p["ln1_gamma"], p["ln1_beta"])
        h2 = ln(cell(h1, h2, p["wih2"], p["whh2"], p["bih2"], p["bhh2"], d2),
                p["ln2_gamma"], p["ln2_beta"])
    v = (h2 * drop_mask) @ p["wfc"] + p["bfc"]
    return v, x_recon, mu, logvar


# -----------------------------------------------------------------------------
if __name__ == "__main__":
    key = jax.random.PRNGKey(0)
    k_x, k_eps, k_drop, k_param = jax.random.split(key, 4)

    x = jax.random.normal(k_x, (BATCH, SEQ, INPUT_DIM), dtype=jnp.float32)
    params = init_params(k_param)
    w_slab, v_slab = pack_params(params)      # one-time packing, outside the kernel

    # randomness for reparameterize (torch.randn_like) and training-mode Dropout
    # TODO(synk): torch draws these internally; here they are pre-drawn host-side.
    eps_noise = jax.random.normal(k_eps, (BATCH, SEQ, LATENT_DIM), dtype=jnp.float32)
    keep = jax.random.bernoulli(k_drop, p=1.0 - DROP_RATE, shape=(BATCH, GRU_DIMS[-1]))
    drop_mask = keep.astype(jnp.float32) / (1.0 - DROP_RATE)

    fwd = jax.jit(aegru_forward)
    v, x_recon, mu, logvar = fwd(x, w_slab, v_slab, eps_noise, drop_mask)
    jax.block_until_ready((v, x_recon, mu, logvar))

    # sanity check against plain-JAX reference
    v_r, xr_r, mu_r, lv_r = reference_forward(x, params, eps_noise, drop_mask)
    for a, b in [(v, v_r), (x_recon, xr_r), (mu, mu_r), (logvar, lv_r)]:
        assert jnp.allclose(a, b, rtol=1e-3, atol=1e-3), "mismatch vs reference"

    assert v.shape == (BATCH, OUTPUT_DIM)
    assert x_recon.shape == (BATCH, SEQ, INPUT_DIM)
    assert mu.shape == (BATCH, SEQ, LATENT_DIM)
    assert logvar.shape == (BATCH, SEQ, LATENT_DIM)

    print("KERNEL_OK")
</pallas_src>

<mosaic_0001>
module attributes {stable_mosaic.version = 11 : i64} {
  func.func @aegru_kernel(%arg0: memref<16x16xf32, #tpu.memory_space<vmem>>, %arg1: memref<16x16xf32, #tpu.memory_space<vmem>>, %arg2: memref<112x128xf32, #tpu.memory_space<vmem>>, %arg3: memref<16x128xf32, #tpu.memory_space<vmem>>, %arg4: memref<2x16xf32, #tpu.memory_space<vmem>>, %arg5: memref<16x128xf32, #tpu.memory_space<vmem>>, %arg6: memref<2x128xf32, #tpu.memory_space<vmem>>) attributes {dimension_semantics = [], scalar_prefetch = 0 : i64, scratch_operands = 0 : i64, tpu.core_type = #tpu.core_type<tc>} {
    %c0 = arith.constant 0 : index
    %c0_0 = arith.constant 0 : index
    %0 = vector.load %arg3[%c0, %c0_0] : memref<16x128xf32, #tpu.memory_space<vmem>>, vector<16x128xf32>
    %c0_1 = arith.constant 0 : index
    %c0_2 = arith.constant 0 : index
    %1 = vector.load %arg0[%c0_1, %c0_2] : memref<16x16xf32, #tpu.memory_space<vmem>>, vector<16x16xf32>
    %cst = arith.constant 0.000000e+00 : f32
    %2 = vector.broadcast %cst : f32 to vector<16x16xf32>
    %3 = arith.maximumf %1, %2 : vector<16x16xf32>
    %4 = vector.broadcast %cst : f32 to vector<16x16xf32>
    %5 = arith.subf %1, %4 : vector<16x16xf32>
    %6 = arith.cmpf one, %5, %5 : vector<16x16xf32>
    %7 = vector.broadcast %cst : f32 to vector<16x16xf32>
    %8 = arith.addf %1, %7 : vector<16x16xf32>
    %9 = math.absf %5 : vector<16x16xf32>
    %cst_3 = arith.constant 0.000000e+00 : f32
    %10 = vector.broadcast %cst_3 : f32 to vector<16x16xf32>
    %11 = arith.subf %10, %9 : vector<16x16xf32>
    %12 = math.exp %11 : vector<16x16xf32>
    %13 = math.log1p %12 : vector<16x16xf32>
    %14 = arith.addf %3, %13 : vector<16x16xf32>
    %15 = arith.select %6, %8, %14 : vector<16x16xi1>, vector<16x16xf32>
    %16 = math.log %15 : vector<16x16xf32>
    %c48 = arith.constant 48 : index
    %c64 = arith.constant 64 : index
    %17 = vector.load %arg2[%c48, %c64] : memref<112x128xf32, #tpu.memory_space<vmem>>, vector<16x32xf32>
    %cst_4 = arith.constant dense<0.000000e+00> : vector<16x32xf32>
    %18 = tpu.matmul %16, %17, %cst_4 {dimension_numbers = #tpu.dot_dimension_numbers<[1], [0], [0], [1], [0, 0, 1, 1], [], []>} : vector<16x16xf32>, vector<16x32xf32>, vector<16x32xf32> -> vector<16x32xf32>
    %19 = vector.extract_strided_slice %0 {offsets = [0, 0], sizes = [1, 32], strides = [1, 1]} : vector<16x128xf32> to vector<1x32xf32>
    %20 = vector.broadcast %19 : vector<1x32xf32> to vector<16x32xf32>
    %21 = arith.addf %18, %20 : vector<16x32xf32>
    %cst_5 = arith.constant 0.000000e+00 : f32
    %22 = vector.broadcast %cst_5 : f32 to vector<16x32xf32>
    %23 = arith.maximumf %21, %22 : vector<16x32xf32>
    %c16 = arith.constant 16 : index
    %c96 = arith.constant 96 : index
    %24 = vector.load %arg2[%c16, %c96] : memref<112x128xf32, #tpu.memory_space<vmem>>, vector<32x16xf32>
    %cst_6 = arith.constant dense<0.000000e+00> : vector<16x16xf32>
    %25 = tpu.matmul %23, %24, %cst_6 {dimension_numbers = #tpu.dot_dimension_numbers<[1], [0], [0], [1], [0, 0, 1, 1], [], []>} : vector<16x32xf32>, vector<32x16xf32>, vector<16x16xf32> -> vector<16x16xf32>
    %26 = vector.extract_strided_slice %0 {offsets = [1, 0], sizes = [1, 16], strides = [1, 1]} : vector<16x128xf32> to vector<1x16xf32>
    %27 = vector.broadcast %26 : vector<1x16xf32> to vector<16x16xf32>
    %28 = arith.addf %25, %27 : vector<16x16xf32>
    %c0_7 = arith.constant 0 : index
    %c96_8 = arith.constant 96 : index
    %29 = vector.load %arg2[%c0_7, %c96_8] : memref<112x128xf32, #tpu.memory_space<vmem>>, vector<16x16xf32>
    %cst_9 = arith.constant dense<0.000000e+00> : vector<16x16xf32>
    %30 = tpu.matmul %16, %29, %cst_9 {dimension_numbers = #tpu.dot_dimension_numbers<[1], [0], [0], [1], [0, 0, 1, 1], [], []>} : vector<16x16xf32>, vector<16x16xf32>, vector<16x16xf32> -> vector<16x16xf32>
    %31 = vector.extract_strided_slice %0 {offsets = [2, 0], sizes = [1, 16], strides = [1, 1]} : vector<16x128xf32> to vector<1x16xf32>
    %32 = vector.broadcast %31 : vector<1x16xf32> to vector<16x16xf32>
    %33 = arith.addf %30, %32 : vector<16x16xf32>
    %cst_10 = arith.constant dense<0.000000e+00> : vector<16xf32>
    %34 = vector.multi_reduction <add>, %33, %cst_10 [0] : vector<16x16xf32> to vector<16xf32>
    %35 = vector.shape_cast %34 : vector<16xf32> to vector<1x16xf32>
    %cst_11 = arith.constant 1.600000e+01 : f32
    %36 = vector.broadcast %cst_11 : f32 to vector<1x16xf32>
    %37 = arith.divf %35, %36 : vector<1x16xf32>
    %38 = vector.broadcast %37 : vector<1x16xf32> to vector<16x16xf32>
    %39 = arith.subf %33, %38 : vector<16x16xf32>
    %40 = arith.mulf %39, %39 : vector<16x16xf32>
    %cst_12 = arith.constant dense<0.000000e+00> : vector<16xf32>
    %41 = vector.multi_reduction <add>, %40, %cst_12 [0] : vector<16x16xf32> to vector<16xf32>
    %42 = vector.shape_cast %41 : vector<16xf32> to vector<1x16xf32>
    %cst_13 = arith.constant 1.600000e+01 : f32
    %43 = vector.broadcast %cst_13 : f32 to vector<1x16xf32>
    %44 = arith.divf %42, %43 : vector<1x16xf32>
    %45 = vector.extract_strided_slice %0 {offsets = [3, 0], sizes = [1, 16], strides = [1, 1]} : vector<16x128xf32> to vector<1x16xf32>
    %46 = vector.broadcast %37 : vector<1x16xf32> to vector<16x16xf32>
    %47 = arith.subf %33, %46 : vector<16x16xf32>
    %48 = vector.broadcast %45 : vector<1x16xf32> to vector<16x16xf32>
    %49 = arith.mulf %48, %47 : vector<16x16xf32>
    %cst_14 = arith.constant 9.99999974E-6 : f32
    %50 = vector.broadcast %cst_14 : f32 to vector<1x16xf32>
    %51 = arith.addf %44, %50 : vector<1x16xf32>
    %52 = math.rsqrt %51 : vector<1x16xf32>
    %53 = vector.broadcast %52 : vector<1x16xf32> to vector<16x16xf32>
    %54 = arith.mulf %49, %53 : vector<16x16xf32>
    %55 = vector.extract_strided_slice %0 {offsets = [4, 0], sizes = [1, 16], strides = [1, 1]} : vector<16x128xf32> to vector<1x16xf32>
    %56 = vector.broadcast %55 : vector<1x16xf32> to vector<16x16xf32>
    %57 = arith.addf %54, %56 : vector<16x16xf32>
    %cst_15 = arith.constant -1.000000e+01 : f32
    %cst_16 = arith.constant 1.000000e+01 : f32
    %58 = vector.broadcast %cst_15 : f32 to vector<16x16xf32>
    %59 = arith.maximumf %58, %57 : vector<16x16xf32>
    %60 = vector.broadcast %cst_16 : f32 to vector<16x16xf32>
    %61 = arith.minimumf %60, %59 : vector<16x16xf32>
    %c0_17 = arith.constant 0 : index
    %c0_18 = arith.constant 0 : index
    %62 = vector.load %arg1[%c0_17, %c0_18] : memref<16x16xf32, #tpu.memory_space<vmem>>, vector<16x16xf32>
    %cst_19 = arith.constant 5.000000e-01 : f32
    %63 = vector.broadcast %cst_19 : f32 to vector<16x16xf32>
    %64 = arith.mulf %63, %28 : vector<16x16xf32>
    %65 = math.exp %64 : vector<16x16xf32>
    %66 = arith.mulf %62, %65 : vector<16x16xf32>
    %67 = arith.addf %61, %66 : vector<16x16xf32>
    %c0_20 = arith.constant 0 : index
    %c112 = arith.constant 112 : index
    %68 = vector.load %arg2[%c0_20, %c112] : memref<112x128xf32, #tpu.memory_space<vmem>>, vector<16x16xf32>
    %cst_21 = arith.constant dense<0.000000e+00> : vector<16x16xf32>
    %69 = tpu.matmul %67, %68, %cst_21 {dimension_numbers = #tpu.dot_dimension_numbers<[1], [0], [0], [1], [0, 0, 1, 1], [], []>} : vector<16x16xf32>, vector<16x16xf32>, vector<16x16xf32> -> vector<16x16xf32>
    %70 = vector.extract_strided_slice %0 {offsets = [5, 0], sizes = [1, 16], strides = [1, 1]} : vector<16x128xf32> to vector<1x16xf32>
    %71 = vector.broadcast %70 : vector<1x16xf32> to vector<16x16xf32>
    %72 = arith.addf %69, %71 : vector<16x16xf32>
    %73 = math.exp %72 : vector<16x16xf32>
    %cst_22 = arith.constant 0.000000e+00 : f32
    %74 = vector.broadcast %cst_22 : f32 to vector<16x80xf32>
    %75 = tpu.concatenate %73, %61, %28, %74 in 1 : vector<16x16xf32>, vector<16x16xf32>, vector<16x16xf32>, vector<16x80xf32> -> vector<16x128xf32>
    %c0_23 = arith.constant 0 : index
    %c0_24 = arith.constant 0 : index
    %76 = vector.load %arg5[%c0_23, %c0_24] : memref<16x128xf32, #tpu.memory_space<vmem>>, vector<16x128xf32>
    tpu.vector_store %arg5[%c0_23, %c0_24], %75 {strides = array<i32>} : memref<16x128xf32, #tpu.memory_space<vmem>>, vector<16x128xf32>,
    %c16_25 = arith.constant 16 : index
    %c0_26 = arith.constant 0 : index
    %77 = vector.load %arg2[%c16_25, %c0_26] : memref<112x128xf32, #tpu.memory_space<vmem>>, vector<32x96xf32>
    %c48_27 = arith.constant 48 : index
    %c0_28 = arith.constant 0 : index
    %78 = vector.load %arg2[%c48_27, %c0_28] : memref<112x128xf32, #tpu.memory_space<vmem>>, vector<48x64xf32>
    %c0_29 = arith.constant 0 : index
    %c0_30 = arith.constant 0 : index
    %79 = vector.load %arg2[%c0_29, %c0_30] : memref<112x128xf32, #tpu.memory_space<vmem>>, vector<16x96xf32>
    %cst_31 = arith.constant dense<0.000000e+00> : vector<16x96xf32>
    %80 = tpu.matmul %67, %79, %cst_31 {dimension_numbers = #tpu.dot_dimension_numbers<[1], [0], [0], [1], [0, 0, 1, 1], [], []>} : vector<16x16xf32>, vector<16x96xf32>, vector<16x96xf32> -> vector<16x96xf32>
    %81 = vector.extract_strided_slice %0 {offsets = [6, 0], sizes = [1, 96], strides = [1, 1]} : vector<16x128xf32> to vector<1x96xf32>
    %82 = vector.broadcast %81 : vector<1x96xf32> to vector<16x96xf32>
    %83 = arith.addf %80, %82 : vector<16x96xf32>
    %84 = vector.extract_strided_slice %0 {offsets = [7, 0], sizes = [1, 32], strides = [1, 1]} : vector<16x128xf32> to vector<1x32xf32>
    %85 = vector.shape_cast %84 : vector<1x32xf32> to vector<1x32xf32>
    %86 = vector.broadcast %85 : vector<1x32xf32> to vector<2x32xf32>
    %87 = vector.extract_strided_slice %0 {offsets = [10, 0], sizes = [1, 64], strides = [1, 1]} : vector<16x128xf32> to vector<1x64xf32>
    %88 = vector.shape_cast %87 : vector<1x64xf32> to vector<1x64xf32>
    %89 = vector.broadcast %88 : vector<1x64xf32> to vector<2x64xf32>
    %90 = vector.extract_strided_slice %0 {offsets = [8, 0], sizes = [1, 32], strides = [1, 1]} : vector<16x128xf32> to vector<1x32xf32>
    %91 = vector.shape_cast %90 : vector<1x32xf32> to vector<1x32xf32>
    %92 = vector.broadcast %91 : vector<1x32xf32> to vector<2x32xf32>
    %93 = vector.extract_strided_slice %0 {offsets = [9, 0], sizes = [1, 32], strides = [1, 1]} : vector<16x128xf32> to vector<1x32xf32>
    %94 = vector.shape_cast %93 : vector<1x32xf32> to vector<1x32xf32>
    %95 = vector.broadcast %94 : vector<1x32xf32> to vector<2x32xf32>
    %96 = vector.extract_strided_slice %0 {offsets = [11, 0], sizes = [1, 16], strides = [1, 1]} : vector<16x128xf32> to vector<1x16xf32>
    %97 = vector.shape_cast %96 : vector<1x16xf32> to vector<1x16xf32>
    %98 = vector.broadcast %97 : vector<1x16xf32> to vector<2x16xf32>
    %99 = vector.extract_strided_slice %0 {offsets = [12, 0], sizes = [1, 16], strides = [1, 1]} : vector<16x128xf32> to vector<1x16xf32>
    %100 = vector.shape_cast %99 : vector<1x16xf32> to vector<1x16xf32>
    %101 = vector.broadcast %100 : vector<1x16xf32> to vector<2x16xf32>
    %cst_32 = arith.constant 0.000000e+00 : f32
    %102 = vector.broadcast %cst_32 : f32 to vector<2x32xf32>
    %cst_33 = arith.constant 0.000000e+00 : f32
    %103 = vector.broadcast %cst_33 : f32 to vector<2x16xf32>
    %104 = vector.extract_strided_slice %83 {offsets = [0, 0], sizes = [1, 96], strides = [1, 1]} : vector<16x96xf32> to vector<1x96xf32>
    %105 = vector.extract_strided_slice %83 {offsets = [8, 0], sizes = [1, 96], strides = [1, 1]} : vector<16x96xf32> to vector<1x96xf32>
    %106 = tpu.concatenate %104, %105 in 0 : vector<1x96xf32>, vector<1x96xf32> -> vector<2x96xf32>
    %cst_34 = arith.constant dense<0.000000e+00> : vector<2x96xf32>
    %107 = tpu.matmul %102, %77, %cst_34 {dimension_numbers = #tpu.dot_dimension_numbers<[1], [0], [0], [1], [0, 0, 1, 1], [], []>} : vector<2x32xf32>, vector<32x96xf32>, vector<2x96xf32> -> vector<2x96xf32>
    %108 = vector.extract_strided_slice %106 {offsets = [0, 0], sizes = [2, 32], strides = [1, 1]} : vector<2x96xf32> to vector<2x32xf32>
    %109 = vector.extract_strided_slice %107 {offsets = [0, 0], sizes = [2, 32], strides = [1, 1]} : vector<2x96xf32> to vector<2x32xf32>
    %110 = arith.addf %108, %109 : vector<2x32xf32>
    %111 = arith.negf %110 : vector<2x32xf32>
    %112 = math.exp %111 : vector<2x32xf32>
    %cst_35 = arith.constant 1.000000e+00 : f32
    %113 = vector.broadcast %cst_35 : f32 to vector<2x32xf32>
    %114 = arith.addf %113, %112 : vector<2x32xf32>
    %115 = arith.divf %113, %114 : vector<2x32xf32>
    %116 = vector.extract_strided_slice %106 {offsets = [0, 32], sizes = [2, 32], strides = [1, 1]} : vector<2x96xf32> to vector<2x32xf32>
    %117 = vector.extract_strided_slice %107 {offsets = [0, 32], sizes = [2, 32], strides = [1, 1]} : vector<2x96xf32> to vector<2x32xf32>
    %118 = arith.addf %116, %117 : vector<2x32xf32>
    %119 = arith.negf %118 : vector<2x32xf32>
    %120 = math.exp %119 : vector<2x32xf32>
    %cst_36 = arith.constant 1.000000e+00 : f32
    %121 = vector.broadcast %cst_36 : f32 to vector<2x32xf32>
    %122 = arith.addf %121, %120 : vector<2x32xf32>
    %123 = arith.divf %121, %122 : vector<2x32xf32>
    %124 = vector.extract_strided_slice %106 {offsets = [0, 64], sizes = [2, 32], strides = [1, 1]} : vector<2x96xf32> to vector<2x32xf32>
    %125 = vector.extract_strided_slice %107 {offsets = [0, 64], sizes = [2, 32], strides = [1, 1]} : vector<2x96xf32> to vector<2x32xf32>
    %126 = arith.addf %125, %86 : vector<2x32xf32>
    %127 = arith.mulf %115, %126 : vector<2x32xf32>
    %128 = arith.addf %124, %127 : vector<2x32xf32>
    %129 = math.tanh %128 : vector<2x32xf32>
    %cst_37 = arith.constant 1.000000e+00 : f32
    %130 = vector.broadcast %cst_37 : f32 to vector<2x32xf32>
    %131 = arith.subf %130, %123 : vector<2x32xf32>
    %132 = arith.mulf %131, %129 : vector<2x32xf32>
    %133 = arith.mulf %123, %102 : vector<2x32xf32>
    %134 = arith.addf %132, %133 : vector<2x32xf32>
    %cst_38 = arith.constant dense<0.000000e+00> : vector<2xf32>
    %135 = vector.multi_reduction <add>, %134, %cst_38 [1] : vector<2x32xf32> to vector<2xf32>
    %136 = vector.shape_cast %135 : vector<2xf32> to vector<2x1xf32>
    %cst_39 = arith.constant 3.200000e+01 : f32
    %137 = vector.broadcast %cst_39 : f32 to vector<2x1xf32>
    %138 = arith.divf %136, %137 : vector<2x1xf32>
    %139 = arith.mulf %134, %134 : vector<2x32xf32>
    %cst_40 = arith.constant dense<0.000000e+00> : vector<2xf32>
    %140 = vector.multi_reduction <add>, %139, %cst_40 [1] : vector<2x32xf32> to vector<2xf32>
    %141 = vector.shape_cast %140 : vector<2xf32> to vector<2x1xf32>
    %cst_41 = arith.constant 3.200000e+01 : f32
    %142 = vector.broadcast %cst_41 : f32 to vector<2x1xf32>
    %143 = arith.divf %141, %142 : vector<2x1xf32>
    %144 = vector.broadcast %138 : vector<2x1xf32> to vector<2x32xf32>
    %145 = arith.subf %134, %144 : vector<2x32xf32>
    %146 = arith.mulf %92, %145 : vector<2x32xf32>
    %147 = arith.mulf %138, %138 : vector<2x1xf32>
    %148 = arith.subf %143, %147 : vector<2x1xf32>
    %cst_42 = arith.constant 9.99999974E-6 : f32
    %149 = vector.broadcast %cst_42 : f32 to vector<2x1xf32>
    %150 = arith.addf %148, %149 : vector<2x1xf32>
    %151 = math.rsqrt %150 : vector<2x1xf32>
    %152 = vector.broadcast %151 : vector<2x1xf32> to vector<2x32xf32>
    %153 = arith.mulf %146, %152 : vector<2x32xf32>
    %154 = arith.addf %153, %95 : vector<2x32xf32>
    %155 = tpu.concatenate %154, %103 in 1 : vector<2x32xf32>, vector<2x16xf32> -> vector<2x48xf32>
    %cst_43 = arith.constant dense<0.000000e+00> : vector<2x64xf32>
    %156 = tpu.matmul %155, %78, %cst_43 {dimension_numbers = #tpu.dot_dimension_numbers<[1], [0], [0], [1], [0, 0, 1, 1], [], []>} : vector<2x48xf32>, vector<48x64xf32>, vector<2x64xf32> -> vector<2x64xf32>
    %157 = arith.addf %156, %89 : vector<2x64xf32>
    %158 = vector.extract_strided_slice %157 {offsets = [0, 0], sizes = [2, 16], strides = [1, 1]} : vector<2x64xf32> to vector<2x16xf32>
    %159 = arith.negf %158 : vector<2x16xf32>
    %160 = math.exp %159 : vector<2x16xf32>
    %cst_44 = arith.constant 1.000000e+00 : f32
    %161 = vector.broadcast %cst_44 : f32 to vector<2x16xf32>
    %162 = arith.addf %161, %160 : vector<2x16xf32>
    %163 = arith.divf %161, %162 : vector<2x16xf32>
    %164 = vector.extract_strided_slice %157 {offsets = [0, 16], sizes = [2, 16], strides = [1, 1]} : vector<2x64xf32> to vector<2x16xf32>
    %165 = arith.negf %164 : vector<2x16xf32>
    %166 = math.exp %165 : vector<2x16xf32>
    %cst_45 = arith.constant 1.000000e+00 : f32
    %167 = vector.broadcast %cst_45 : f32 to vector<2x16xf32>
    %168 = arith.addf %167, %166 : vector<2x16xf32>
    %169 = arith.divf %167, %168 : vector<2x16xf32>
    %170 = vector.extract_strided_slice %157 {offsets = [0, 32], sizes = [2, 16], strides = [1, 1]} : vector<2x64xf32> to vector<2x16xf32>
    %171 = vector.extract_strided_slice %157 {offsets = [0, 48], sizes = [2, 16], strides = [1, 1]} : vector<2x64xf32> to vector<2x16xf32>
    %172 = arith.mulf %163, %171 : vector<2x16xf32>
    %173 = arith.addf %170, %172 : vector<2x16xf32>
    %174 = math.tanh %173 : vector<2x16xf32>
    %cst_46 = arith.constant 1.000000e+00 : f32
    %175 = vector.broadcast %cst_46 : f32 to vector<2x16xf32>
    %176 = arith.subf %175, %169 : vector<2x16xf32>
    %177 = arith.mulf %176, %174 : vector<2x16xf32>
    %178 = arith.mulf %169, %103 : vector<2x16xf32>
    %179 = arith.addf %177, %178 : vector<2x16xf32>
    %cst_47 = arith.constant dense<0.000000e+00> : vector<2xf32>
    %180 = vector.multi_reduction <add>, %179, %cst_47 [1] : vector<2x16xf32> to vector<2xf32>
    %181 = vector.shape_cast %180 : vector<2xf32> to vector<2x1xf32>
    %cst_48 = arith.constant 1.600000e+01 : f32
    %182 = vector.broadcast %cst_48 : f32 to vector<2x1xf32>
    %183 = arith.divf %181, %182 : vector<2x1xf32>
    %184 = arith.mulf %179, %179 : vector<2x16xf32>
    %cst_49 = arith.constant dense<0.000000e+00> : vector<2xf32>
    %185 = vector.multi_reduction <add>, %184, %cst_49 [1] : vector<2x16xf32> to vector<2xf32>
    %186 = vector.shape_cast %185 : vector<2xf32> to vector<2x1xf32>
    %cst_50 = arith.constant 1.600000e+01 : f32
    %187 = vector.broadcast %cst_50 : f32 to vector<2x1xf32>
    %188 = arith.divf %186, %187 : vector<2x1xf32>
    %189 = vector.broadcast %183 : vector<2x1xf32> to vector<2x16xf32>
    %190 = arith.subf %179, %189 : vector<2x16xf32>
    %191 = arith.mulf %98, %190 : vector<2x16xf32>
    %192 = arith.mulf %183, %183 : vector<2x1xf32>
    %193 = arith.subf %188, %192 : vector<2x1xf32>
    %cst_51 = arith.constant 9.99999974E-6 : f32
    %194 = vector.broadcast %cst_51 : f32 to vector<2x1xf32>
    %195 = arith.addf %193, %194 : vector<2x1xf32>
    %196 = math.rsqrt %195 : vector<2x1xf32>
    %197 = vector.broadcast %196 : vector<2x1xf32> to vector<2x16xf32>
    %198 = arith.mulf %191, %197 : vector<2x16xf32>
    %199 = arith.addf %198, %101 : vector<2x16xf32>
    %200 = vector.extract_strided_slice %83 {offsets = [1, 0], sizes = [1, 96], strides = [1, 1]} : vector<16x96xf32> to vector<1x96xf32>
    %201 = vector.extract_strided_slice %83 {offsets = [9, 0], sizes = [1, 96], strides = [1, 1]} : vector<16x96xf32> to vector<1x96xf32>
    %202 = tpu.concatenate %200, %201 in 0 : vector<1x96xf32>, vector<1x96xf32> -> vector<2x96xf32>
    %cst_52 = arith.constant dense<0.000000e+00> : vector<2x96xf32>
    %203 = tpu.matmul %154, %77, %cst_52 {dimension_numbers = #tpu.dot_dimension_numbers<[1], [0], [0], [1], [0, 0, 1, 1], [], []>} : vector<2x32xf32>, vector<32x96xf32>, vector<2x96xf32> -> vector<2x96xf32>
    %204 = vector.extract_strided_slice %202 {offsets = [0, 0], sizes = [2, 32], strides = [1, 1]} : vector<2x96xf32> to vector<2x32xf32>
    %205 = vector.extract_strided_slice %203 {offsets = [0, 0], sizes = [2, 32], strides = [1, 1]} : vector<2x96xf32> to vector<2x32xf32>
    %206 = arith.addf %204, %205 : vector<2x32xf32>
    %207 = arith.negf %206 : vector<2x32xf32>
    %208 = math.exp %207 : vector<2x32xf32>
    %cst_53 = arith.constant 1.000000e+00 : f32
    %209 = vector.broadcast %cst_53 : f32 to vector<2x32xf32>
    %210 = arith.addf %209, %208 : vector<2x32xf32>
    %211 = arith.divf %209, %210 : vector<2x32xf32>
    %212 = vector.extract_strided_slice %202 {offsets = [0, 32], sizes = [2, 32], strides = [1, 1]} : vector<2x96xf32> to vector<2x32xf32>
    %213 = vector.extract_strided_slice %203 {offsets = [0, 32], sizes = [2, 32], strides = [1, 1]} : vector<2x96xf32> to vector<2x32xf32>
    %214 = arith.addf %212, %213 : vector<2x32xf32>
    %215 = arith.negf %214 : vector<2x32xf32>
    %216 = math.exp %215 : vector<2x32xf32>
    %cst_54 = arith.constant 1.000000e+00 : f32
    %217 = vector.broadcast %cst_54 : f32 to vector<2x32xf32>
    %218 = arith.addf %217, %216 : vector<2x32xf32>
    %219 = arith.divf %217, %218 : vector<2x32xf32>
    %220 = vector.extract_strided_slice %202 {offsets = [0, 64], sizes = [2, 32], strides = [1, 1]} : vector<2x96xf32> to vector<2x32xf32>
    %221 = vector.extract_strided_slice %203 {offsets = [0, 64], sizes = [2, 32], strides = [1, 1]} : vector<2x96xf32> to vector<2x32xf32>
    %222 = arith.addf %221, %86 : vector<2x32xf32>
    %223 = arith.mulf %211, %222 : vector<2x32xf32>
    %224 = arith.addf %220, %223 : vector<2x32xf32>
    %225 = math.tanh %224 : vector<2x32xf32>
    %cst_55 = arith.constant 1.000000e+00 : f32
    %226 = vector.broadcast %cst_55 : f32 to vector<2x32xf32>
    %227 = arith.subf %226, %219 : vector<2x32xf32>
    %228 = arith.mulf %227, %225 : vector<2x32xf32>
    %229 = arith.mulf %219, %154 : vector<2x32xf32>
    %230 = arith.addf %228, %229 : vector<2x32xf32>
    %cst_56 = arith.constant dense<0.000000e+00> : vector<2xf32>
    %231 = vector.multi_reduction <add>, %230, %cst_56 [1] : vector<2x32xf32> to vector<2xf32>
    %232 = vector.shape_cast %231 : vector<2xf32> to vector<2x1xf32>
    %cst_57 = arith.constant 3.200000e+01 : f32
    %233 = vector.broadcast %cst_57 : f32 to vector<2x1xf32>
    %234 = arith.divf %232, %233 : vector<2x1xf32>
    %235 = arith.mulf %230, %230 : vector<2x32xf32>
    %cst_58 = arith.constant dense<0.000000e+00> : vector<2xf32>
    %236 = vector.multi_reduction <add>, %235, %cst_58 [1] : vector<2x32xf32> to vector<2xf32>
    %237 = vector.shape_cast %236 : vector<2xf32> to vector<2x1xf32>
    %cst_59 = arith.constant 3.200000e+01 : f32
    %238 = vector.broadcast %cst_59 : f32 to vector<2x1xf32>
    %239 = arith.divf %237, %238 : vector<2x1xf32>
    %240 = vector.broadcast %234 : vector<2x1xf32> to vector<2x32xf32>
    %241 = arith.subf %230, %240 : vector<2x32xf32>
    %242 = arith.mulf %92, %241 : vector<2x32xf32>
    %243 = arith.mulf %234, %234 : vector<2x1xf32>
    %244 = arith.subf %239, %243 : vector<2x1xf32>
    %cst_60 = arith.constant 9.99999974E-6 : f32
    %245 = vector.broadcast %cst_60 : f32 to vector<2x1xf32>
    %246 = arith.addf %244, %245 : vector<2x1xf32>
    %247 = math.rsqrt %246 : vector<2x1xf32>
    %248 = vector.broadcast %247 : vector<2x1xf32> to vector<2x32xf32>
    %249 = arith.mulf %242, %248 : vector<2x32xf32>
    %250 = arith.addf %249, %95 : vector<2x32xf32>
    %251 = tpu.concatenate %250, %199 in 1 : vector<2x32xf32>, vector<2x16xf32> -> vector<2x48xf32>
    %cst_61 = arith.constant dense<0.000000e+00> : vector<2x64xf32>
    %252 = tpu.matmul %251, %78, %cst_61 {dimension_numbers = #tpu.dot_dimension_numbers<[1], [0], [0], [1], [0, 0, 1, 1], [], []>} : vector<2x48xf32>, vector<48x64xf32>, vector<2x64xf32> -> vector<2x64xf32>
    %253 = arith.addf %252, %89 : vector<2x64xf32>
    %254 = vector.extract_strided_slice %253 {offsets = [0, 0], sizes = [2, 16], strides = [1, 1]} : vector<2x64xf32> to vector<2x16xf32>
    %255 = arith.negf %254 : vector<2x16xf32>
    %256 = math.exp %255 : vector<2x16xf32>
    %cst_62 = arith.constant 1.000000e+00 : f32
    %257 = vector.broadcast %cst_62 : f32 to vector<2x16xf32>
    %258 = arith.addf %257, %256 : vector<2x16xf32>
    %259 = arith.divf %257, %258 : vector<2x16xf32>
    %260 = vector.extract_strided_slice %253 {offsets = [0, 16], sizes = [2, 16], strides = [1, 1]} : vector<2x64xf32> to vector<2x16xf32>
    %261 = arith.negf %260 : vector<2x16xf32>
    %262 = math.exp %261 : vector<2x16xf32>
    %cst_63 = arith.constant 1.000000e+00 : f32
    %263 = vector.broadcast %cst_63 : f32 to vector<2x16xf32>
    %264 = arith.addf %263, %262 : vector<2x16xf32>
    %265 = arith.divf %263, %264 : vector<2x16xf32>
    %266 = vector.extract_strided_slice %253 {offsets = [0, 32], sizes = [2, 16], strides = [1, 1]} : vector<2x64xf32> to vector<2x16xf32>
    %267 = vector.extract_strided_slice %253 {offsets = [0, 48], sizes = [2, 16], strides = [1, 1]} : vector<2x64xf32> to vector<2x16xf32>
    %268 = arith.mulf %259, %267 : vector<2x16xf32>
    %269 = arith.addf %266, %268 : vector<2x16xf32>
    %270 = math.tanh %269 : vector<2x16xf32>
    %cst_64 = arith.constant 1.000000e+00 : f32
    %271 = vector.broadcast %cst_64 : f32 to vector<2x16xf32>
    %272 = arith.subf %271, %265 : vector<2x16xf32>
    %273 = arith.mulf %272, %270 : vector<2x16xf32>
    %274 = arith.mulf %265, %199 : vector<2x16xf32>
    %275 = arith.addf %273, %274 : vector<2x16xf32>
    %cst_65 = arith.constant dense<0.000000e+00> : vector<2xf32>
    %276 = vector.multi_reduction <add>, %275, %cst_65 [1] : vector<2x16xf32> to vector<2xf32>
    %277 = vector.shape_cast %276 : vector<2xf32> to vector<2x1xf32>
    %cst_66 = arith.constant 1.600000e+01 : f32
    %278 = vector.broadcast %cst_66 : f32 to vector<2x1xf32>
    %279 = arith.divf %277, %278 : vector<2x1xf32>
    %280 = arith.mulf %275, %275 : vector<2x16xf32>
    %cst_67 = arith.constant dense<0.000000e+00> : vector<2xf32>
    %281 = vector.multi_reduction <add>, %280, %cst_67 [1] : vector<2x16xf32> to vector<2xf32>
    %282 = vector.shape_cast %281 : vector<2xf32> to vector<2x1xf32>
    %cst_68 = arith.constant 1.600000e+01 : f32
    %283 = vector.broadcast %cst_68 : f32 to vector<2x1xf32>
    %284 = arith.divf %282, %283 : vector<2x1xf32>
    %285 = vector.broadcast %279 : vector<2x1xf32> to vector<2x16xf32>
    %286 = arith.subf %275, %285 : vector<2x16xf32>
    %287 = arith.mulf %98, %286 : vector<2x16xf32>
    %288 = arith.mulf %279, %279 : vector<2x1xf32>
    %289 = arith.subf %284, %288 : vector<2x1xf32>
    %cst_69 = arith.constant 9.99999974E-6 : f32
    %290 = vector.broadcast %cst_69 : f32 to vector<2x1xf32>
    %291 = arith.addf %289, %290 : vector<2x1xf32>
    %292 = math.rsqrt %291 : vector<2x1xf32>
    %293 = vector.broadcast %292 : vector<2x1xf32> to vector<2x16xf32>
    %294 = arith.mulf %287, %293 : vector<2x16xf32>
    %295 = arith.addf %294, %101 : vector<2x16xf32>
    %296 = vector.extract_strided_slice %83 {offsets = [2, 0], sizes = [1, 96], strides = [1, 1]} : vector<16x96xf32> to vector<1x96xf32>
    %297 = vector.extract_strided_slice %83 {offsets = [10, 0], sizes = [1, 96], strides = [1, 1]} : vector<16x96xf32> to vector<1x96xf32>
    %298 = tpu.concatenate %296, %297 in 0 : vector<1x96xf32>, vector<1x96xf32> -> vector<2x96xf32>
    %cst_70 = arith.constant dense<0.000000e+00> : vector<2x96xf32>
    %299 = tpu.matmul %250, %77, %cst_70 {dimension_numbers = #tpu.dot_dimension_numbers<[1], [0], [0], [1], [0, 0, 1, 1], [], []>} : vector<2x32xf32>, vector<32x96xf32>, vector<2x96xf32> -> vector<2x96xf32>
    %300 = vector.extract_strided_slice %298 {offsets = [0, 0], sizes = [2, 32], strides = [1, 1]} : vector<2x96xf32> to vector<2x32xf32>
    %301 = vector.extract_strided_slice %299 {offsets = [0, 0], sizes = [2, 32], strides = [1, 1]} : vector<2x96xf32> to vector<2x32xf32>
    %302 = arith.addf %300, %301 : vector<2x32xf32>
    %303 = arith.negf %302 : vector<2x32xf32>
    %304 = math.exp %303 : vector<2x32xf32>
    %cst_71 = arith.constant 1.000000e+00 : f32
    %305 = vector.broadcast %cst_71 : f32 to vector<2x32xf32>
    %306 = arith.addf %305, %304 : vector<2x32xf32>
    %307 = arith.divf %305, %306 : vector<2x32xf32>
    %308 = vector.extract_strided_slice %298 {offsets = [0, 32], sizes = [2, 32], strides = [1, 1]} : vector<2x96xf32> to vector<2x32xf32>
    %309 = vector.extract_strided_slice %299 {offsets = [0, 32], sizes = [2, 32], strides = [1, 1]} : vector<2x96xf32> to vector<2x32xf32>
    %310 = arith.addf %308, %309 : vector<2x32xf32>
    %311 = arith.negf %310 : vector<2x32xf32>
    %312 = math.exp %311 : vector<2x32xf32>
    %cst_72 = arith.constant 1.000000e+00 : f32
    %313 = vector.broadcast %cst_72 : f32 to vector<2x32xf32>
    %314 = arith.addf %313, %312 : vector<2x32xf32>
    %315 = arith.divf %313, %314 : vector<2x32xf32>
    %316 = vector.extract_strided_slice %298 {offsets = [0, 64], sizes = [2, 32], strides = [1, 1]} : vector<2x96xf32> to vector<2x32xf32>
    %317 = vector.extract_strided_slice %299 {offsets = [0, 64], sizes = [2, 32], strides = [1, 1]} : vector<2x96xf32> to vector<2x32xf32>
    %318 = arith.addf %317, %86 : vector<2x32xf32>
    %319 = arith.mulf %307, %318 : vector<2x32xf32>
    %320 = arith.addf %316, %319 : vector<2x32xf32>
    %321 = math.tanh %320 : vector<2x32xf32>
    %cst_73 = arith.constant 1.000000e+00 : f32
    %322 = vector.broadcast %cst_73 : f32 to vector<2x32xf32>
    %323 = arith.subf %322, %315 : vector<2x32xf32>
    %324 = arith.mulf %323, %321 : vector<2x32xf32>
    %325 = arith.mulf %315, %250 : vector<2x32xf32>
    %326 = arith.addf %324, %325 : vector<2x32xf32>
    %cst_74 = arith.constant dense<0.000000e+00> : vector<2xf32>
    %327 = vector.multi_reduction <add>, %326, %cst_74 [1] : vector<2x32xf32> to vector<2xf32>
    %328 = vector.shape_cast %327 : vector<2xf32> to vector<2x1xf32>
    %cst_75 = arith.constant 3.200000e+01 : f32
    %329 = vector.broadcast %cst_75 : f32 to vector<2x1xf32>
    %330 = arith.divf %328, %329 : vector<2x1xf32>
    %331 = arith.mulf %326, %326 : vector<2x32xf32>
    %cst_76 = arith.constant dense<0.000000e+00> : vector<2xf32>
    %332 = vector.multi_reduction <add>, %331, %cst_76 [1] : vector<2x32xf32> to vector<2xf32>
    %333 = vector.shape_cast %332 : vector<2xf32> to vector<2x1xf32>
    %cst_77 = arith.constant 3.200000e+01 : f32
    %334 = vector.broadcast %cst_77 : f32 to vector<2x1xf32>
    %335 = arith.divf %333, %334 : vector<2x1xf32>
    %336 = vector.broadcast %330 : vector<2x1xf32> to vector<2x32xf32>
    %337 = arith.subf %326, %336 : vector<2x32xf32>
    %338 = arith.mulf %92, %337 : vector<2x32xf32>
    %339 = arith.mulf %330, %330 : vector<2x1xf32>
    %340 = arith.subf %335, %339 : vector<2x1xf32>
    %cst_78 = arith.constant 9.99999974E-6 : f32
    %341 = vector.broadcast %cst_78 : f32 to vector<2x1xf32>
    %342 = arith.addf %340, %341 : vector<2x1xf32>
    %343 = math.rsqrt %342 : vector<2x1xf32>
    %344 = vector.broadcast %343 : vector<2x1xf32> to vector<2x32xf32>
    %345 = arith.mulf %338, %344 : vector<2x32xf32>
    %346 = arith.addf %345, %95 : vector<2x32xf32>
    %347 = tpu.concatenate %346, %295 in 1 : vector<2x32xf32>, vector<2x16xf32> -> vector<2x48xf32>
    %cst_79 = arith.constant dense<0.000000e+00> : vector<2x64xf32>
    %348 = tpu.matmul %347, %78, %cst_79 {dimension_numbers = #tpu.dot_dimension_numbers<[1], [0], [0], [1], [0, 0, 1, 1], [], []>} : vector<2x48xf32>, vector<48x64xf32>, vector<2x64xf32> -> vector<2x64xf32>
    %349 = arith.addf %348, %89 : vector<2x64xf32>
    %350 = vector.extract_strided_slice %349 {offsets = [0, 0], sizes = [2, 16], strides = [1, 1]} : vector<2x64xf32> to vector<2x16xf32>
    %351 = arith.negf %350 : vector<2x16xf32>
    %352 = math.exp %351 : vector<2x16xf32>
    %cst_80 = arith.constant 1.000000e+00 : f32
    %353 = vector.broadcast %cst_80 : f32 to vector<2x16xf32>
    %354 = arith.addf %353, %352 : vector<2x16xf32>
    %355 = arith.divf %353, %354 : vector<2x16xf32>
    %356 = vector.extract_strided_slice %349 {offsets = [0, 16], sizes = [2, 16], strides = [1, 1]} : vector<2x64xf32> to vector<2x16xf32>
    %357 = arith.negf %356 : vector<2x16xf32>
    %358 = math.exp %357 : vector<2x16xf32>
    %cst_81 = arith.constant 1.000000e+00 : f32
    %359 = vector.broadcast %cst_81 : f32 to vector<2x16xf32>
    %360 = arith.addf %359, %358 : vector<2x16xf32>
    %361 = arith.divf %359, %360 : vector<2x16xf32>
    %362 = vector.extract_strided_slice %349 {offsets = [0, 32], sizes = [2, 16], strides = [1, 1]} : vector<2x64xf32> to vector<2x16xf32>
    %363 = vector.extract_strided_slice %349 {offsets = [0, 48], sizes = [2, 16], strides = [1, 1]} : vector<2x64xf32> to vector<2x16xf32>
    %364 = arith.mulf %355, %363 : vector<2x16xf32>
    %365 = arith.addf %362, %364 : vector<2x16xf32>
    %366 = math.tanh %365 : vector<2x16xf32>
    %cst_82 = arith.constant 1.000000e+00 : f32
    %367 = vector.broadcast %cst_82 : f32 to vector<2x16xf32>
    %368 = arith.subf %367, %361 : vector<2x16xf32>
    %369 = arith.mulf %368, %366 : vector<2x16xf32>
    %370 = arith.mulf %361, %295 : vector<2x16xf32>
    %371 = arith.addf %369, %370 : vector<2x16xf32>
    %cst_83 = arith.constant dense<0.000000e+00> : vector<2xf32>
    %372 = vector.multi_reduction <add>, %371, %cst_83 [1] : vector<2x16xf32> to vector<2xf32>
    %373 = vector.shape_cast %372 : vector<2xf32> to vector<2x1xf32>
    %cst_84 = arith.constant 1.600000e+01 : f32
    %374 = vector.broadcast %cst_84 : f32 to vector<2x1xf32>
    %375 = arith.divf %373, %374 : vector<2x1xf32>
    %376 = arith.mulf %371, %371 : vector<2x16xf32>
    %cst_85 = arith.constant dense<0.000000e+00> : vector<2xf32>
    %377 = vector.multi_reduction <add>, %376, %cst_85 [1] : vector<2x16xf32> to vector<2xf32>
    %378 = vector.shape_cast %377 : vector<2xf32> to vector<2x1xf32>
    %cst_86 = arith.constant 1.600000e+01 : f32
    %379 = vector.broadcast %cst_86 : f32 to vector<2x1xf32>
    %380 = arith.divf %378, %379 : vector<2x1xf32>
    %381 = vector.broadcast %375 : vector<2x1xf32> to vector<2x16xf32>
    %382 = arith.subf %371, %381 : vector<2x16xf32>
    %383 = arith.mulf %98, %382 : vector<2x16xf32>
    %384 = arith.mulf %375, %375 : vector<2x1xf32>
    %385 = arith.subf %380, %384 : vector<2x1xf32>
    %cst_87 = arith.constant 9.99999974E-6 : f32
    %386 = vector.broadcast %cst_87 : f32 to vector<2x1xf32>
    %387 = arith.addf %385, %386 : vector<2x1xf32>
    %388 = math.rsqrt %387 : vector<2x1xf32>
    %389 = vector.broadcast %388 : vector<2x1xf32> to vector<2x16xf32>
    %390 = arith.mulf %383, %389 : vector<2x16xf32>
    %391 = arith.addf %390, %101 : vector<2x16xf32>
    %392 = vector.extract_strided_slice %83 {offsets = [3, 0], sizes = [1, 96], strides = [1, 1]} : vector<16x96xf32> to vector<1x96xf32>
    %393 = vector.extract_strided_slice %83 {offsets = [11, 0], sizes = [1, 96], strides = [1, 1]} : vector<16x96xf32> to vector<1x96xf32>
    %394 = tpu.concatenate %392, %393 in 0 : vector<1x96xf32>, vector<1x96xf32> -> vector<2x96xf32>
    %cst_88 = arith.constant dense<0.000000e+00> : vector<2x96xf32>
    %395 = tpu.matmul %346, %77, %cst_88 {dimension_numbers = #tpu.dot_dimension_numbers<[1], [0], [0], [1], [0, 0, 1, 1], [], []>} : vector<2x32xf32>, vector<32x96xf32>, vector<2x96xf32> -> vector<2x96xf32>
    %396 = vector.extract_strided_slice %394 {offsets = [0, 0], sizes = [2, 32], strides = [1, 1]} : vector<2x96xf32> to vector<2x32xf32>
    %397 = vector.extract_strided_slice %395 {offsets = [0, 0], sizes = [2, 32], strides = [1, 1]} : vector<2x96xf32> to vector<2x32xf32>
    %398 = arith.addf %396, %397 : vector<2x32xf32>
    %399 = arith.negf %398 : vector<2x32xf32>
    %400 = math.exp %399 : vector<2x32xf32>
    %cst_89 = arith.constant 1.000000e+00 : f32
    %401 = vector.broadcast %cst_89 : f32 to vector<2x32xf32>
    %402 = arith.addf %401, %400 : vector<2x32xf32>
    %403 = arith.divf %401, %402 : vector<2x32xf32>
    %404 = vector.extract_strided_slice %394 {offsets = [0, 32], sizes = [2, 32], strides = [1, 1]} : vector<2x96xf32> to vector<2x32xf32>
    %405 = vector.extract_strided_slice %395 {offsets = [0, 32], sizes = [2, 32], strides = [1, 1]} : vector<2x96xf32> to vector<2x32xf32>
    %406 = arith.addf %404, %405 : vector<2x32xf32>
    %407 = arith.negf %406 : vector<2x32xf32>
    %408 = math.exp %407 : vector<2x32xf32>
    %cst_90 = arith.constant 1.000000e+00 : f32
    %409 = vector.broadcast %cst_90 : f32 to vector<2x32xf32>
    %410 = arith.addf %409, %408 : vector<2x32xf32>
    %411 = arith.divf %409, %410 : vector<2x32xf32>
    %412 = vector.extract_strided_slice %394 {offsets = [0, 64], sizes = [2, 32], strides = [1, 1]} : vector<2x96xf32> to vector<2x32xf32>
    %413 = vector.extract_strided_slice %395 {offsets = [0, 64], sizes = [2, 32], strides = [1, 1]} : vector<2x96xf32> to vector<2x32xf32>
    %414 = arith.addf %413, %86 : vector<2x32xf32>
    %415 = arith.mulf %403, %414 : vector<2x32xf32>
    %416 = arith.addf %412, %415 : vector<2x32xf32>
    %417 = math.tanh %416 : vector<2x32xf32>
    %cst_91 = arith.constant 1.000000e+00 : f32
    %418 = vector.broadcast %cst_91 : f32 to vector<2x32xf32>
    %419 = arith.subf %418, %411 : vector<2x32xf32>
    %420 = arith.mulf %419, %417 : vector<2x32xf32>
    %421 = arith.mulf %411, %346 : vector<2x32xf32>
    %422 = arith.addf %420, %421 : vector<2x32xf32>
    %cst_92 = arith.constant dense<0.000000e+00> : vector<2xf32>
    %423 = vector.multi_reduction <add>, %422, %cst_92 [1] : vector<2x32xf32> to vector<2xf32>
    %424 = vector.shape_cast %423 : vector<2xf32> to vector<2x1xf32>
    %cst_93 = arith.constant 3.200000e+01 : f32
    %425 = vector.broadcast %cst_93 : f32 to vector<2x1xf32>
    %426 = arith.divf %424, %425 : vector<2x1xf32>
    %427 = arith.mulf %422, %422 : vector<2x32xf32>
    %cst_94 = arith.constant dense<0.000000e+00> : vector<2xf32>
    %428 = vector.multi_reduction <add>, %427, %cst_94 [1] : vector<2x32xf32> to vector<2xf32>
    %429 = vector.shape_cast %428 : vector<2xf32> to vector<2x1xf32>
    %cst_95 = arith.constant 3.200000e+01 : f32
    %430 = vector.broadcast %cst_95 : f32 to vector<2x1xf32>
    %431 = arith.divf %429, %430 : vector<2x1xf32>
    %432 = vector.broadcast %426 : vector<2x1xf32> to vector<2x32xf32>
    %433 = arith.subf %422, %432 : vector<2x32xf32>
    %434 = arith.mulf %92, %433 : vector<2x32xf32>
    %435 = arith.mulf %426, %426 : vector<2x1xf32>
    %436 = arith.subf %431, %435 : vector<2x1xf32>
    %cst_96 = arith.constant 9.99999974E-6 : f32
    %437 = vector.broadcast %cst_96 : f32 to vector<2x1xf32>
    %438 = arith.addf %436, %437 : vector<2x1xf32>
    %439 = math.rsqrt %438 : vector<2x1xf32>
    %440 = vector.broadcast %439 : vector<2x1xf32> to vector<2x32xf32>
    %441 = arith.mulf %434, %440 : vector<2x32xf32>
    %442 = arith.addf %441, %95 : vector<2x32xf32>
    %443 = tpu.concatenate %442, %391 in 1 : vector<2x32xf32>, vector<2x16xf32> -> vector<2x48xf32>
    %cst_97 = arith.constant dense<0.000000e+00> : vector<2x64xf32>
    %444 = tpu.matmul %443, %78, %cst_97 {dimension_numbers = #tpu.dot_dimension_numbers<[1], [0], [0], [1], [0, 0, 1, 1], [], []>} : vector<2x48xf32>, vector<48x64xf32>, vector<2x64xf32> -> vector<2x64xf32>
    %445 = arith.addf %444, %89 : vector<2x64xf32>
    %446 = vector.extract_strided_slice %445 {offsets = [0, 0], sizes = [2, 16], strides = [1, 1]} : vector<2x64xf32> to vector<2x16xf32>
    %447 = arith.negf %446 : vector<2x16xf32>
    %448 = math.exp %447 : vector<2x16xf32>
    %cst_98 = arith.constant 1.000000e+00 : f32
    %449 = vector.broadcast %cst_98 : f32 to vector<2x16xf32>
    %450 = arith.addf %449, %448 : vector<2x16xf32>
    %451 = arith.divf %449, %450 : vector<2x16xf32>
    %452 = vector.extract_strided_slice %445 {offsets = [0, 16], sizes = [2, 16], strides = [1, 1]} : vector<2x64xf32> to vector<2x16xf32>
    %453 = arith.negf %452 : vector<2x16xf32>
    %454 = math.exp %453 : vector<2x16xf32>
    %cst_99 = arith.constant 1.000000e+00 : f32
    %455 = vector.broadcast %cst_99 : f32 to vector<2x16xf32>
    %456 = arith.addf %455, %454 : vector<2x16xf32>
    %457 = arith.divf %455, %456 : vector<2x16xf32>
    %458 = vector.extract_strided_slice %445 {offsets = [0, 32], sizes = [2, 16], strides = [1, 1]} : vector<2x64xf32> to vector<2x16xf32>
    %459 = vector.extract_strided_slice %445 {offsets = [0, 48], sizes = [2, 16], strides = [1, 1]} : vector<2x64xf32> to vector<2x16xf32>
    %460 = arith.mulf %451, %459 : vector<2x16xf32>
    %461 = arith.addf %458, %460 : vector<2x16xf32>
    %462 = math.tanh %461 : vector<2x16xf32>
    %cst_100 = arith.constant 1.000000e+00 : f32
    %463 = vector.broadcast %cst_100 : f32 to vector<2x16xf32>
    %464 = arith.subf %463, %457 : vector<2x16xf32>
    %465 = arith.mulf %464, %462 : vector<2x16xf32>
    %466 = arith.mulf %457, %391 : vector<2x16xf32>
    %467 = arith.addf %465, %466 : vector<2x16xf32>
    %cst_101 = arith.constant dense<0.000000e+00> : vector<2xf32>
    %468 = vector.multi_reduction <add>, %467, %cst_101 [1] : vector<2x16xf32> to vector<2xf32>
    %469 = vector.shape_cast %468 : vector<2xf32> to vector<2x1xf32>
    %cst_102 = arith.constant 1.600000e+01 : f32
    %470 = vector.broadcast %cst_102 : f32 to vector<2x1xf32>
    %471 = arith.divf %469, %470 : vector<2x1xf32>
    %472 = arith.mulf %467, %467 : vector<2x16xf32>
    %cst_103 = arith.constant dense<0.000000e+00> : vector<2xf32>
    %473 = vector.multi_reduction <add>, %472, %cst_103 [1] : vector<2x16xf32> to vector<2xf32>
    %474 = vector.shape_cast %473 : vector<2xf32> to vector<2x1xf32>
    %cst_104 = arith.constant 1.600000e+01 : f32
    %475 = vector.broadcast %cst_104 : f32 to vector<2x1xf32>
    %476 = arith.divf %474, %475 : vector<2x1xf32>
    %477 = vector.broadcast %471 : vector<2x1xf32> to vector<2x16xf32>
    %478 = arith.subf %467, %477 : vector<2x16xf32>
    %479 = arith.mulf %98, %478 : vector<2x16xf32>
    %480 = arith.mulf %471, %471 : vector<2x1xf32>
    %481 = arith.subf %476, %480 : vector<2x1xf32>
    %cst_105 = arith.constant 9.99999974E-6 : f32
    %482 = vector.broadcast %cst_105 : f32 to vector<2x1xf32>
    %483 = arith.addf %481, %482 : vector<2x1xf32>
    %484 = math.rsqrt %483 : vector<2x1xf32>
    %485 = vector.broadcast %484 : vector<2x1xf32> to vector<2x16xf32>
    %486 = arith.mulf %479, %485 : vector<2x16xf32>
    %487 = arith.addf %486, %101 : vector<2x16xf32>
    %488 = vector.extract_strided_slice %83 {offsets = [4, 0], sizes = [1, 96], strides = [1, 1]} : vector<16x96xf32> to vector<1x96xf32>
    %489 = vector.extract_strided_slice %83 {offsets = [12, 0], sizes = [1, 96], strides = [1, 1]} : vector<16x96xf32> to vector<1x96xf32>
    %490 = tpu.concatenate %488, %489 in 0 : vector<1x96xf32>, vector<1x96xf32> -> vector<2x96xf32>
    %cst_106 = arith.constant dense<0.000000e+00> : vector<2x96xf32>
    %491 = tpu.matmul %442, %77, %cst_106 {dimension_numbers = #tpu.dot_dimension_numbers<[1], [0], [0], [1], [0, 0, 1, 1], [], []>} : vector<2x32xf32>, vector<32x96xf32>, vector<2x96xf32> -> vector<2x96xf32>
    %492 = vector.extract_strided_slice %490 {offsets = [0, 0], sizes = [2, 32], strides = [1, 1]} : vector<2x96xf32> to vector<2x32xf32>
    %493 = vector.extract_strided_slice %491 {offsets = [0, 0], sizes = [2, 32], strides = [1, 1]} : vector<2x96xf32> to vector<2x32xf32>
    %494 = arith.addf %492, %493 : vector<2x32xf32>
    %495 = arith.negf %494 : vector<2x32xf32>
    %496 = math.exp %495 : vector<2x32xf32>
    %cst_107 = arith.constant 1.000000e+00 : f32
    %497 = vector.broadcast %cst_107 : f32 to vector<2x32xf32>
    %498 = arith.addf %497, %496 : vector<2x32xf32>
    %499 = arith.divf %497, %498 : vector<2x32xf32>
    %500 = vector.extract_strided_slice %490 {offsets = [0, 32], sizes = [2, 32], strides = [1, 1]} : vector<2x96xf32> to vector<2x32xf32>
    %501 = vector.extract_strided_slice %491 {offsets = [0, 32], sizes = [2, 32], strides = [1, 1]} : vector<2x96xf32> to vector<2x32xf32>
    %502 = arith.addf %500, %501 : vector<2x32xf32>
    %503 = arith.negf %502 : vector<2x32xf32>
    %504 = math.exp %503 : vector<2x32xf32>
    %cst_108 = arith.constant 1.000000e+00 : f32
    %505 = vector.broadcast %cst_108 : f32 to vector<2x32xf32>
    %506 = arith.addf %505, %504 : vector<2x32xf32>
    %507 = arith.divf %505, %506 : vector<2x32xf32>
    %508 = vector.extract_strided_slice %490 {offsets = [0, 64], sizes = [2, 32], strides = [1, 1]} : vector<2x96xf32> to vector<2x32xf32>
    %509 = vector.extract_strided_slice %491 {offsets = [0, 64], sizes = [2, 32], strides = [1, 1]} : vector<2x96xf32> to vector<2x32xf32>
    %510 = arith.addf %509, %86 : vector<2x32xf32>
    %511 = arith.mulf %499, %510 : vector<2x32xf32>
    %512 = arith.addf %508, %511 : vector<2x32xf32>
    %513 = math.tanh %512 : vector<2x32xf32>
    %cst_109 = arith.constant 1.000000e+00 : f32
    %514 = vector.broadcast %cst_109 : f32 to vector<2x32xf32>
    %515 = arith.subf %514, %507 : vector<2x32xf32>
    %516 = arith.mulf %515, %513 : vector<2x32xf32>
    %517 = arith.mulf %507, %442 : vector<2x32xf32>
    %518 = arith.addf %516, %517 : vector<2x32xf32>
    %cst_110 = arith.constant dense<0.000000e+00> : vector<2xf32>
    %519 = vector.multi_reduction <add>, %518, %cst_110 [1] : vector<2x32xf32> to vector<2xf32>
    %520 = vector.shape_cast %519 : vector<2xf32> to vector<2x1xf32>
    %cst_111 = arith.constant 3.200000e+01 : f32
    %521 = vector.broadcast %cst_111 : f32 to vector<2x1xf32>
    %522 = arith.divf %520, %521 : vector<2x1xf32>
    %523 = arith.mulf %518, %518 : vector<2x32xf32>
    %cst_112 = arith.constant dense<0.000000e+00> : vector<2xf32>
    %524 = vector.multi_reduction <add>, %523, %cst_112 [1] : vector<2x32xf32> to vector<2xf32>
    %525 = vector.shape_cast %524 : vector<2xf32> to vector<2x1xf32>
    %cst_113 = arith.constant 3.200000e+01 : f32
    %526 = vector.broadcast %cst_113 : f32 to vector<2x1xf32>
    %527 = arith.divf %525, %526 : vector<2x1xf32>
    %528 = vector.broadcast %522 : vector<2x1xf32> to vector<2x32xf32>
    %529 = arith.subf %518, %528 : vector<2x32xf32>
    %530 = arith.mulf %92, %529 : vector<2x32xf32>
    %531 = arith.mulf %522, %522 : vector<2x1xf32>
    %532 = arith.subf %527, %531 : vector<2x1xf32>
    %cst_114 = arith.constant 9.99999974E-6 : f32
    %533 = vector.broadcast %cst_114 : f32 to vector<2x1xf32>
    %534 = arith.addf %532, %533 : vector<2x1xf32>
    %535 = math.rsqrt %534 : vector<2x1xf32>
    %536 = vector.broadcast %535 : vector<2x1xf32> to vector<2x32xf32>
    %537 = arith.mulf %530, %536 : vector<2x32xf32>
    %538 = arith.addf %537, %95 : vector<2x32xf32>
    %539 = tpu.concatenate %538, %487 in 1 : vector<2x32xf32>, vector<2x16xf32> -> vector<2x48xf32>
    %cst_115 = arith.constant dense<0.000000e+00> : vector<2x64xf32>
    %540 = tpu.matmul %539, %78, %cst_115 {dimension_numbers = #tpu.dot_dimension_numbers<[1], [0], [0], [1], [0, 0, 1, 1], [], []>} : vector<2x48xf32>, vector<48x64xf32>, vector<2x64xf32> -> vector<2x64xf32>
    %541 = arith.addf %540, %89 : vector<2x64xf32>
    %542 = vector.extract_strided_slice %541 {offsets = [0, 0], sizes = [2, 16], strides = [1, 1]} : vector<2x64xf32> to vector<2x16xf32>
    %543 = arith.negf %542 : vector<2x16xf32>
    %544 = math.exp %543 : vector<2x16xf32>
    %cst_116 = arith.constant 1.000000e+00 : f32
    %545 = vector.broadcast %cst_116 : f32 to vector<2x16xf32>
    %546 = arith.addf %545, %544 : vector<2x16xf32>
    %547 = arith.divf %545, %546 : vector<2x16xf32>
    %548 = vector.extract_strided_slice %541 {offsets = [0, 16], sizes = [2, 16], strides = [1, 1]} : vector<2x64xf32> to vector<2x16xf32>
    %549 = arith.negf %548 : vector<2x16xf32>
    %550 = math.exp %549 : vector<2x16xf32>
    %cst_117 = arith.constant 1.000000e+00 : f32
    %551 = vector.broadcast %cst_117 : f32 to vector<2x16xf32>
    %552 = arith.addf %551, %550 : vector<2x16xf32>
    %553 = arith.divf %551, %552 : vector<2x16xf32>
    %554 = vector.extract_strided_slice %541 {offsets = [0, 32], sizes = [2, 16], strides = [1, 1]} : vector<2x64xf32> to vector<2x16xf32>
    %555 = vector.extract_strided_slice %541 {offsets = [0, 48], sizes = [2, 16], strides = [1, 1]} : vector<2x64xf32> to vector<2x16xf32>
    %556 = arith.mulf %547, %555 : vector<2x16xf32>
    %557 = arith.addf %554, %556 : vector<2x16xf32>
    %558 = math.tanh %557 : vector<2x16xf32>
    %cst_118 = arith.constant 1.000000e+00 : f32
    %559 = vector.broadcast %cst_118 : f32 to vector<2x16xf32>
    %560 = arith.subf %559, %553 : vector<2x16xf32>
    %561 = arith.mulf %560, %558 : vector<2x16xf32>
    %562 = arith.mulf %553, %487 : vector<2x16xf32>
    %563 = arith.addf %561, %562 : vector<2x16xf32>
    %cst_119 = arith.constant dense<0.000000e+00> : vector<2xf32>
    %564 = vector.multi_reduction <add>, %563, %cst_119 [1] : vector<2x16xf32> to vector<2xf32>
    %565 = vector.shape_cast %564 : vector<2xf32> to vector<2x1xf32>
    %cst_120 = arith.constant 1.600000e+01 : f32
    %566 = vector.broadcast %cst_120 : f32 to vector<2x1xf32>
    %567 = arith.divf %565, %566 : vector<2x1xf32>
    %568 = arith.mulf %563, %563 : vector<2x16xf32>
    %cst_121 = arith.constant dense<0.000000e+00> : vector<2xf32>
    %569 = vector.multi_reduction <add>, %568, %cst_121 [1] : vector<2x16xf32> to vector<2xf32>
    %570 = vector.shape_cast %569 : vector<2xf32> to vector<2x1xf32>
    %cst_122 = arith.constant 1.600000e+01 : f32
    %571 = vector.broadcast %cst_122 : f32 to vector<2x1xf32>
    %572 = arith.divf %570, %571 : vector<2x1xf32>
    %573 = vector.broadcast %567 : vector<2x1xf32> to vector<2x16xf32>
    %574 = arith.subf %563, %573 : vector<2x16xf32>
    %575 = arith.mulf %98, %574 : vector<2x16xf32>
    %576 = arith.mulf %567, %567 : vector<2x1xf32>
    %577 = arith.subf %572, %576 : vector<2x1xf32>
    %cst_123 = arith.constant 9.99999974E-6 : f32
    %578 = vector.broadcast %cst_123 : f32 to vector<2x1xf32>
    %579 = arith.addf %577, %578 : vector<2x1xf32>
    %580 = math.rsqrt %579 : vector<2x1xf32>
    %581 = vector.broadcast %580 : vector<2x1xf32> to vector<2x16xf32>
    %582 = arith.mulf %575, %581 : vector<2x16xf32>
    %583 = arith.addf %582, %101 : vector<2x16xf32>
    %584 = vector.extract_strided_slice %83 {offsets = [5, 0], sizes = [1, 96], strides = [1, 1]} : vector<16x96xf32> to vector<1x96xf32>
    %585 = vector.extract_strided_slice %83 {offsets = [13, 0], sizes = [1, 96], strides = [1, 1]} : vector<16x96xf32> to vector<1x96xf32>
    %586 = tpu.concatenate %584, %585 in 0 : vector<1x96xf32>, vector<1x96xf32> -> vector<2x96xf32>
    %cst_124 = arith.constant dense<0.000000e+00> : vector<2x96xf32>
    %587 = tpu.matmul %538, %77, %cst_124 {dimension_numbers = #tpu.dot_dimension_numbers<[1], [0], [0], [1], [0, 0, 1, 1], [], []>} : vector<2x32xf32>, vector<32x96xf32>, vector<2x96xf32> -> vector<2x96xf32>
    %588 = vector.extract_strided_slice %586 {offsets = [0, 0], sizes = [2, 32], strides = [1, 1]} : vector<2x96xf32> to vector<2x32xf32>
    %589 = vector.extract_strided_slice %587 {offsets = [0, 0], sizes = [2, 32], strides = [1, 1]} : vector<2x96xf32> to vector<2x32xf32>
    %590 = arith.addf %588, %589 : vector<2x32xf32>
    %591 = arith.negf %590 : vector<2x32xf32>
    %592 = math.exp %591 : vector<2x32xf32>
    %cst_125 = arith.constant 1.000000e+00 : f32
    %593 = vector.broadcast %cst_125 : f32 to vector<2x32xf32>
    %594 = arith.addf %593, %592 : vector<2x32xf32>
    %595 = arith.divf %593, %594 : vector<2x32xf32>
    %596 = vector.extract_strided_slice %586 {offsets = [0, 32], sizes = [2, 32], strides = [1, 1]} : vector<2x96xf32> to vector<2x32xf32>
    %597 = vector.extract_strided_slice %587 {offsets = [0, 32], sizes = [2, 32], strides = [1, 1]} : vector<2x96xf32> to vector<2x32xf32>
    %598 = arith.addf %596, %597 : vector<2x32xf32>
    %599 = arith.negf %598 : vector<2x32xf32>
    %600 = math.exp %599 : vector<2x32xf32>
    %cst_126 = arith.constant 1.000000e+00 : f32
    %601 = vector.broadcast %cst_126 : f32 to vector<2x32xf32>
    %602 = arith.addf %601, %600 : vector<2x32xf32>
    %603 = arith.divf %601, %602 : vector<2x32xf32>
    %604 = vector.extract_strided_slice %586 {offsets = [0, 64], sizes = [2, 32], strides = [1, 1]} : vector<2x96xf32> to vector<2x32xf32>
    %605 = vector.extract_strided_slice %587 {offsets = [0, 64], sizes = [2, 32], strides = [1, 1]} : vector<2x96xf32> to vector<2x32xf32>
    %606 = arith.addf %605, %86 : vector<2x32xf32>
    %607 = arith.mulf %595, %606 : vector<2x32xf32>
    %608 = arith.addf %604, %607 : vector<2x32xf32>
    %609 = math.tanh %608 : vector<2x32xf32>
    %cst_127 = arith.constant 1.000000e+00 : f32
    %610 = vector.broadcast %cst_127 : f32 to vector<2x32xf32>
    %611 = arith.subf %610, %603 : vector<2x32xf32>
    %612 = arith.mulf %611, %609 : vector<2x32xf32>
    %613 = arith.mulf %603, %538 : vector<2x32xf32>
    %614 = arith.addf %612, %613 : vector<2x32xf32>
    %cst_128 = arith.constant dense<0.000000e+00> : vector<2xf32>
    %615 = vector.multi_reduction <add>, %614, %cst_128 [1] : vector<2x32xf32> to vector<2xf32>
    %616 = vector.shape_cast %615 : vector<2xf32> to vector<2x1xf32>
    %cst_129 = arith.constant 3.200000e+01 : f32
    %617 = vector.broadcast %cst_129 : f32 to vector<2x1xf32>
    %618 = arith.divf %616, %617 : vector<2x1xf32>
    %619 = arith.mulf %614, %614 : vector<2x32xf32>
    %cst_130 = arith.constant dense<0.000000e+00> : vector<2xf32>
    %620 = vector.multi_reduction <add>, %619, %cst_130 [1] : vector<2x32xf32> to vector<2xf32>
    %621 = vector.shape_cast %620 : vector<2xf32> to vector<2x1xf32>
    %cst_131 = arith.constant 3.200000e+01 : f32
    %622 = vector.broadcast %cst_131 : f32 to vector<2x1xf32>
    %623 = arith.divf %621, %622 : vector<2x1xf32>
    %624 = vector.broadcast %618 : vector<2x1xf32> to vector<2x32xf32>
    %625 = arith.subf %614, %624 : vector<2x32xf32>
    %626 = arith.mulf %92, %625 : vector<2x32xf32>
    %627 = arith.mulf %618, %618 : vector<2x1xf32>
    %628 = arith.subf %623, %627 : vector<2x1xf32>
    %cst_132 = arith.constant 9.99999974E-6 : f32
    %629 = vector.broadcast %cst_132 : f32 to vector<2x1xf32>
    %630 = arith.addf %628, %629 : vector<2x1xf32>
    %631 = math.rsqrt %630 : vector<2x1xf32>
    %632 = vector.broadcast %631 : vector<2x1xf32> to vector<2x32xf32>
    %633 = arith.mulf %626, %632 : vector<2x32xf32>
    %634 = arith.addf %633, %95 : vector<2x32xf32>
    %635 = tpu.concatenate %634, %583 in 1 : vector<2x32xf32>, vector<2x16xf32> -> vector<2x48xf32>
    %cst_133 = arith.constant dense<0.000000e+00> : vector<2x64xf32>
    %636 = tpu.matmul %635, %78, %cst_133 {dimension_numbers = #tpu.dot_dimension_numbers<[1], [0], [0], [1], [0, 0, 1, 1], [], []>} : vector<2x48xf32>, vector<48x64xf32>, vector<2x64xf32> -> vector<2x64xf32>
    %637 = arith.addf %636, %89 : vector<2x64xf32>
    %638 = vector.extract_strided_slice %637 {offsets = [0, 0], sizes = [2, 16], strides = [1, 1]} : vector<2x64xf32> to vector<2x16xf32>
    %639 = arith.negf %638 : vector<2x16xf32>
    %640 = math.exp %639 : vector<2x16xf32>
    %cst_134 = arith.constant 1.000000e+00 : f32
    %641 = vector.broadcast %cst_134 : f32 to vector<2x16xf32>
    %642 = arith.addf %641, %640 : vector<2x16xf32>
    %643 = arith.divf %641, %642 : vector<2x16xf32>
    %644 = vector.extract_strided_slice %637 {offsets = [0, 16], sizes = [2, 16], strides = [1, 1]} : vector<2x64xf32> to vector<2x16xf32>
    %645 = arith.negf %644 : vector<2x16xf32>
    %646 = math.exp %645 : vector<2x16xf32>
    %cst_135 = arith.constant 1.000000e+00 : f32
    %647 = vector.broadcast %cst_135 : f32 to vector<2x16xf32>
    %648 = arith.addf %647, %646 : vector<2x16xf32>
    %649 = arith.divf %647, %648 : vector<2x16xf32>
    %650 = vector.extract_strided_slice %637 {offsets = [0, 32], sizes = [2, 16], strides = [1, 1]} : vector<2x64xf32> to vector<2x16xf32>
    %651 = vector.extract_strided_slice %637 {offsets = [0, 48], sizes = [2, 16], strides = [1, 1]} : vector<2x64xf32> to vector<2x16xf32>
    %652 = arith.mulf %643, %651 : vector<2x16xf32>
    %653 = arith.addf %650, %652 : vector<2x16xf32>
    %654 = math.tanh %653 : vector<2x16xf32>
    %cst_136 = arith.constant 1.000000e+00 : f32
    %655 = vector.broadcast %cst_136 : f32 to vector<2x16xf32>
    %656 = arith.subf %655, %649 : vector<2x16xf32>
    %657 = arith.mulf %656, %654 : vector<2x16xf32>
    %658 = arith.mulf %649, %583 : vector<2x16xf32>
    %659 = arith.addf %657, %658 : vector<2x16xf32>
    %cst_137 = arith.constant dense<0.000000e+00> : vector<2xf32>
    %660 = vector.multi_reduction <add>, %659, %cst_137 [1] : vector<2x16xf32> to vector<2xf32>
    %661 = vector.shape_cast %660 : vector<2xf32> to vector<2x1xf32>
    %cst_138 = arith.constant 1.600000e+01 : f32
    %662 = vector.broadcast %cst_138 : f32 to vector<2x1xf32>
    %663 = arith.divf %661, %662 : vector<2x1xf32>
    %664 = arith.mulf %659, %659 : vector<2x16xf32>
    %cst_139 = arith.constant dense<0.000000e+00> : vector<2xf32>
    %665 = vector.multi_reduction <add>, %664, %cst_139 [1] : vector<2x16xf32> to vector<2xf32>
    %666 = vector.shape_cast %665 : vector<2xf32> to vector<2x1xf32>
    %cst_140 = arith.constant 1.600000e+01 : f32
    %667 = vector.broadcast %cst_140 : f32 to vector<2x1xf32>
    %668 = arith.divf %666, %667 : vector<2x1xf32>
    %669 = vector.broadcast %663 : vector<2x1xf32> to vector<2x16xf32>
    %670 = arith.subf %659, %669 : vector<2x16xf32>
    %671 = arith.mulf %98, %670 : vector<2x16xf32>
    %672 = arith.mulf %663, %663 : vector<2x1xf32>
    %673 = arith.subf %668, %672 : vector<2x1xf32>
    %cst_141 = arith.constant 9.99999974E-6 : f32
    %674 = vector.broadcast %cst_141 : f32 to vector<2x1xf32>
    %675 = arith.addf %673, %674 : vector<2x1xf32>
    %676 = math.rsqrt %675 : vector<2x1xf32>
    %677 = vector.broadcast %676 : vector<2x1xf32> to vector<2x16xf32>
    %678 = arith.mulf %671, %677 : vector<2x16xf32>
    %679 = arith.addf %678, %101 : vector<2x16xf32>
    %680 = vector.extract_strided_slice %83 {offsets = [6, 0], sizes = [1, 96], strides = [1, 1]} : vector<16x96xf32> to vector<1x96xf32>
    %681 = vector.extract_strided_slice %83 {offsets = [14, 0], sizes = [1, 96], strides = [1, 1]} : vector<16x96xf32> to vector<1x96xf32>
    %682 = tpu.concatenate %680, %681 in 0 : vector<1x96xf32>, vector<1x96xf32> -> vector<2x96xf32>
    %cst_142 = arith.constant dense<0.000000e+00> : vector<2x96xf32>
    %683 = tpu.matmul %634, %77, %cst_142 {dimension_numbers = #tpu.dot_dimension_numbers<[1], [0], [0], [1], [0, 0, 1, 1], [], []>} : vector<2x32xf32>, vector<32x96xf32>, vector<2x96xf32> -> vector<2x96xf32>
    %684 = vector.extract_strided_slice %682 {offsets = [0, 0], sizes = [2, 32], strides = [1, 1]} : vector<2x96xf32> to vector<2x32xf32>
    %685 = vector.extract_strided_slice %683 {offsets = [0, 0], sizes = [2, 32], strides = [1, 1]} : vector<2x96xf32> to vector<2x32xf32>
    %686 = arith.addf %684, %685 : vector<2x32xf32>
    %687 = arith.negf %686 : vector<2x32xf32>
    %688 = math.exp %687 : vector<2x32xf32>
    %cst_143 = arith.constant 1.000000e+00 : f32
    %689 = vector.broadcast %cst_143 : f32 to vector<2x32xf32>
    %690 = arith.addf %689, %688 : vector<2x32xf32>
    %691 = arith.divf %689, %690 : vector<2x32xf32>
    %692 = vector.extract_strided_slice %682 {offsets = [0, 32], sizes = [2, 32], strides = [1, 1]} : vector<2x96xf32> to vector<2x32xf32>
    %693 = vector.extract_strided_slice %683 {offsets = [0, 32], sizes = [2, 32], strides = [1, 1]} : vector<2x96xf32> to vector<2x32xf32>
    %694 = arith.addf %692, %693 : vector<2x32xf32>
    %695 = arith.negf %694 : vector<2x32xf32>
    %696 = math.exp %695 : vector<2x32xf32>
    %cst_144 = arith.constant 1.000000e+00 : f32
    %697 = vector.broadcast %cst_144 : f32 to vector<2x32xf32>
    %698 = arith.addf %697, %696 : vector<2x32xf32>
    %699 = arith.divf %697, %698 : vector<2x32xf32>
    %700 = vector.extract_strided_slice %682 {offsets = [0, 64], sizes = [2, 32], strides = [1, 1]} : vector<2x96xf32> to vector<2x32xf32>
    %701 = vector.extract_strided_slice %683 {offsets = [0, 64], sizes = [2, 32], strides = [1, 1]} : vector<2x96xf32> to vector<2x32xf32>
    %702 = arith.addf %701, %86 : vector<2x32xf32>
    %703 = arith.mulf %691, %702 : vector<2x32xf32>
    %704 = arith.addf %700, %703 : vector<2x32xf32>
    %705 = math.tanh %704 : vector<2x32xf32>
    %cst_145 = arith.constant 1.000000e+00 : f32
    %706 = vector.broadcast %cst_145 : f32 to vector<2x32xf32>
    %707 = arith.subf %706, %699 : vector<2x32xf32>
    %708 = arith.mulf %707, %705 : vector<2x32xf32>
    %709 = arith.mulf %699, %634 : vector<2x32xf32>
    %710 = arith.addf %708, %709 : vector<2x32xf32>
    %cst_146 = arith.constant dense<0.000000e+00> : vector<2xf32>
    %711 = vector.multi_reduction <add>, %710, %cst_146 [1] : vector<2x32xf32> to vector<2xf32>
    %712 = vector.shape_cast %711 : vector<2xf32> to vector<2x1xf32>
    %cst_147 = arith.constant 3.200000e+01 : f32
    %713 = vector.broadcast %cst_147 : f32 to vector<2x1xf32>
    %714 = arith.divf %712, %713 : vector<2x1xf32>
    %715 = arith.mulf %710, %710 : vector<2x32xf32>
    %cst_148 = arith.constant dense<0.000000e+00> : vector<2xf32>
    %716 = vector.multi_reduction <add>, %715, %cst_148 [1] : vector<2x32xf32> to vector<2xf32>
    %717 = vector.shape_cast %716 : vector<2xf32> to vector<2x1xf32>
    %cst_149 = arith.constant 3.200000e+01 : f32
    %718 = vector.broadcast %cst_149 : f32 to vector<2x1xf32>
    %719 = arith.divf %717, %718 : vector<2x1xf32>
    %720 = vector.broadcast %714 : vector<2x1xf32> to vector<2x32xf32>
    %721 = arith.subf %710, %720 : vector<2x32xf32>
    %722 = arith.mulf %92, %721 : vector<2x32xf32>
    %723 = arith.mulf %714, %714 : vector<2x1xf32>
    %724 = arith.subf %719, %723 : vector<2x1xf32>
    %cst_150 = arith.constant 9.99999974E-6 : f32
    %725 = vector.broadcast %cst_150 : f32 to vector<2x1xf32>
    %726 = arith.addf %724, %725 : vector<2x1xf32>
    %727 = math.rsqrt %726 : vector<2x1xf32>
    %728 = vector.broadcast %727 : vector<2x1xf32> to vector<2x32xf32>
    %729 = arith.mulf %722, %728 : vector<2x32xf32>
    %730 = arith.addf %729, %95 : vector<2x32xf32>
    %731 = tpu.concatenate %730, %679 in 1 : vector<2x32xf32>, vector<2x16xf32> -> vector<2x48xf32>
    %cst_151 = arith.constant dense<0.000000e+00> : vector<2x64xf32>
    %732 = tpu.matmul %731, %78, %cst_151 {dimension_numbers = #tpu.dot_dimension_numbers<[1], [0], [0], [1], [0, 0, 1, 1], [], []>} : vector<2x48xf32>, vector<48x64xf32>, vector<2x64xf32> -> vector<2x64xf32>
    %733 = arith.addf %732, %89 : vector<2x64xf32>
    %734 = vector.extract_strided_slice %733 {offsets = [0, 0], sizes = [2, 16], strides = [1, 1]} : vector<2x64xf32> to vector<2x16xf32>
    %735 = arith.negf %734 : vector<2x16xf32>
    %736 = math.exp %735 : vector<2x16xf32>
    %cst_152 = arith.constant 1.000000e+00 : f32
    %737 = vector.broadcast %cst_152 : f32 to vector<2x16xf32>
    %738 = arith.addf %737, %736 : vector<2x16xf32>
    %739 = arith.divf %737, %738 : vector<2x16xf32>
    %740 = vector.extract_strided_slice %733 {offsets = [0, 16], sizes = [2, 16], strides = [1, 1]} : vector<2x64xf32> to vector<2x16xf32>
    %741 = arith.negf %740 : vector<2x16xf32>
    %742 = math.exp %741 : vector<2x16xf32>
    %cst_153 = arith.constant 1.000000e+00 : f32
    %743 = vector.broadcast %cst_153 : f32 to vector<2x16xf32>
    %744 = arith.addf %743, %742 : vector<2x16xf32>
    %745 = arith.divf %743, %744 : vector<2x16xf32>
    %746 = vector.extract_strided_slice %733 {offsets = [0, 32], sizes = [2, 16], strides = [1, 1]} : vector<2x64xf32> to vector<2x16xf32>
    %747 = vector.extract_strided_slice %733 {offsets = [0, 48], sizes = [2, 16], strides = [1, 1]} : vector<2x64xf32> to vector<2x16xf32>
    %748 = arith.mulf %739, %747 : vector<2x16xf32>
    %749 = arith.addf %746, %748 : vector<2x16xf32>
    %750 = math.tanh %749 : vector<2x16xf32>
    %cst_154 = arith.constant 1.000000e+00 : f32
    %751 = vector.broadcast %cst_154 : f32 to vector<2x16xf32>
    %752 = arith.subf %751, %745 : vector<2x16xf32>
    %753 = arith.mulf %752, %750 : vector<2x16xf32>
    %754 = arith.mulf %745, %679 : vector<2x16xf32>
    %755 = arith.addf %753, %754 : vector<2x16xf32>
    %cst_155 = arith.constant dense<0.000000e+00> : vector<2xf32>
    %756 = vector.multi_reduction <add>, %755, %cst_155 [1] : vector<2x16xf32> to vector<2xf32>
    %757 = vector.shape_cast %756 : vector<2xf32> to vector<2x1xf32>
    %cst_156 = arith.constant 1.600000e+01 : f32
    %758 = vector.broadcast %cst_156 : f32 to vector<2x1xf32>
    %759 = arith.divf %757, %758 : vector<2x1xf32>
    %760 = arith.mulf %755, %755 : vector<2x16xf32>
    %cst_157 = arith.constant dense<0.000000e+00> : vector<2xf32>
    %761 = vector.multi_reduction <add>, %760, %cst_157 [1] : vector<2x16xf32> to vector<2xf32>
    %762 = vector.shape_cast %761 : vector<2xf32> to vector<2x1xf32>
    %cst_158 = arith.constant 1.600000e+01 : f32
    %763 = vector.broadcast %cst_158 : f32 to vector<2x1xf32>
    %764 = arith.divf %762, %763 : vector<2x1xf32>
    %765 = vector.broadcast %759 : vector<2x1xf32> to vector<2x16xf32>
    %766 = arith.subf %755, %765 : vector<2x16xf32>
    %767 = arith.mulf %98, %766 : vector<2x16xf32>
    %768 = arith.mulf %759, %759 : vector<2x1xf32>
    %769 = arith.subf %764, %768 : vector<2x1xf32>
    %cst_159 = arith.constant 9.99999974E-6 : f32
    %770 = vector.broadcast %cst_159 : f32 to vector<2x1xf32>
    %771 = arith.addf %769, %770 : vector<2x1xf32>
    %772 = math.rsqrt %771 : vector<2x1xf32>
    %773 = vector.broadcast %772 : vector<2x1xf32> to vector<2x16xf32>
    %774 = arith.mulf %767, %773 : vector<2x16xf32>
    %775 = arith.addf %774, %101 : vector<2x16xf32>
    %776 = vector.extract_strided_slice %83 {offsets = [7, 0], sizes = [1, 96], strides = [1, 1]} : vector<16x96xf32> to vector<1x96xf32>
    %777 = vector.extract_strided_slice %83 {offsets = [15, 0], sizes = [1, 96], strides = [1, 1]} : vector<16x96xf32> to vector<1x96xf32>
    %778 = tpu.concatenate %776, %777 in 0 : vector<1x96xf32>, vector<1x96xf32> -> vector<2x96xf32>
    %cst_160 = arith.constant dense<0.000000e+00> : vector<2x96xf32>
    %779 = tpu.matmul %730, %77, %cst_160 {dimension_numbers = #tpu.dot_dimension_numbers<[1], [0], [0], [1], [0, 0, 1, 1], [], []>} : vector<2x32xf32>, vector<32x96xf32>, vector<2x96xf32> -> vector<2x96xf32>
    %780 = vector.extract_strided_slice %778 {offsets = [0, 0], sizes = [2, 32], strides = [1, 1]} : vector<2x96xf32> to vector<2x32xf32>
    %781 = vector.extract_strided_slice %779 {offsets = [0, 0], sizes = [2, 32], strides = [1, 1]} : vector<2x96xf32> to vector<2x32xf32>
    %782 = arith.addf %780, %781 : vector<2x32xf32>
    %783 = arith.negf %782 : vector<2x32xf32>
    %784 = math.exp %783 : vector<2x32xf32>
    %cst_161 = arith.constant 1.000000e+00 : f32
    %785 = vector.broadcast %cst_161 : f32 to vector<2x32xf32>
    %786 = arith.addf %785, %784 : vector<2x32xf32>
    %787 = arith.divf %785, %786 : vector<2x32xf32>
    %788 = vector.extract_strided_slice %778 {offsets = [0, 32], sizes = [2, 32], strides = [1, 1]} : vector<2x96xf32> to vector<2x32xf32>
    %789 = vector.extract_strided_slice %779 {offsets = [0, 32], sizes = [2, 32], strides = [1, 1]} : vector<2x96xf32> to vector<2x32xf32>
    %790 = arith.addf %788, %789 : vector<2x32xf32>
    %791 = arith.negf %790 : vector<2x32xf32>
    %792 = math.exp %791 : vector<2x32xf32>
    %cst_162 = arith.constant 1.000000e+00 : f32
    %793 = vector.broadcast %cst_162 : f32 to vector<2x32xf32>
    %794 = arith.addf %793, %792 : vector<2x32xf32>
    %795 = arith.divf %793, %794 : vector<2x32xf32>
    %796 = vector.extract_strided_slice %778 {offsets = [0, 64], sizes = [2, 32], strides = [1, 1]} : vector<2x96xf32> to vector<2x32xf32>
    %797 = vector.extract_strided_slice %779 {offsets = [0, 64], sizes = [2, 32], strides = [1, 1]} : vector<2x96xf32> to vector<2x32xf32>
    %798 = arith.addf %797, %86 : vector<2x32xf32>
    %799 = arith.mulf %787, %798 : vector<2x32xf32>
    %800 = arith.addf %796, %799 : vector<2x32xf32>
    %801 = math.tanh %800 : vector<2x32xf32>
    %cst_163 = arith.constant 1.000000e+00 : f32
    %802 = vector.broadcast %cst_163 : f32 to vector<2x32xf32>
    %803 = arith.subf %802, %795 : vector<2x32xf32>
    %804 = arith.mulf %803, %801 : vector<2x32xf32>
    %805 = arith.mulf %795, %730 : vector<2x32xf32>
    %806 = arith.addf %804, %805 : vector<2x32xf32>
    %cst_164 = arith.constant dense<0.000000e+00> : vector<2xf32>
    %807 = vector.multi_reduction <add>, %806, %cst_164 [1] : vector<2x32xf32> to vector<2xf32>
    %808 = vector.shape_cast %807 : vector<2xf32> to vector<2x1xf32>
    %cst_165 = arith.constant 3.200000e+01 : f32
    %809 = vector.broadcast %cst_165 : f32 to vector<2x1xf32>
    %810 = arith.divf %808, %809 : vector<2x1xf32>
    %811 = arith.mulf %806, %806 : vector<2x32xf32>
    %cst_166 = arith.constant dense<0.000000e+00> : vector<2xf32>
    %812 = vector.multi_reduction <add>, %811, %cst_166 [1] : vector<2x32xf32> to vector<2xf32>
    %813 = vector.shape_cast %812 : vector<2xf32> to vector<2x1xf32>
    %cst_167 = arith.constant 3.200000e+01 : f32
    %814 = vector.broadcast %cst_167 : f32 to vector<2x1xf32>
    %815 = arith.divf %813, %814 : vector<2x1xf32>
    %816 = vector.broadcast %810 : vector<2x1xf32> to vector<2x32xf32>
    %817 = arith.subf %806, %816 : vector<2x32xf32>
    %818 = arith.mulf %92, %817 : vector<2x32xf32>
    %819 = arith.mulf %810, %810 : vector<2x1xf32>
    %820 = arith.subf %815, %819 : vector<2x1xf32>
    %cst_168 = arith.constant 9.99999974E-6 : f32
    %821 = vector.broadcast %cst_168 : f32 to vector<2x1xf32>
    %822 = arith.addf %820, %821 : vector<2x1xf32>
    %823 = math.rsqrt %822 : vector<2x1xf32>
    %824 = vector.broadcast %823 : vector<2x1xf32> to vector<2x32xf32>
    %825 = arith.mulf %818, %824 : vector<2x32xf32>
    %826 = arith.addf %825, %95 : vector<2x32xf32>
    %827 = tpu.concatenate %826, %775 in 1 : vector<2x32xf32>, vector<2x16xf32> -> vector<2x48xf32>
    %cst_169 = arith.constant dense<0.000000e+00> : vector<2x64xf32>
    %828 = tpu.matmul %827, %78, %cst_169 {dimension_numbers = #tpu.dot_dimension_numbers<[1], [0], [0], [1], [0, 0, 1, 1], [], []>} : vector<2x48xf32>, vector<48x64xf32>, vector<2x64xf32> -> vector<2x64xf32>
    %829 = arith.addf %828, %89 : vector<2x64xf32>
    %830 = vector.extract_strided_slice %829 {offsets = [0, 0], sizes = [2, 16], strides = [1, 1]} : vector<2x64xf32> to vector<2x16xf32>
    %831 = arith.negf %830 : vector<2x16xf32>
    %832 = math.exp %831 : vector<2x16xf32>
    %cst_170 = arith.constant 1.000000e+00 : f32
    %833 = vector.broadcast %cst_170 : f32 to vector<2x16xf32>
    %834 = arith.addf %833, %832 : vector<2x16xf32>
    %835 = arith.divf %833, %834 : vector<2x16xf32>
    %836 = vector.extract_strided_slice %829 {offsets = [0, 16], sizes = [2, 16], strides = [1, 1]} : vector<2x64xf32> to vector<2x16xf32>
    %837 = arith.negf %836 : vector<2x16xf32>
    %838 = math.exp %837 : vector<2x16xf32>
    %cst_171 = arith.constant 1.000000e+00 : f32
    %839 = vector.broadcast %cst_171 : f32 to vector<2x16xf32>
    %840 = arith.addf %839, %838 : vector<2x16xf32>
    %841 = arith.divf %839, %840 : vector<2x16xf32>
    %842 = vector.extract_strided_slice %829 {offsets = [0, 32], sizes = [2, 16], strides = [1, 1]} : vector<2x64xf32> to vector<2x16xf32>
    %843 = vector.extract_strided_slice %829 {offsets = [0, 48], sizes = [2, 16], strides = [1, 1]} : vector<2x64xf32> to vector<2x16xf32>
    %844 = arith.mulf %835, %843 : vector<2x16xf32>
    %845 = arith.addf %842, %844 : vector<2x16xf32>
    %846 = math.tanh %845 : vector<2x16xf32>
    %cst_172 = arith.constant 1.000000e+00 : f32
    %847 = vector.broadcast %cst_172 : f32 to vector<2x16xf32>
    %848 = arith.subf %847, %841 : vector<2x16xf32>
    %849 = arith.mulf %848, %846 : vector<2x16xf32>
    %850 = arith.mulf %841, %775 : vector<2x16xf32>
    %851 = arith.addf %849, %850 : vector<2x16xf32>
    %cst_173 = arith.constant dense<0.000000e+00> : vector<2xf32>
    %852 = vector.multi_reduction <add>, %851, %cst_173 [1] : vector<2x16xf32> to vector<2xf32>
    %853 = vector.shape_cast %852 : vector<2xf32> to vector<2x1xf32>
    %cst_174 = arith.constant 1.600000e+01 : f32
    %854 = vector.broadcast %cst_174 : f32 to vector<2x1xf32>
    %855 = arith.divf %853, %854 : vector<2x1xf32>
    %856 = arith.mulf %851, %851 : vector<2x16xf32>
    %cst_175 = arith.constant dense<0.000000e+00> : vector<2xf32>
    %857 = vector.multi_reduction <add>, %856, %cst_175 [1] : vector<2x16xf32> to vector<2xf32>
    %858 = vector.shape_cast %857 : vector<2xf32> to vector<2x1xf32>
    %cst_176 = arith.constant 1.600000e+01 : f32
    %859 = vector.broadcast %cst_176 : f32 to vector<2x1xf32>
    %860 = arith.divf %858, %859 : vector<2x1xf32>
    %861 = vector.broadcast %855 : vector<2x1xf32> to vector<2x16xf32>
    %862 = arith.subf %851, %861 : vector<2x16xf32>
    %863 = arith.mulf %98, %862 : vector<2x16xf32>
    %864 = arith.mulf %855, %855 : vector<2x1xf32>
    %865 = arith.subf %860, %864 : vector<2x1xf32>
    %cst_177 = arith.constant 9.99999974E-6 : f32
    %866 = vector.broadcast %cst_177 : f32 to vector<2x1xf32>
    %867 = arith.addf %865, %866 : vector<2x1xf32>
    %868 = math.rsqrt %867 : vector<2x1xf32>
    %869 = vector.broadcast %868 : vector<2x1xf32> to vector<2x16xf32>
    %870 = arith.mulf %863, %869 : vector<2x16xf32>
    %871 = arith.addf %870, %101 : vector<2x16xf32>
    %c0_178 = arith.constant 0 : index
    %c0_179 = arith.constant 0 : index
    %872 = vector.load %arg4[%c0_178, %c0_179] : memref<2x16xf32, #tpu.memory_space<vmem>>, vector<2x16xf32>
    %873 = arith.mulf %871, %872 : vector<2x16xf32>
    %c96_180 = arith.constant 96 : index
    %c0_181 = arith.constant 0 : index
    %874 = vector.load %arg2[%c96_180, %c0_181] : memref<112x128xf32, #tpu.memory_space<vmem>>, vector<16x128xf32>
    %cst_182 = arith.constant dense<0.000000e+00> : vector<2x128xf32>
    %875 = tpu.matmul %873, %874, %cst_182 {dimension_numbers = #tpu.dot_dimension_numbers<[1], [0], [0], [1], [0, 0, 1, 1], [], []>} : vector<2x16xf32>, vector<16x128xf32>, vector<2x128xf32> -> vector<2x128xf32>
    %876 = vector.extract_strided_slice %0 {offsets = [13, 0], sizes = [1, 128], strides = [1, 1]} : vector<16x128xf32> to vector<1x128xf32>
    %877 = vector.broadcast %876 : vector<1x128xf32> to vector<2x128xf32>
    %878 = arith.addf %875, %877 : vector<2x128xf32>
    %c0_183 = arith.constant 0 : index
    %c0_184 = arith.constant 0 : index
    %879 = vector.load %arg6[%c0_183, %c0_184] : memref<2x128xf32, #tpu.memory_space<vmem>>, vector<2x128xf32>
    tpu.vector_store %arg6[%c0_183, %c0_184], %878 {strides = array<i32>} : memref<2x128xf32, #tpu.memory_space<vmem>>, vector<2x128xf32>,
    return
  }
}

</mosaic_0001>

<bundles_post_ra>
// kernel: aegru_forward.1
= control target key start
LH: loop header
LB: loop body
LE: loop exit
PB: predicated region body
PF: predicated region fallthrough
CT: control target
= control target key end

     0   :  { %12 = vsyncpa [#allocation3], 0  ;;  %s4491_s0 = inlined_call_operand.hbm [shape: f32[16,16], index: 0, kind: input, shape index: {}]   ;;  %s4492_s1 = inlined_call_operand.vmem [shape: f32[16,16], index: 1, kind: input, shape index: {}]   ;;  %s4493_s2 = inlined_call_operand.hbm [shape: f32[112,128], index: 2, kind: input, shape index: {}]   ;;  %s4494_s3 = inlined_call_operand.hbm [shape: f32[16,128], index: 3, kind: input, shape index: {}]   ;;  %s4495_s4 = inlined_call_operand.vmem [shape: f32[2,16], index: 4, kind: input, shape index: {}]   ;;  %s4496_s5 = inlined_call_operand.vmem [shape: f32[16,128], index: 5, kind: output, shape index: {0}]   ;;  %s4497_s6 = inlined_call_operand.hbm [shape: f32[2,128], index: 6, kind: output, shape index: {1}]  }
   0x1   :  { %13 = vsyncpa [#allocation6], 0 }
   0x2   :  { %14 = vsyncpa [#allocation4], 0  ;;  %s3818_s21 = smov [#allocation5]   ;;  %s3819_s23 = smov [#allocation2]  }
   0x3   :  { %s34_s22 = sshll.u32 %s3818_s21, 4  ;;  %s20_s24 = sshll.u32 %s3819_s23, 4  ;;  %s35_s22 = int_to_ptr.vmem [resolvable:$true] %s34_s22  ;;  %s3868_s24 = int_to_ptr.vmem [resolvable:$true] %s20_s24 }
   0x4   :  { %s3724_s27 = scalar_lea.hbm %s4493_s2, 1792 }
   0x5   :  { %p3725_p0 = scmp.ne.s32.totalorder %s4493_s2, %s3724_s27  ;;  %p3728_p1 = scmp.lt.u32.totalorder %s3724_s27, %s4493_s2 }
   0x7   :  { %p3730_p2 = pnand %p3728_p1, %p3725_p0 }
   0x9   :  { %3733 = shalt.err (!%p3730_p2)
}
   0xa   :  { %s3734_s8 = scalar_lea.vmem %s35_s22, 1792  ;;  %p3739_p4 = scmp.lt.s32.totalorder %s35_s22, %s35_s22 }
   0xb   :  { %p3735_p3 = scmp.ne.s32.totalorder %s35_s22, %s3734_s8  ;;  %p3740_p5 = scmp.lt.s32.totalorder %s3734_s8, %s3734_s8 }
   0xd   :  { %p3741_p6 = por %p3740_p5, %p3739_p4 }
   0xf   :  { %p3742_p7 = pnand %p3741_p6, %p3735_p3 }
  0x11   :  { %3745 = shalt.err (!%p3742_p7)
}
  0x12   :  { %s3820_s9 = smov 128   ;;  %s3821_s10 = smov 8  }
  0x13   :  { %40 = dma.hbm_to_vmem [thread:$0]  %s4493_s2, 1792, %s35_s22, [#allocation6], %s3820_s9, %s3820_s9, %s3821_s10  }
  0x14   :  { %s3746_s15 = scalar_lea.hbm %s4491_s0, 256 }
  0x15   :  { %p3747_p8 = scmp.ne.s32.totalorder %s4491_s0, %s3746_s15  ;;  %p3750_p9 = scmp.lt.u32.totalorder %s3746_s15, %s4491_s0 }
  0x17   :  { %p3752_p10 = pnand %p3750_p9, %p3747_p8 }
  0x19   :  { %3755 = shalt.err (!%p3752_p10)
}
  0x1a   :  { %s3756_s20 = scalar_lea.vmem %s3868_s24, 256  ;;  %p3761_p12 = scmp.lt.s32.totalorder %s3868_s24, %s3868_s24 }
  0x1b   :  { %p3757_p11 = scmp.ne.s32.totalorder %s3868_s24, %s3756_s20  ;;  %p3762_p13 = scmp.lt.s32.totalorder %s3756_s20, %s3756_s20 }
  0x1d   :  { %p3763_p0 = por %p3762_p13, %p3761_p12 }
  0x1f   :  { %p3764_p1 = pnand %p3763_p0, %p3757_p11 }
  0x21   :  { %3767 = shalt.err (!%p3764_p1)
}
  0x22   :  { %26 = dma.hbm_to_vmem [thread:$0]  %s4491_s0, 256, %s3868_s24, [#allocation3], %s3820_s9, %s3820_s9, %s3821_s10  }
  0x23   :  { %s3822_s22 = smov [#allocation7]   ;;  %s3768_s27 = scalar_lea.hbm %s4494_s3, 256 }
  0x24   :  { %s46_s23 = sshll.u32 %s3822_s22, 4  ;;  %p3769_p2 = scmp.ne.s32.totalorder %s4494_s3, %s3768_s27  ;;  %s47_s23 = int_to_ptr.vmem [resolvable:$true] %s46_s23 }
  0x25   :  { %p3772_p3 = scmp.lt.u32.totalorder %s3768_s27, %s4494_s3 }
  0x27   :  { %p3774_p4 = pnand %p3772_p3, %p3769_p2 }
  0x29   :  { %3777 = shalt.err (!%p3774_p4)
}
  0x2a   :  { %s3778_s8 = scalar_lea.vmem %s47_s23, 256  ;;  %p3783_p6 = scmp.lt.s32.totalorder %s47_s23, %s47_s23 }
  0x2b   :  { %p3779_p5 = scmp.ne.s32.totalorder %s47_s23, %s3778_s8  ;;  %p3784_p7 = scmp.lt.s32.totalorder %s3778_s8, %s3778_s8 }
  0x2d   :  { %p3785_p8 = por %p3784_p7, %p3783_p6 }
  0x2f   :  { %p3786_p9 = pnand %p3785_p8, %p3779_p5 }
  0x31   :  { %3789 = shalt.err (!%p3786_p9)
}
  0x32   :  { %52 = dma.hbm_to_vmem [thread:$0]  %s4494_s3, 256, %s47_s23, [#allocation6], %s3820_s9, %s3820_s9, %s3821_s10  }
  0x33   :  { %3812 = dma.done.wait [#allocation3], 256  }
  0x34   :  { %3813 = vsyncadd [#allocation3], 4294967040 }
  0x35   :  { %3814 = dma.done.wait [#allocation6], 2048  }
  0x36   :  { %3815 = vsyncadd [#allocation6], 4294965248  ;;  %v3920_v0 = vld [vmem:[#allocation5 + $0x30] sm:$0xff]  ;;  %v3922_v1 = vld [vmem:[#allocation5 + $0x38] sm:$0xff]  ;;  %s3823_s3 = smov 64   ;;  %s3824_s9 = smov 32  }
  0x37   :  { %v66_v2 = vld [vmem:[#allocation2] sm:$0xff]  ;;  %v3548_v3 = vpack.i.bf16 %v3922_v1, %v3920_v0  ;;  %v3926_v5 = vld [vmem:[#allocation5] sm:$0xff]  ;;  %v3928_v6 = vld [vmem:[#allocation5 + $0x8] sm:$0xff]  ;;  %vm122_vm2 = vcmask 130048   ;;  %s3825_s10 = smov 16   ;;  %vm230_vm5 = vcmask 261120  }
  0x38   :  { %v74_v4 = vand.u32 2147483647, %v66_v2  ;;  %v3930_v7 = vld [vmem:[#allocation5 + $0x10] sm:$0xff]  ;;  %v3932_v8 = vld [vmem:[#allocation5 + $0x18] sm:$0xff]  ;;  %v3934_v9 = vld [vmem:[#allocation5 + $0x20] sm:$0xff]  ;;  %v3939_v11 = vpack.i.bf16 %v3928_v6, %v3926_v5  ;;  %v68_v23 = vmax.f32 %v66_v2, 0.0  ;;  %vm70_vm1 = vcmp.ne.f32.partialorder %v66_v2, %v66_v2 }
  0x39   :  { %3549 = vrot.lane.b32.xlu0 %v3548_v3, %s3823_s3  ;;  %v3558_v12 = vpack.i.bf16 %v3932_v8, %v3930_v7  ;;  %v3943_v13 = vld [vmem:[#allocation5 + $0x28] sm:$0xff]  ;;  %v67_v30 = vld [vmem:[#allocation2 + $0x8] sm:$0xff]  ;;  %vm3827_vm6 = vmmov 0   ;;  %vm696_vm7 = vcmask 1040384   ;;  %vm806_vm8 = vcmask 254976   ;;  %s3830_s15 = smov 80  }
  0x3a   :  { %v76_v10 = vsub.f32 0.0, %v74_v4  ;;  %v3563_v15 = vpack.i.bf16 %v3943_v13, %v3934_v9  ;;  %v75_v31 = vand.u32 2147483647, %v67_v30  ;;  %v69_v42 = vmax.f32 %v67_v30, 0.0  ;;  %s3831_s16 = smov 112  }
  0x3b   :  { %3559 = vrot.lane.b32.xlu1 %v3558_v12, %s3824_s9  ;;  %vm71_vm4 = vcmp.ne.f32.partialorder %v67_v30, %v67_v30  ;;  %vm573_vm9 = vcmask 392192   ;;  %vm936_vm10 = vcmask 123904  }
  0x3c   :  { %v78_v14 = vmul.f32 1.442695, %v76_v10  ;;  %v77_v32 = vsub.f32 0.0, %v75_v31  ;;  %v3960_v10 = vld [vmem:[#allocation7] sm:$0xff] }
  0x3d   :  { %3554 = vrot.lane.b32.xlu0 %v3939_v11, %s3824_s9 }
  0x3e   :  { %3573 = vpow2.f32 %v78_v14  ;;  %v80_v33 = vmul.f32 1.442695, %v77_v32 }
  0x3f   :  { %3564 = vrot.lane.b32.xlu1 %v3563_v15, %s3824_s9 }
  0x41   :  { %3569 = vrot.lane.b32.xlu0 %v3939_v11, %s3825_s10 }
  0x48   :  { %v3574_v16 = vpop.eup %3573 }
  0x49   :  { %v82_v17 = vadd.f32 1.0, %v3574_v16  ;;  %v85_v18 = vmul.f32 -0.5, %v3574_v16  ;;  %v88_v20 = vand.u32 2147483647, %v3574_v16 }
  0x4b   :  { %3575 = vlog2.f32 %v82_v17  ;;  %v86_v19 = vadd.f32 1.0, %v85_v18  ;;  %vm89_vm0 = vcmp.lt.f32.partialorder %v88_v20, 0.0004427343 }
  0x4d   :  { %v87_v21 = vmul.f32 %v3574_v16, %v86_v19 }
  0x55   :  { %v3576_v22 = vpop.eup %3575 }
  0x56   :  { %v84_v24 = vmul.f32 0.6931472, %v3576_v22 }
  0x58   :  { %v90_v25 = vsel %vm89_vm0, %v87_v21, %v84_v24 }
  0x59   :  { %v100_v26 = vadd.f32 %v90_v25, %v68_v23 }
  0x5b   :  { %v102_v27 = vsel %vm70_vm1, %v66_v2, %v100_v26  ;;  %v110_v2 = vlaneseq }
  0x5c   :  { %3577 = vlog2.f32 %v102_v27 }
  0x5d   :  { %3579 = vpow2.f32 %v80_v33  ;;  %v3957_v3 = vshrl.u32 %v110_v2, 7 }
  0x5f   :  { %v112_v4 = vsub.s32 0, %v3957_v3  ;;  %v316_v14 = vsub.s32 2, %v3957_v3 }
  0x61   :  { %v113_v12 = vrot.slane %v3960_v10, %v112_v4  ;;  %v317_v11 = vrot.slane %v3960_v10, %v316_v14 }
  0x66   :  { %v3578_v28 = vpop.eup %3577 }
  0x67   :  { %v105_v29 = vmul.f32 0.6931472, %v3578_v28  ;;  %v3580_v34 = vpop.eup %3579 }
  0x68   :  { %v91_v35 = vadd.f32 1.0, %v3580_v34  ;;  %v94_v36 = vmul.f32 -0.5, %v3580_v34  ;;  %v97_v39 = vand.u32 2147483647, %v3580_v34 }
  0x69   :  { %3136 = vmatprep.mubr.msk.f32.mxu0 %vm122_vm2, %v105_v29 }
  0x6a   :  { %3581 = vlog2.f32 %v91_v35  ;;  %v95_v37 = vadd.f32 1.0, %v94_v36  ;;  %vm98_vm3 = vcmp.lt.f32.partialorder %v97_v39, 0.0004427343 }
  0x6c   :  { %v96_v41 = vmul.f32 %v3580_v34, %v95_v37 }
  0x74   :  { %v3582_v38 = vpop.eup %3581 }
  0x75   :  { %v93_v40 = vmul.f32 0.6931472, %v3582_v38 }
  0x77   :  { %v99_v43 = vsel %vm98_vm3, %v96_v41, %v93_v40 }
  0x78   :  { %v101_v44 = vadd.f32 %v99_v43, %v69_v42 }
  0x7a   :  { %v103_v45 = vsel %vm71_vm4, %v67_v30, %v101_v44 }
  0x7b   :  { %3583 = vlog2.f32 %v103_v45 }
  0x85   :  { %v3584_v49 = vpop.eup %3583 }
  0x86   :  { %v107_v55 = vmul.f32 0.6931472, %v3584_v49 }
  0xab   :  { %v3550_v46 = vpop.permute.xlu0 %3549 }
  0xac   :  { %v3552_v47 = vunpack.i.h.bf16 %v3550_v46  ;;  %v3551_v48 = vunpack.i.l.bf16 %v3550_v46 }
  0xad   :  { %v3560_v50 = vpop.permute.xlu1 %3559 }
  0xae   :  { %v3386_v51 = vpack.c.bf16 %v3552_v47, %v3551_v48  ;;  %v3562_v52 = vunpack.i.h.bf16 %v3560_v50  ;;  %v3561_v53 = vunpack.i.l.bf16 %v3560_v50  ;;  %v428_v50 = vsub.s32 3, %v3957_v3 }
  0xaf   :  { %v3555_v54 = vpop.permute.xlu0 %3554 }
  0xb0   :  { %3387 = vmatprep.subr.bf16.mxu0 %v3386_v51  ;;  %v3557_v56 = vunpack.i.h.bf16 %v3555_v54  ;;  %v3556_v57 = vunpack.i.l.bf16 %v3555_v54  ;;  %v3390_v58 = vpack.c.bf16 %v3562_v52, %v3561_v53 }
  0xb1   :  { %3389 = vmatpush3.bf16.msra.mxu0 %v3386_v51  ;;  %v3565_v60 = vpop.permute.xlu1 %3564  ;;  %v429_v51 = vrot.slane %v3960_v10, %v428_v50 }
  0xb2   :  { %v3398_v59 = vpack.c.bf16 %v3557_v56, %v3556_v57  ;;  %3391 = vmatprep.subr.bf16.mxu1 %v3390_v58  ;;  %v3567_v61 = vunpack.i.h.bf16 %v3565_v60  ;;  %v3566_v62 = vunpack.i.l.bf16 %v3565_v60 }
  0xb3   :  { %3393 = vmatpush3.bf16.msra.mxu1 %v3390_v58  ;;  %v3570_v57 = vpop.permute.xlu0 %3569  ;;  %v3406_v58 = vpack.c.bf16 %v3928_v6, %v3926_v5  ;;  %v212_v5 = vsub.s32 1, %v3957_v3 }
  0xb4   :  { %3137 = vmatmul.mubr.msk.f32.vlgmr.msra.gmra.mrb[0].mxu0 %vm122_vm2, %v107_v55  ;;  %3399 = vmatprep.subr.bf16.mxu0 %v3398_v59  ;;  %v3394_v63 = vpack.c.bf16 %v3567_v61, %v3566_v62  ;;  %v3571_v60 = vunpack.i.l.bf16 %v3570_v57  ;;  %v3826_v62 = vmov 0.0|0.0  }
  0xb5   :  { %3401 = vmatpush3.bf16.msra.mxu0 %v3398_v59  ;;  %3154 = vmatprep.mubr.msk.f32.mxu0 %vm122_vm2, %v105_v29  ;;  %v3572_v59 = vunpack.i.h.bf16 %v3570_v57  ;;  %v213_v6 = vrot.slane %v3960_v10, %v212_v5 }
  0xb6   :  { %3395 = vmatprep.subr.bf16.mxu1 %v3394_v63 }
  0xb7   :  { %3397 = vmatpush3.bf16.msra.mxu1 %v3394_v63  ;;  %v3402_v61 = vpack.c.bf16 %v3572_v59, %v3571_v60  ;;  %v671_v63 = vsub.s32 7, %v3957_v3 }
  0xb8   :  { %3155 = vmatmul.mubr.msk.f32.vlgmr.msra.gmra.mrb[2].mxu0 %vm122_vm2, %v107_v55  ;;  %3407 = vmatprep.subr.bf16.mxu1 %v3406_v58 }
  0xb9   :  { %3403 = vmatprep.subr.bf16.mxu0 %v3402_v61  ;;  %v672_v2 = vrot.slane %v3960_v10, %v671_v63 }
  0xba   :  { %3405 = vmatpush3.bf16.msra.mxu0 %v3402_v61 }
  0xbb   :  { %3410 = vmatprep.subr.bf16.mxu0 %v3826_v62  ;;  %779 = vrot.lane.b32.xlu1 %v672_v2, %s3823_s3 }
 0x187   :  { %v3138_v15 = vpop.f32.mrb[0].mxu0 }
 0x188   :  { %v201_v16 = vadd.f32 %v3138_v15, %v113_v12  ;;  %v195_v17 = vpop.f32.mrb[1].mxu0 }
 0x189   :  { %v196_v18 = vadd.f32 %v195_v17, %v113_v12 }
 0x18a   :  { %v205_v21 = vmax.f32 %v201_v16, 0.0 }
 0x18b   :  { %v204_v19 = vmax.f32 %v196_v18, 0.0  ;;  %v3156_v20 = vpop.f32.mrb[2].mxu0 }
 0x18c   :  { %v398_v22 = vadd.f32 %v3156_v20, %v317_v11  ;;  %v392_v23 = vpop.f32.mrb[3].mxu0 }
 0x18d   :  { %3147 = vmatprep.mubr.msk.f32.mxu1 %vm230_vm5, %v204_v19  ;;  %v393_v24 = vadd.f32 %v392_v23, %v317_v11 }
 0x18e   :  { %3148 = vmatmul.mubr.msk.f32.vlgmr.msra.gmra.mrb[0].mxu1 %vm230_vm5, %v205_v21  ;;  %v402_v25 = vsel %vm122_vm2, %v398_v22, 0.0  ;;  %v438_v21 = vsub.s32 4, %v3957_v3 }
 0x18f   :  { %v401_v26 = vsel %vm122_vm2, %v393_v24, 0.0  ;;  %3409 = vmatpush3.bf16.msra.mxu1 %v3406_v58 }
 0x190   :  { %v403_v27 = vadd.f32 %v402_v25, %v401_v26  ;;  %3416 = vmatprep.subr.bf16.mxu1 %v3826_v62  ;;  %v446_v26 = vld [vmem:[%s4492_s1] sm:$0xff] }
 0x192   :  { %v404_v28 = vrot.slane %v403_v27, 4 }
 0x194   :  { %v405_v29 = vadd.f32 %v404_v28, %v403_v27 }
 0x196   :  { %v406_v30 = vrot.slane %v405_v29, 2 }
 0x198   :  { %v407_v31 = vadd.f32 %v406_v30, %v405_v29 }
 0x19a   :  { %v408_v32 = vrot.slane %v407_v31, 1 }
 0x19c   :  { %v409_v33 = vadd.f32 %v408_v32, %v407_v31 }
 0x19e   :  { %v411_v34 = vmul.f32 0.0625, %v409_v33 }
 0x1a0   :  { %v412_v35 = vsub.f32 %v393_v24, %v411_v34  ;;  %v413_v36 = vsub.f32 %v398_v22, %v411_v34  ;;  %v439_v22 = vrot.slane %v3960_v10, %v438_v21  ;;  %v447_v24 = vld [vmem:[%s4492_s1 + $0x8] sm:$0xff]  ;;  %v4016_v34 = vpack.c.bf16 %v3932_v8, %v3930_v7  ;;  %s3829_s1 = smov 96  }
 0x1a1   :  { %v3828_v7 = vmov 0.0   ;;  %v460_v8 = vsub.s32 5, %v3957_v3 }
 0x1a2   :  { %v414_v37 = vmul.f32 %v412_v35, %v412_v35  ;;  %v415_v38 = vmul.f32 %v413_v36, %v413_v36  ;;  %v430_v52 = vmul.f32 %v429_v51, %v412_v35  ;;  %v431_v53 = vmul.f32 %v429_v51, %v413_v36 }
 0x1a3   :  { %v4027_v36 = vpack.c.bf16 %v3943_v13, %v3934_v9  ;;  %v592_v9 = vsub.s32 6, %v3957_v3  ;;  %v4048_v13 = vrot.slane %v3960_v10, %v460_v8 }
 0x1a4   :  { %v416_v39 = vsel %vm122_vm2, %v414_v37, 0.0  ;;  %v417_v40 = vsel %vm122_vm2, %v415_v38, 0.0 }
 0x1a5   :  { %v418_v41 = vadd.f32 %v417_v40, %v416_v39  ;;  %v593_v37 = vrot.slane %v3960_v10, %v592_v9 }
 0x1a7   :  { %v419_v42 = vrot.slane %v418_v41, 4 }
 0x1a9   :  { %v420_v43 = vadd.f32 %v419_v42, %v418_v41 }
 0x1ab   :  { %v421_v44 = vrot.slane %v420_v43, 2 }
 0x1ad   :  { %v422_v45 = vadd.f32 %v421_v44, %v420_v43 }
 0x1af   :  { %v423_v46 = vrot.slane %v422_v45, 1 }
 0x1b1   :  { %v424_v47 = vadd.f32 %v423_v46, %v422_v45 }
 0x1b3   :  { %v425_v48 = vmul.f32 0.0625, %v424_v47 }
 0x1b5   :  { %v432_v49 = vadd.f32 1e-05, %v425_v48 }
 0x1b7   :  { %3585 = vrsqrt.f32 %v432_v49 }
 0x1c1   :  { %v3586_v54 = vpop.eup %3585 }
 0x1c2   :  { %v434_v55 = vmul.f32 %v3586_v54, %v430_v52  ;;  %v435_v56 = vmul.f32 %v3586_v54, %v431_v53  ;;  %v4057_v54 = vpop.permute.xlu1 %779 }
 0x1c4   :  { %v4000_v23 = vadd.f32 %v439_v22, %v434_v55  ;;  %v4005_v25 = vadd.f32 %v439_v22, %v435_v56 }
 0x1c6   :  { %v2973_v30 = vclamps-f32 %v4000_v23, 10.0  ;;  %v2974_v32 = vclamps-f32 %v4005_v25, 10.0 }
 0x261   :  { %v3149_v12 = vpop.f32.mrb[0].mxu1 }
 0x262   :  { %v3990_v15 = vadd.f32 %v3149_v12, %v213_v6  ;;  %v303_v16 = vpop.f32.mrb[1].mxu1 }
 0x263   :  { %v3992_v17 = vadd.f32 %v303_v16, %v213_v6 }
 0x264   :  { %v449_v11 = vmul.f32 0.5, %v3990_v15 }
 0x265   :  { %v448_v18 = vmul.f32 0.5, %v3992_v17 }
 0x266   :  { %v452_v19 = vmul.f32 1.442695, %v449_v11 }
 0x267   :  { %v450_v20 = vmul.f32 1.442695, %v448_v18 }
 0x268   :  { %3587 = vpow2.f32 %v452_v19 }
 0x269   :  { %3589 = vpow2.f32 %v450_v20 }
 0x272   :  { %v3588_v27 = vpop.eup %3587 }
 0x273   :  { %v3590_v28 = vpop.eup %3589  ;;  %v455_v29 = vmul.f32 %v3588_v27, %v447_v24 }
 0x274   :  { %v454_v31 = vmul.f32 %v3590_v28, %v446_v26 }
 0x275   :  { %v457_v35 = vadd.f32 %v2974_v32, %v455_v29 }
 0x276   :  { %v456_v33 = vadd.f32 %v2973_v30, %v454_v31 }
 0x278   :  { %3161 = vmatprep.mubr.msk.f32.mxu0 %vm122_vm2, %v456_v33  ;;  %3168 = vmatprep.mubr.msk.f32.mxu1 %vm122_vm2, %v456_v33 }
 0x279   :  { %3162 = vmatmul.mubr.msk.f32.vlgmr.msra.gmra.mrb[4].mxu0 %vm122_vm2, %v457_v35  ;;  %3169 = vmatmul.mubr.msk.f32.vlgmr.msra.gmra.mrb[2].mxu1 %vm122_vm2, %v457_v35 }
 0x27a   :  { %3412 = vmatpush3.bf16.msra.mxu0 %v4016_v34  ;;  %3179 = vmatprep.mubr.msk.f32.mxu0 %vm3827_vm6, %v3828_v7 }
 0x27b   :  { %3413 = vmatprep.subr.bf16.mxu0 %v3826_v62  ;;  %3194 = vmatprep.mubr.msk.f32.mxu1 %vm3827_vm6, %v3828_v7 }
 0x27e   :  { %3415 = vmatpush3.bf16.msra.mxu0 %v4027_v36 }
 0x27f   :  { %3425 = vmatprep.subr.bf16.mxu0 %v3826_v62 }
 0x281   :  { %3180 = vmatmul.mubr.f32.vlgmr.msra.gmra.mrb[6].mxu0 %v3828_v7 }
 0x282   :  { %3427 = vmatpush3.bf16.msra.mxu0 %v4016_v34  ;;  %3205 = vmatprep.mubr.msk.f32.mxu0 %vm3827_vm6, %v3828_v7 }
 0x283   :  { %3428 = vmatprep.subr.bf16.mxu0 %v3826_v62 }
 0x286   :  { %3430 = vmatpush3.bf16.msra.mxu0 %v4027_v36 }
 0x287   :  { %3440 = vmatprep.subr.bf16.mxu0 %v3826_v62 }
 0x34c   :  { %v3163_v38 = vpop.f32.mrb[4].mxu0  ;;  %v3170_v39 = vpop.f32.mrb[2].mxu1 }
 0x34d   :  { %v4052_v40 = vadd.f32 %v3163_v38, %v4048_v13  ;;  %v666_v41 = vadd.f32 %v3170_v39, %v593_v37  ;;  %v4054_v42 = vpop.f32.mrb[5].mxu0  ;;  %v660_v43 = vpop.f32.mrb[3].mxu1 }
 0x34e   :  { %v661_v44 = vadd.f32 %v660_v43, %v593_v37 }
 0x34f   :  { %v694_v45 = vrot.slane %v666_v41, 7  ;;  %v1235_v46 = vrot.slane %v666_v41, 1  ;;  %v1507_v47 = vrot.slane %v666_v41, 2  ;;  %v1779_v53 = vrot.slane %v666_v41, 3 }
 0x350   :  { %v963_v48 = vrot.slane %v661_v44, 1  ;;  %v1233_v49 = vrot.slane %v661_v44, 2  ;;  %v1505_v51 = vrot.slane %v661_v44, 3  ;;  %v1777_v10 = vrot.slane %v661_v44, 4 }
 0x351   :  { %v697_v52 = vsel %vm696_vm7, %v661_v44, %v694_v45  ;;  %v2049_v59 = vrot.slane %v661_v44, 5  ;;  %v2051_v60 = vrot.slane %v666_v41, 4  ;;  %v2321_v61 = vrot.slane %v661_v44, 6 }
 0x352   :  { %v4060_v55 = vsel %vm696_vm7, %v963_v48, %v666_v41  ;;  %v4063_v56 = vsel %vm696_vm7, %v1233_v49, %v1235_v46  ;;  %v4066_v57 = vsel %vm696_vm7, %v1505_v51, %v1507_v47  ;;  %v4069_v58 = vsel %vm696_vm7, %v1777_v10, %v1779_v53  ;;  %v584_v51 = vld [vmem:[#allocation5 + $0x40] sm:$0xff]  ;;  %v586_v53 = vld [vmem:[#allocation5 + $0x50] sm:$0xff] }
 0x353   :  { %v2323_v2 = vrot.slane %v666_v41, 5  ;;  %v2593_v6 = vrot.slane %v661_v44, 7  ;;  %v2595_v12 = vrot.slane %v666_v41, 6  ;;  %v4073_v18 = vsel %vm696_vm7, %v2049_v59, %v2051_v60  ;;  %v587_v59 = vld [vmem:[#allocation5 + $0x58] sm:$0xff] }
 0x354   :  { %v767_v63 = vpop.f32.mrb[6].mxu0  ;;  %v4090_v49 = vpack.c.bf16 %v3922_v1, %v3920_v0  ;;  %v4098_v60 = vpack.c.bf16 %v587_v59, %v586_v53 }
 0x355   :  { %v782_v16 = vadd.f32 %v4057_v54, %v767_v63  ;;  %v3181_v11 = vpop.f32.mrb[7].mxu0  ;;  %v4076_v19 = vsel %vm696_vm7, %v2321_v61, %v2323_v2  ;;  %v4079_v20 = vsel %vm696_vm7, %v2593_v6, %v2595_v12  ;;  %v771_v22 = vadd.f32 %v767_v63, %v697_v52 }
 0x356   :  { %3418 = vmatpush3.bf16.msra.mxu1 %v4090_v49  ;;  %v4103_v11 = vld [vmem:[#allocation7 + $0x8] sm:$0xff] }
 0x357   :  { %784 = vrot.lane.b32.xlu0 %v782_v16, %s3823_s3  ;;  %v2979_v24 = vmul.f32 -1.442695, %v771_v22  ;;  %3419 = vmatprep.subr.bf16.mxu1 %v3826_v62  ;;  %v4108_v22 = vrot.slane %v4103_v11, %v112_v4  ;;  %v4137_v4 = vrot.slane %v4103_v11, %v316_v14 }
 0x359   :  { %3591 = vpow2.f32 %v2979_v24 }
 0x363   :  { %v3592_v26 = vpop.eup %3591 }
 0x364   :  { %v775_v27 = vadd.f32 1.0, %v3592_v26  ;;  %v4113_v26 = vrot.slane %v4103_v11, %v212_v5 }
 0x366   :  { %3593 = vrcp.f32 %v775_v27 }
 0x370   :  { %v3594_v28 = vpop.eup %3593 }
 0x371   :  { %v794_v37 = vsub.f32 1.0, %v3594_v28  ;;  %v800_v39 = vmul.f32 0.0, %v3594_v28 }
 0x3c9   :  { %v785_v29 = vpop.permute.xlu0 %784 }
 0x3ca   :  { %v787_v31 = vmul.f32 %v3594_v28, %v785_v29 }
 0x3cc   :  { %789 = vrot.lane.b32.xlu1 %v787_v31, %s3823_s3 }
 0x43e   :  { %v790_v33 = vpop.permute.xlu1 %789 }
 0x43f   :  { %v792_v35 = vadd.f32 %v790_v33, %v697_v52  ;;  %v585_v52 = vld [vmem:[#allocation5 + $0x48] sm:$0xff] }
 0x440   :  { %v4094_v10 = vpack.c.bf16 %v585_v52, %v584_v51 }
 0x441   :  { %3595 = vtanh.f32 %v792_v35 }
 0x442   :  { %3421 = vmatpush3.bf16.msra.mxu1 %v4094_v10 }
 0x443   :  { %3422 = vmatprep.subr.bf16.mxu1 %v3826_v62 }
 0x446   :  { %3424 = vmatpush3.bf16.msra.mxu1 %v4098_v60 }
 0x447   :  { %3431 = vmatprep.subr.bf16.mxu1 %v3826_v62 }
 0x44b   :  { %v3596_v9 = vpop.eup %3595 }
 0x44c   :  { %796 = vrot.lane.b32.xlu0 %v3596_v9, %s3829_s1 }
 0x4be   :  { %v797_v38 = vpop.permute.xlu0 %796 }
 0x4bf   :  { %v799_v41 = vmul.f32 %v797_v38, %v794_v37 }
 0x4c1   :  { %v801_v43 = vadd.f32 %v800_v39, %v799_v41 }
 0x4c3   :  { %803 = vrot.lane.b32.xlu1 %v801_v43, %s3829_s1  ;;  %v812_v44 = vmul.f32 %v801_v43, %v801_v43 }
 0x4c5   :  { %814 = vrot.lane.b32.xlu0 %v812_v44, %s3829_s1 }
 0x535   :  { %v804_v45 = vpop.permute.xlu1 %803 }
 0x536   :  { %v807_v46 = vsel %vm806_vm8, %v804_v45, 0.0 }
 0x537   :  { %808 = vadd.xlane.f32.xlu1 %v807_v46  ;;  %v815_v47 = vpop.permute.xlu0 %814 }
 0x538   :  { %v817_v48 = vsel %vm806_vm8, %v815_v47, 0.0 }
 0x539   :  { %818 = vadd.xlane.f32.xlu0 %v817_v48 }
 0x5c4   :  { %v809_v0 = vpop.xlane.xlu1 %808 }
 0x5c5   :  { %v811_v1 = vmul.f32 0.03125, %v809_v0 }
 0x5c6   :  { %v819_v63 = vpop.xlane.xlu0 %818 }
 0x5c7   :  { %v821_v61 = vsub.f32 %v801_v43, %v811_v1  ;;  %v827_v2 = vmul.f32 %v811_v1, %v811_v1  ;;  %v820_v6 = vmul.f32 0.03125, %v819_v63 }
 0x5c9   :  { %823 = vrot.lane.b32.xlu0 %v821_v61, %s3829_s1  ;;  %v828_v12 = vsub.f32 %v820_v6, %v827_v2 }
 0x5cb   :  { %v829_v16 = vadd.f32 1e-05, %v828_v12 }
 0x5cd   :  { %3597 = vrsqrt.f32 %v829_v16 }
 0x5d7   :  { %v3598_v28 = vpop.eup %3597 }
 0x63b   :  { %v824_v24 = vpop.permute.xlu0 %823 }
 0x63c   :  { %v826_v27 = vmul.f32 %v824_v24, %v4108_v22 }
 0x63e   :  { %v831_v29 = vmul.f32 %v3598_v28, %v826_v27 }
 0x640   :  { %v832_v31 = vadd.f32 %v831_v29, %v4113_v26 }
 0x642   :  { %3206 = vmatmul.mubr.msk.f32.vlgmr.msra.gmra.mrb[8].mxu0 %vm230_vm5, %v832_v31  ;;  %v833_v33 = vsel %vm230_vm5, %v832_v31, 0.0 }
 0x643   :  { %3195 = vmatmul.mubr.msk.f32.vlgmr.msra.gmra.mrb[4].mxu1 %vm573_vm9, %v833_v33  ;;  %3442 = vmatpush3.bf16.msra.mxu0 %v4016_v34 }
 0x644   :  { %3443 = vmatprep.subr.bf16.mxu0 %v3826_v62  ;;  %3231 = vmatprep.mubr.msk.f32.mxu0 %vm3827_vm6, %v3828_v7 }
 0x645   :  { %3433 = vmatpush3.bf16.msra.mxu1 %v4090_v49  ;;  %3220 = vmatprep.mubr.msk.f32.mxu1 %vm3827_vm6, %v3828_v7 }
 0x646   :  { %3434 = vmatprep.subr.bf16.mxu1 %v3826_v62 }
 0x647   :  { %3445 = vmatpush3.bf16.msra.mxu0 %v4027_v36 }
 0x648   :  { %3446 = vmatprep.subr.bf16.mxu0 %v3826_v62 }
 0x649   :  { %3436 = vmatpush3.bf16.msra.mxu1 %v4094_v10 }
 0x64a   :  { %3437 = vmatprep.subr.bf16.mxu1 %v3826_v62 }
 0x64d   :  { %3439 = vmatpush3.bf16.msra.mxu1 %v4098_v60 }
 0x64e   :  { %3455 = vmatprep.subr.bf16.mxu1 %v3826_v62 }
 0x715   :  { %v1035_v5 = vpop.f32.mrb[8].mxu0 }
 0x716   :  { %v903_v35 = vpop.f32.mrb[4].mxu1  ;;  %v3207_v9 = vpop.f32.mrb[9].mxu0  ;;  %v1046_v39 = vadd.f32 %v1035_v5, %v4057_v54  ;;  %v1039_v41 = vadd.f32 %v1035_v5, %v4060_v55 }
 0x717   :  { %v904_v37 = vadd.f32 %v903_v35, %v4137_v4  ;;  %v3196_v38 = vpop.f32.mrb[5].mxu1 }
 0x718   :  { %v2983_v44 = vmul.f32 -1.442695, %v1039_v41 }
 0x719   :  { %914 = vrot.lane.b32.xlu1 %v904_v37, %s3830_s15  ;;  %v2981_v43 = vmul.f32 -1.442695, %v904_v37 }
 0x71b   :  { %3599 = vpow2.f32 %v2981_v43 }
 0x71c   :  { %3601 = vpow2.f32 %v2983_v44 }
 0x71d   :  { %1048 = vrot.lane.b32.xlu1 %v1046_v39, %s3823_s3 }
 0x725   :  { %v3600_v14 = vpop.eup %3599 }
 0x726   :  { %v910_v45 = vadd.f32 1.0, %v3600_v14  ;;  %v3602_v46 = vpop.eup %3601 }
 0x727   :  { %v1043_v47 = vadd.f32 1.0, %v3602_v46 }
 0x728   :  { %3603 = vrcp.f32 %v910_v45 }
 0x729   :  { %3605 = vrcp.f32 %v1043_v47 }
 0x732   :  { %v3604_v48 = vpop.eup %3603 }
 0x733   :  { %v3606_v53 = vpop.eup %3605  ;;  %v924_v16 = vsub.f32 1.0, %v3604_v48  ;;  %v930_v27 = vmul.f32 0.0, %v3604_v48 }
 0x734   :  { %v1058_v33 = vsub.f32 1.0, %v3606_v53 }
 0x78b   :  { %v915_v51 = vpop.permute.xlu1 %914 }
 0x78c   :  { %v917_v52 = vmul.f32 %v3604_v48, %v915_v51 }
 0x78e   :  { %919 = vrot.lane.b32.xlu0 %v917_v52, %s3824_s9 }
 0x78f   :  { %v1049_v59 = vpop.permute.xlu1 %1048 }
 0x790   :  { %v1051_v0 = vmul.f32 %v3606_v53, %v1049_v59 }
 0x792   :  { %1053 = vrot.lane.b32.xlu1 %v1051_v0, %s3823_s3 }
 0x800   :  { %v920_v1 = vpop.permute.xlu0 %919 }
 0x801   :  { %v922_v61 = vadd.f32 %v920_v1, %v904_v37 }
 0x803   :  { %3607 = vtanh.f32 %v922_v61 }
 0x804   :  { %v1054_v63 = vpop.permute.xlu1 %1053 }
 0x805   :  { %v1056_v2 = vadd.f32 %v1054_v63, %v4060_v55 }
 0x807   :  { %3609 = vtanh.f32 %v1056_v2 }
 0x80d   :  { %v3608_v6 = vpop.eup %3607 }
 0x80e   :  { %926 = vrot.lane.b32.xlu0 %v3608_v6, %s3831_s16 }
 0x811   :  { %v3610_v12 = vpop.eup %3609 }
 0x812   :  { %1064 = vrot.lane.b32.xlu0 %v832_v31, %s3824_s9  ;;  %1060 = vrot.lane.b32.xlu1 %v3610_v12, %s3829_s1 }
 0x880   :  { %v927_v24 = vpop.permute.xlu0 %926 }
 0x881   :  { %v929_v28 = vmul.f32 %v927_v24, %v924_v16 }
 0x883   :  { %v931_v29 = vadd.f32 %v930_v27, %v929_v28 }
 0x884   :  { %v1065_v5 = vpop.permute.xlu0 %1064  ;;  %v1061_v35 = vpop.permute.xlu1 %1060 }
 0x885   :  { %v1067_v9 = vmul.f32 %v3606_v53, %v1065_v5  ;;  %v1063_v55 = vmul.f32 %v1061_v35, %v1058_v33  ;;  %933 = vrot.lane.b32.xlu1 %v931_v29, %s3831_s16  ;;  %v941_v37 = vmul.f32 %v931_v29, %v931_v29  ;;  %v4168_v5 = vrot.slane %v4103_v11, %v438_v21 }
 0x887   :  { %v1068_v38 = vadd.f32 %v1067_v9, %v1063_v55  ;;  %943 = vrot.lane.b32.xlu0 %v941_v37, %s3831_s16 }
 0x889   :  { %1070 = vrot.lane.b32.xlu1 %v1068_v38, %s3829_s1  ;;  %v1077_v31 = vmul.f32 %v1068_v38, %v1068_v38 }
 0x88d   :  { %1079 = vrot.lane.b32.xlu1 %v1077_v31, %s3829_s1 }
 0x8f7   :  { %v934_v39 = vpop.permute.xlu1 %933 }
 0x8f8   :  { %v937_v41 = vsel %vm936_vm10, %v934_v39, 0.0 }
 0x8f9   :  { %v944_v43 = vpop.permute.xlu0 %943  ;;  %938 = vadd.xlane.f32.xlu0 %v937_v41 }
 0x8fa   :  { %v946_v44 = vsel %vm936_vm10, %v944_v43, 0.0 }
 0x8fb   :  { %947 = vadd.xlane.f32.xlu1 %v946_v44  ;;  %v1071_v14 = vpop.permute.xlu1 %1070 }
 0x8fc   :  { %v1073_v45 = vsel %vm806_vm8, %v1071_v14, 0.0 }
 0x8fd   :  { %1074 = vadd.xlane.f32.xlu0 %v1073_v45 }
 0x8ff   :  { %v1080_v46 = vpop.permute.xlu1 %1079 }
 0x900   :  { %v1082_v47 = vsel %vm806_vm8, %v1080_v46, 0.0 }
 0x901   :  { %1083 = vadd.xlane.f32.xlu1 %v1082_v47 }
 0x986   :  { %v939_v48 = vpop.xlane.xlu0 %938 }
 0x987   :  { %v940_v51 = vmul.f32 0.0625, %v939_v48 }
 0x988   :  { %v948_v1 = vpop.xlane.xlu1 %947 }
 0x989   :  { %v950_v52 = vsub.f32 %v931_v29, %v940_v51  ;;  %v956_v61 = vmul.f32 %v940_v51, %v940_v51  ;;  %v949_v63 = vmul.f32 0.0625, %v948_v1  ;;  %v4163_v29 = vrot.slane %v4103_v11, %v428_v50 }
 0x98a   :  { %v1075_v53 = vpop.xlane.xlu0 %1074 }
 0x98b   :  { %v1076_v59 = vmul.f32 0.03125, %v1075_v53  ;;  %952 = vrot.lane.b32.xlu0 %v950_v52, %s3831_s16  ;;  %v957_v6 = vsub.f32 %v949_v63, %v956_v61 }
 0x98d   :  { %v1086_v0 = vsub.f32 %v1068_v38, %v1076_v59  ;;  %v1092_v16 = vmul.f32 %v1076_v59, %v1076_v59  ;;  %v958_v24 = vadd.f32 1e-05, %v957_v6 }
 0x98e   :  { %v1084_v2 = vpop.xlane.xlu1 %1083 }
 0x98f   :  { %1088 = vrot.lane.b32.xlu1 %v1086_v0, %s3829_s1  ;;  %v1085_v12 = vmul.f32 0.03125, %v1084_v2  ;;  %3611 = vrsqrt.f32 %v958_v24 }
 0x991   :  { %v1093_v27 = vsub.f32 %v1085_v12, %v1092_v16 }
 0x993   :  { %v1094_v28 = vadd.f32 1e-05, %v1093_v27 }
 0x995   :  { %3613 = vrsqrt.f32 %v1094_v28 }
 0x999   :  { %v3612_v9 = vpop.eup %3611 }
 0x99f   :  { %v3614_v39 = vpop.eup %3613 }
 0x9fd   :  { %v953_v33 = vpop.permute.xlu0 %952 }
 0x9fe   :  { %v955_v35 = vmul.f32 %v953_v33, %v4163_v29 }
 0xa00   :  { %v960_v55 = vmul.f32 %v3612_v9, %v955_v35 }
 0xa01   :  { %v1089_v37 = vpop.permute.xlu1 %1088 }
 0xa02   :  { %v1091_v38 = vmul.f32 %v1089_v37, %v4108_v22  ;;  %v961_v31 = vadd.f32 %v960_v55, %v4168_v5 }
 0xa04   :  { %v1096_v41 = vmul.f32 %v3614_v39, %v1091_v38  ;;  %1099 = vrot.lane.b32.xlu0 %v961_v31, %s3824_s9 }
 0xa06   :  { %v1097_v50 = vadd.f32 %v1096_v41, %v4113_v26 }
 0xa08   :  { %3232 = vmatmul.mubr.msk.f32.vlgmr.msra.gmra.mrb[10].mxu0 %vm230_vm5, %v1097_v50 }
 0xa09   :  { %3448 = vmatpush3.bf16.msra.mxu0 %v4090_v49  ;;  %3246 = vmatprep.mubr.msk.f32.mxu0 %vm3827_vm6, %v3828_v7 }
 0xa0a   :  { %3449 = vmatprep.subr.bf16.mxu0 %v3826_v62 }
 0xa0d   :  { %3451 = vmatpush3.bf16.msra.mxu0 %v4094_v10 }
 0xa0e   :  { %3452 = vmatprep.subr.bf16.mxu0 %v3826_v62 }
 0xa11   :  { %3454 = vmatpush3.bf16.msra.mxu0 %v4098_v60 }
 0xa12   :  { %3470 = vmatprep.subr.bf16.mxu0 %v3826_v62 }
 0xa76   :  { %v1100_v21 = vpop.permute.xlu0 %1099 }
 0xa77   :  { %v1102_v11 = vsel %vm230_vm5, %v1097_v50, %v1100_v21 }
 0xa78   :  { %3221 = vmatmul.mubr.msk.f32.vlgmr.msra.gmra.mrb[6].mxu1 %vm573_vm9, %v1102_v11 }
 0xa79   :  { %3457 = vmatpush3.bf16.msra.mxu1 %v4016_v34  ;;  %3257 = vmatprep.mubr.msk.f32.mxu1 %vm3827_vm6, %v3828_v7 }
 0xa7a   :  { %3458 = vmatprep.subr.bf16.mxu1 %v3826_v62 }
 0xa7d   :  { %3460 = vmatpush3.bf16.msra.mxu1 %v4027_v36 }
 0xa7e   :  { %3461 = vmatprep.subr.bf16.mxu1 %v3826_v62 }
 0xadb   :  { %v1307_v43 = vpop.f32.mrb[10].mxu0 }
 0xadc   :  { %v1318_v44 = vadd.f32 %v1307_v43, %v4057_v54  ;;  %v3233_v14 = vpop.f32.mrb[11].mxu0  ;;  %v1311_v45 = vadd.f32 %v1307_v43, %v4063_v56 }
 0xade   :  { %1320 = vrot.lane.b32.xlu1 %v1318_v44, %s3823_s3  ;;  %v2987_v46 = vmul.f32 -1.442695, %v1311_v45 }
 0xae0   :  { %3615 = vpow2.f32 %v2987_v46 }
 0xaea   :  { %v3616_v47 = vpop.eup %3615 }
 0xaeb   :  { %v1315_v48 = vadd.f32 1.0, %v3616_v47 }
 0xaed   :  { %3617 = vrcp.f32 %v1315_v48 }
 0xaf7   :  { %v3618_v59 = vpop.eup %3617 }
 0xaf8   :  { %v1330_v21 = vsub.f32 1.0, %v3618_v59 }
 0xb4b   :  { %v1172_v51 = vpop.f32.mrb[6].mxu1 }
 0xb4c   :  { %v1173_v52 = vadd.f32 %v1172_v51, %v4137_v4  ;;  %v3222_v53 = vpop.f32.mrb[7].mxu1 }
 0xb4e   :  { %1183 = vrot.lane.b32.xlu0 %v1173_v52, %s3830_s15  ;;  %v2985_v61 = vmul.f32 -1.442695, %v1173_v52 }
 0xb50   :  { %v1321_v0 = vpop.permute.xlu1 %1320  ;;  %3619 = vpow2.f32 %v2985_v61 }
 0xb51   :  { %v1323_v1 = vmul.f32 %v3618_v59, %v1321_v0 }
 0xb53   :  { %1325 = vrot.lane.b32.xlu1 %v1323_v1, %s3823_s3 }
 0xb57   :  { %1199 = vrot.lane.b32.xlu1 %v961_v31, %s3825_s10 }
 0xb5a   :  { %v3620_v63 = vpop.eup %3619 }
 0xb5b   :  { %1336 = vrot.lane.b32.xlu1 %v1097_v50, %s3824_s9  ;;  %v1179_v2 = vadd.f32 1.0, %v3620_v63 }
 0xb5d   :  { %3621 = vrcp.f32 %v1179_v2 }
 0xb67   :  { %v3622_v6 = vpop.eup %3621 }
 0xb68   :  { %v1193_v37 = vsub.f32 1.0, %v3622_v6 }
 0xbc0   :  { %v1184_v12 = vpop.permute.xlu0 %1183 }
 0xbc1   :  { %v1186_v16 = vmul.f32 %v3622_v6, %v1184_v12 }
 0xbc3   :  { %1188 = vrot.lane.b32.xlu0 %v1186_v16, %s3824_s9 }
 0xbc5   :  { %v1326_v24 = vpop.permute.xlu1 %1325 }
 0xbc6   :  { %v1328_v33 = vadd.f32 %v1326_v24, %v4063_v56 }
 0xbc9   :  { %v1200_v55 = vpop.permute.xlu1 %1199 }
 0xbca   :  { %v1202_v31 = vmul.f32 %v3622_v6, %v1200_v55 }
 0xbcd   :  { %v1337_v41 = vpop.permute.xlu1 %1336 }
 0xbce   :  { %v1339_v43 = vmul.f32 %v3618_v59, %v1337_v41 }
 0xc35   :  { %v1189_v27 = vpop.permute.xlu0 %1188 }
 0xc36   :  { %v1191_v28 = vadd.f32 %v1189_v27, %v1173_v52 }
 0xc38   :  { %3623 = vtanh.f32 %v1191_v28 }
 0xc39   :  { %3625 = vtanh.f32 %v1328_v33 }
 0xc42   :  { %v3624_v35 = vpop.eup %3623 }
 0xc43   :  { %1195 = vrot.lane.b32.xlu0 %v3624_v35, %s3831_s16  ;;  %v3626_v9 = vpop.eup %3625 }
 0xc47   :  { %1332 = vrot.lane.b32.xlu0 %v3626_v9, %s3829_s1 }
 0xcb5   :  { %v1196_v38 = vpop.permute.xlu0 %1195 }
 0xcb6   :  { %v1198_v39 = vmul.f32 %v1196_v38, %v1193_v37 }
 0xcb8   :  { %v1203_v50 = vadd.f32 %v1202_v31, %v1198_v39 }
 0xcb9   :  { %v1333_v11 = vpop.permute.xlu0 %1332 }
 0xcba   :  { %v1335_v44 = vmul.f32 %v1333_v11, %v1330_v21  ;;  %1205 = vrot.lane.b32.xlu0 %v1203_v50, %s3831_s16  ;;  %v1212_v56 = vmul.f32 %v1203_v50, %v1203_v50 }
 0xcbc   :  { %v1340_v14 = vadd.f32 %v1339_v43, %v1335_v44  ;;  %1214 = vrot.lane.b32.xlu1 %v1212_v56, %s3831_s16 }
 0xcbe   :  { %1342 = vrot.lane.b32.xlu0 %v1340_v14, %s3829_s1  ;;  %v1349_v45 = vmul.f32 %v1340_v14, %v1340_v14 }
 0xcc2   :  { %1351 = vrot.lane.b32.xlu0 %v1349_v45, %s3829_s1 }
 0xd2c   :  { %v1206_v46 = vpop.permute.xlu0 %1205 }
 0xd2d   :  { %v1208_v47 = vsel %vm936_vm10, %v1206_v46, 0.0 }
 0xd2e   :  { %1209 = vadd.xlane.f32.xlu1 %v1208_v47  ;;  %v1215_v48 = vpop.permute.xlu1 %1214 }
 0xd2f   :  { %v1217_v51 = vsel %vm936_vm10, %v1215_v48, 0.0 }
 0xd30   :  { %v1343_v52 = vpop.permute.xlu0 %1342  ;;  %1218 = vadd.xlane.f32.xlu0 %v1217_v51 }
 0xd31   :  { %v1345_v53 = vsel %vm806_vm8, %v1343_v52, 0.0 }
 0xd32   :  { %1346 = vadd.xlane.f32.xlu1 %v1345_v53 }
 0xd34   :  { %v1352_v59 = vpop.permute.xlu0 %1351 }
 0xd35   :  { %v1354_v0 = vsel %vm806_vm8, %v1352_v59, 0.0 }
 0xd36   :  { %1355 = vadd.xlane.f32.xlu1 %v1354_v0 }
 0xdbb   :  { %v1210_v1 = vpop.xlane.xlu1 %1209 }
 0xdbc   :  { %v1211_v61 = vmul.f32 0.0625, %v1210_v1 }
 0xdbd   :  { %v1219_v16 = vpop.xlane.xlu0 %1218 }
 0xdbe   :  { %v1221_v63 = vsub.f32 %v1203_v50, %v1211_v61  ;;  %v1227_v24 = vmul.f32 %v1211_v61, %v1211_v61  ;;  %v1220_v27 = vmul.f32 0.0625, %v1219_v16 }
 0xdbf   :  { %v1347_v2 = vpop.xlane.xlu1 %1346 }
 0xdc0   :  { %v1348_v6 = vmul.f32 0.03125, %v1347_v2  ;;  %1223 = vrot.lane.b32.xlu0 %v1221_v63, %s3831_s16  ;;  %v1228_v33 = vsub.f32 %v1220_v27, %v1227_v24 }
 0xdc2   :  { %v1358_v12 = vsub.f32 %v1340_v14, %v1348_v6  ;;  %v1364_v9 = vmul.f32 %v1348_v6, %v1348_v6  ;;  %v1229_v55 = vadd.f32 1e-05, %v1228_v33 }
 0xdc3   :  { %v1356_v28 = vpop.xlane.xlu1 %1355 }
 0xdc4   :  { %1360 = vrot.lane.b32.xlu1 %v1358_v12, %s3829_s1  ;;  %v1357_v35 = vmul.f32 0.03125, %v1356_v28  ;;  %3627 = vrsqrt.f32 %v1229_v55 }
 0xdc6   :  { %v1365_v37 = vsub.f32 %v1357_v35, %v1364_v9 }
 0xdc8   :  { %v1366_v38 = vadd.f32 1e-05, %v1365_v37 }
 0xdca   :  { %3629 = vrsqrt.f32 %v1366_v38 }
 0xdce   :  { %v3628_v41 = vpop.eup %3627 }
 0xdd4   :  { %v3630_v44 = vpop.eup %3629 }
 0xe32   :  { %v1224_v31 = vpop.permute.xlu0 %1223 }
 0xe33   :  { %v1226_v39 = vmul.f32 %v1224_v31, %v4163_v29 }
 0xe35   :  { %v1231_v50 = vmul.f32 %v3628_v41, %v1226_v39 }
 0xe36   :  { %v1361_v21 = vpop.permute.xlu1 %1360 }
 0xe37   :  { %v1363_v11 = vmul.f32 %v1361_v21, %v4108_v22  ;;  %v1232_v43 = vadd.f32 %v1231_v50, %v4168_v5 }
 0xe39   :  { %v1368_v56 = vmul.f32 %v3630_v44, %v1363_v11  ;;  %1371 = vrot.lane.b32.xlu0 %v1232_v43, %s3824_s9 }
 0xe3b   :  { %v1369_v14 = vadd.f32 %v1368_v56, %v4113_v26 }
 0xe3d   :  { %3258 = vmatmul.mubr.msk.f32.vlgmr.msra.gmra.mrb[8].mxu1 %vm230_vm5, %v1369_v14 }
 0xe3e   :  { %3463 = vmatpush3.bf16.msra.mxu1 %v4090_v49  ;;  %3272 = vmatprep.mubr.msk.f32.mxu1 %vm3827_vm6, %v3828_v7 }
 0xe3f   :  { %3464 = vmatprep.subr.bf16.mxu1 %v3826_v62 }
 0xe42   :  { %3466 = vmatpush3.bf16.msra.mxu1 %v4094_v10 }
 0xe43   :  { %3467 = vmatprep.subr.bf16.mxu1 %v3826_v62 }
 0xe46   :  { %3469 = vmatpush3.bf16.msra.mxu1 %v4098_v60 }
 0xe47   :  { %3485 = vmatprep.subr.bf16.mxu1 %v3826_v62 }
 0xeab   :  { %v1372_v45 = vpop.permute.xlu0 %1371 }
 0xeac   :  { %v1374_v46 = vsel %vm230_vm5, %v1369_v14, %v1372_v45 }
 0xead   :  { %3247 = vmatmul.mubr.msk.f32.vlgmr.msra.gmra.mrb[12].mxu0 %vm573_vm9, %v1374_v46 }
 0xeae   :  { %3472 = vmatpush3.bf16.msra.mxu0 %v4016_v34  ;;  %3283 = vmatprep.mubr.msk.f32.mxu0 %vm3827_vm6, %v3828_v7 }
 0xeaf   :  { %3473 = vmatprep.subr.bf16.mxu0 %v3826_v62 }
 0xeb2   :  { %3475 = vmatpush3.bf16.msra.mxu0 %v4027_v36 }
 0xeb3   :  { %3476 = vmatprep.subr.bf16.mxu0 %v3826_v62 }
 0xf10   :  { %v1579_v47 = vpop.f32.mrb[8].mxu1 }
 0xf11   :  { %v1590_v48 = vadd.f32 %v1579_v47, %v4057_v54  ;;  %v3259_v51 = vpop.f32.mrb[9].mxu1  ;;  %v1583_v52 = vadd.f32 %v1579_v47, %v4066_v57 }
 0xf13   :  { %1592 = vrot.lane.b32.xlu0 %v1590_v48, %s3823_s3  ;;  %v2991_v53 = vmul.f32 -1.442695, %v1583_v52 }
 0xf15   :  { %3631 = vpow2.f32 %v2991_v53 }
 0xf1f   :  { %v3632_v59 = vpop.eup %3631 }
 0xf20   :  { %v1587_v0 = vadd.f32 1.0, %v3632_v59 }
 0xf22   :  { %3633 = vrcp.f32 %v1587_v0 }
 0xf2c   :  { %v3634_v2 = vpop.eup %3633 }
 0xf80   :  { %v1444_v1 = vpop.f32.mrb[12].mxu0 }
 0xf81   :  { %v1445_v61 = vadd.f32 %v1444_v1, %v4137_v4  ;;  %v3248_v63 = vpop.f32.mrb[13].mxu0 }
 0xf83   :  { %1455 = vrot.lane.b32.xlu1 %v1445_v61, %s3830_s15  ;;  %v2989_v16 = vmul.f32 -1.442695, %v1445_v61 }
 0xf85   :  { %v1593_v6 = vpop.permute.xlu0 %1592  ;;  %3635 = vpow2.f32 %v2989_v16 }
 0xf86   :  { %v1595_v12 = vmul.f32 %v3634_v2, %v1593_v6 }
 0xf88   :  { %1597 = vrot.lane.b32.xlu0 %v1595_v12, %s3823_s3 }
 0xf8c   :  { %1471 = vrot.lane.b32.xlu0 %v1232_v43, %s3825_s10 }
 0xf8f   :  { %v3636_v24 = vpop.eup %3635 }
 0xf90   :  { %1608 = vrot.lane.b32.xlu0 %v1369_v14, %s3824_s9  ;;  %v1451_v27 = vadd.f32 1.0, %v3636_v24  ;;  %v1602_v14 = vsub.f32 1.0, %v3634_v2 }
 0xf92   :  { %3637 = vrcp.f32 %v1451_v27 }
 0xf9c   :  { %v3638_v28 = vpop.eup %3637 }
 0xf9d   :  { %v1465_v50 = vsub.f32 1.0, %v3638_v28 }
 0xff5   :  { %v1456_v33 = vpop.permute.xlu1 %1455 }
 0xff6   :  { %v1458_v35 = vmul.f32 %v3638_v28, %v1456_v33 }
 0xff8   :  { %1460 = vrot.lane.b32.xlu1 %v1458_v35, %s3824_s9 }
 0xffa   :  { %v1598_v9 = vpop.permute.xlu0 %1597 }
 0xffb   :  { %v1600_v38 = vadd.f32 %v1598_v9, %v4066_v57 }
 0xffe   :  { %v1472_v41 = vpop.permute.xlu0 %1471 }
 0xfff   :  { %v1474_v11 = vmul.f32 %v3638_v28, %v1472_v41 }
0x1002   :  { %v1609_v44 = vpop.permute.xlu0 %1608 }
0x1003   :  { %v1611_v46 = vmul.f32 %v3634_v2, %v1609_v44 }
0x106a   :  { %v1461_v55 = vpop.permute.xlu1 %1460 }
0x106b   :  { %v1463_v37 = vadd.f32 %v1461_v55, %v1445_v61 }
0x106d   :  { %3639 = vtanh.f32 %v1463_v37 }
0x106e   :  { %3641 = vtanh.f32 %v1600_v38 }
0x1077   :  { %v3640_v31 = vpop.eup %3639 }
0x1078   :  { %1467 = vrot.lane.b32.xlu1 %v3640_v31, %s3831_s16  ;;  %v3642_v39 = vpop.eup %3641 }
0x107c   :  { %1604 = vrot.lane.b32.xlu1 %v3642_v39, %s3829_s1 }
0x10ea   :  { %v1468_v21 = vpop.permute.xlu1 %1467 }
0x10eb   :  { %v1470_v43 = vmul.f32 %v1468_v21, %v1465_v50 }
0x10ed   :  { %v1475_v56 = vadd.f32 %v1474_v11, %v1470_v43 }
0x10ee   :  { %v1605_v45 = vpop.permute.xlu1 %1604 }
0x10ef   :  { %v1607_v47 = vmul.f32 %v1605_v45, %v1602_v14  ;;  %1477 = vrot.lane.b32.xlu1 %v1475_v56, %s3831_s16  ;;  %v1484_v57 = vmul.f32 %v1475_v56, %v1475_v56 }
0x10f1   :  { %v1612_v48 = vadd.f32 %v1611_v46, %v1607_v47  ;;  %1486 = vrot.lane.b32.xlu0 %v1484_v57, %s3831_s16 }
0x10f3   :  { %1614 = vrot.lane.b32.xlu1 %v1612_v48, %s3829_s1  ;;  %v1621_v51 = vmul.f32 %v1612_v48, %v1612_v48 }
0x10f7   :  { %1623 = vrot.lane.b32.xlu1 %v1621_v51, %s3829_s1 }
0x1161   :  { %v1478_v52 = vpop.permute.xlu1 %1477 }
0x1162   :  { %v1480_v53 = vsel %vm936_vm10, %v1478_v52, 0.0 }
0x1163   :  { %v1487_v59 = vpop.permute.xlu0 %1486  ;;  %1481 = vadd.xlane.f32.xlu0 %v1480_v53 }
0x1164   :  { %v1489_v0 = vsel %vm936_vm10, %v1487_v59, 0.0 }
0x1165   :  { %1490 = vadd.xlane.f32.xlu1 %v1489_v0  ;;  %v1615_v1 = vpop.permute.xlu1 %1614 }
0x1166   :  { %v1617_v61 = vsel %vm806_vm8, %v1615_v1, 0.0 }
0x1167   :  { %1618 = vadd.xlane.f32.xlu0 %v1617_v61 }
0x1169   :  { %v1624_v63 = vpop.permute.xlu1 %1623 }
0x116a   :  { %v1626_v2 = vsel %vm806_vm8, %v1624_v63, 0.0 }
0x116b   :  { %1627 = vadd.xlane.f32.xlu1 %v1626_v2 }
0x11f0   :  { %v1482_v6 = vpop.xlane.xlu0 %1481 }
0x11f1   :  { %v1483_v12 = vmul.f32 0.0625, %v1482_v6 }
0x11f2   :  { %v1491_v33 = vpop.xlane.xlu1 %1490 }
0x11f3   :  { %v1493_v16 = vsub.f32 %v1475_v56, %v1483_v12  ;;  %v1499_v35 = vmul.f32 %v1483_v12, %v1483_v12  ;;  %v1492_v9 = vmul.f32 0.0625, %v1491_v33 }
0x11f4   :  { %v1619_v24 = vpop.xlane.xlu0 %1618 }
0x11f5   :  { %v1620_v27 = vmul.f32 0.03125, %v1619_v24  ;;  %1495 = vrot.lane.b32.xlu0 %v1493_v16, %s3831_s16  ;;  %v1500_v37 = vsub.f32 %v1492_v9, %v1499_v35 }
0x11f7   :  { %v1630_v28 = vsub.f32 %v1612_v48, %v1620_v27  ;;  %v1636_v31 = vmul.f32 %v1620_v27, %v1620_v27  ;;  %v1501_v39 = vadd.f32 1e-05, %v1500_v37 }
0x11f8   :  { %v1628_v55 = vpop.xlane.xlu1 %1627 }
0x11f9   :  { %1632 = vrot.lane.b32.xlu1 %v1630_v28, %s3829_s1  ;;  %v1629_v38 = vmul.f32 0.03125, %v1628_v55  ;;  %3643 = vrsqrt.f32 %v1501_v39 }
0x11fb   :  { %v1637_v41 = vsub.f32 %v1629_v38, %v1636_v31 }
0x11fd   :  { %v1638_v50 = vadd.f32 1e-05, %v1637_v41 }
0x11ff   :  { %3645 = vrsqrt.f32 %v1638_v50 }
0x1203   :  { %v3644_v43 = vpop.eup %3643 }
0x1209   :  { %v3646_v46 = vpop.eup %3645 }
0x1267   :  { %v1496_v21 = vpop.permute.xlu0 %1495 }
0x1268   :  { %v1498_v11 = vmul.f32 %v1496_v21, %v4163_v29 }
0x126a   :  { %v1503_v44 = vmul.f32 %v3644_v43, %v1498_v11 }
0x126b   :  { %v1633_v56 = vpop.permute.xlu1 %1632 }
0x126c   :  { %v1635_v14 = vmul.f32 %v1633_v56, %v4108_v22  ;;  %v1504_v45 = vadd.f32 %v1503_v44, %v4168_v5 }
0x126e   :  { %v1640_v47 = vmul.f32 %v3646_v46, %v1635_v14  ;;  %1643 = vrot.lane.b32.xlu0 %v1504_v45, %s3824_s9 }
0x1270   :  { %v1641_v57 = vadd.f32 %v1640_v47, %v4113_v26 }
0x1272   :  { %3284 = vmatmul.mubr.msk.f32.vlgmr.msra.gmra.mrb[14].mxu0 %vm230_vm5, %v1641_v57 }
0x1273   :  { %3478 = vmatpush3.bf16.msra.mxu0 %v4090_v49  ;;  %3298 = vmatprep.mubr.msk.f32.mxu0 %vm3827_vm6, %v3828_v7 }
0x1274   :  { %3479 = vmatprep.subr.bf16.mxu0 %v3826_v62 }
0x1277   :  { %3481 = vmatpush3.bf16.msra.mxu0 %v4094_v10 }
0x1278   :  { %3482 = vmatprep.subr.bf16.mxu0 %v3826_v62 }
0x127b   :  { %3484 = vmatpush3.bf16.msra.mxu0 %v4098_v60 }
0x127c   :  { %3500 = vmatprep.subr.bf16.mxu0 %v3826_v62 }
0x12e0   :  { %v1644_v48 = vpop.permute.xlu0 %1643 }
0x12e1   :  { %v1646_v51 = vsel %vm230_vm5, %v1641_v57, %v1644_v48 }
0x12e2   :  { %3273 = vmatmul.mubr.msk.f32.vlgmr.msra.gmra.mrb[10].mxu1 %vm573_vm9, %v1646_v51 }
0x12e3   :  { %3487 = vmatpush3.bf16.msra.mxu1 %v4016_v34  ;;  %3309 = vmatprep.mubr.msk.f32.mxu1 %vm3827_vm6, %v3828_v7 }
0x12e4   :  { %3488 = vmatprep.subr.bf16.mxu1 %v3826_v62 }
0x12e7   :  { %3490 = vmatpush3.bf16.msra.mxu1 %v4027_v36 }
0x12e8   :  { %3491 = vmatprep.subr.bf16.mxu1 %v3826_v62 }
0x1345   :  { %v1851_v52 = vpop.f32.mrb[14].mxu0 }
0x1346   :  { %v1862_v53 = vadd.f32 %v1851_v52, %v4057_v54  ;;  %v3285_v59 = vpop.f32.mrb[15].mxu0  ;;  %v1855_v0 = vadd.f32 %v1851_v52, %v4069_v58 }
0x1348   :  { %1864 = vrot.lane.b32.xlu1 %v1862_v53, %s3823_s3  ;;  %v2995_v1 = vmul.f32 -1.442695, %v1855_v0 }
0x134a   :  { %3647 = vpow2.f32 %v2995_v1 }
0x1354   :  { %v3648_v61 = vpop.eup %3647 }
0x1355   :  { %v1859_v63 = vadd.f32 1.0, %v3648_v61 }
0x1357   :  { %3649 = vrcp.f32 %v1859_v63 }
0x1361   :  { %v3650_v16 = vpop.eup %3649 }
0x1362   :  { %v1874_v47 = vsub.f32 1.0, %v3650_v16 }
0x13b5   :  { %v1716_v2 = vpop.f32.mrb[10].mxu1 }
0x13b6   :  { %v1717_v6 = vadd.f32 %v1716_v2, %v4137_v4  ;;  %v3274_v12 = vpop.f32.mrb[11].mxu1 }
0x13b8   :  { %1727 = vrot.lane.b32.xlu0 %v1717_v6, %s3830_s15  ;;  %v2993_v28 = vmul.f32 -1.442695, %v1717_v6 }
0x13ba   :  { %v1865_v24 = vpop.permute.xlu1 %1864  ;;  %3651 = vpow2.f32 %v2993_v28 }
0x13bb   :  { %v1867_v27 = vmul.f32 %v3650_v16, %v1865_v24 }
0x13bd   :  { %1869 = vrot.lane.b32.xlu1 %v1867_v27, %s3823_s3 }
0x13c1   :  { %1743 = vrot.lane.b32.xlu1 %v1504_v45, %s3825_s10 }
0x13c4   :  { %v3652_v33 = vpop.eup %3651 }
0x13c5   :  { %1880 = vrot.lane.b32.xlu1 %v1641_v57, %s3824_s9  ;;  %v1723_v35 = vadd.f32 1.0, %v3652_v33 }
0x13c7   :  { %3653 = vrcp.f32 %v1723_v35 }
0x13d1   :  { %v3654_v9 = vpop.eup %3653 }
0x13d2   :  { %v1737_v43 = vsub.f32 1.0, %v3654_v9 }
0x142a   :  { %v1728_v55 = vpop.permute.xlu0 %1727 }
0x142b   :  { %v1730_v37 = vmul.f32 %v3654_v9, %v1728_v55 }
0x142d   :  { %1732 = vrot.lane.b32.xlu0 %v1730_v37, %s3824_s9 }
0x142f   :  { %v1870_v38 = vpop.permute.xlu1 %1869 }
0x1430   :  { %v1872_v41 = vadd.f32 %v1870_v38, %v4069_v58 }
0x1433   :  { %v1744_v11 = vpop.permute.xlu1 %1743 }
0x1434   :  { %v1746_v56 = vmul.f32 %v3654_v9, %v1744_v11 }
0x1437   :  { %v1881_v45 = vpop.permute.xlu1 %1880 }
0x1438   :  { %v1883_v48 = vmul.f32 %v3650_v16, %v1881_v45 }
0x149f   :  { %v1733_v31 = vpop.permute.xlu0 %1732 }
0x14a0   :  { %v1735_v39 = vadd.f32 %v1733_v31, %v1717_v6 }
0x14a2   :  { %3655 = vtanh.f32 %v1735_v39 }
0x14a3   :  { %3657 = vtanh.f32 %v1872_v41 }
0x14ac   :  { %v3656_v50 = vpop.eup %3655 }
0x14ad   :  { %1739 = vrot.lane.b32.xlu0 %v3656_v50, %s3831_s16  ;;  %v3658_v21 = vpop.eup %3657 }
0x14b1   :  { %1876 = vrot.lane.b32.xlu0 %v3658_v21, %s3829_s1 }
0x151f   :  { %v1740_v44 = vpop.permute.xlu0 %1739 }
0x1520   :  { %v1742_v14 = vmul.f32 %v1740_v44, %v1737_v43 }
0x1522   :  { %v1747_v46 = vadd.f32 %v1746_v56, %v1742_v14 }
0x1523   :  { %v1877_v57 = vpop.permute.xlu0 %1876 }
0x1524   :  { %v1879_v51 = vmul.f32 %v1877_v57, %v1874_v47  ;;  %1749 = vrot.lane.b32.xlu0 %v1747_v46, %s3831_s16  ;;  %v1756_v58 = vmul.f32 %v1747_v46, %v1747_v46 }
0x1526   :  { %v1884_v52 = vadd.f32 %v1883_v48, %v1879_v51  ;;  %1758 = vrot.lane.b32.xlu1 %v1756_v58, %s3831_s16 }
0x1528   :  { %1886 = vrot.lane.b32.xlu0 %v1884_v52, %s3829_s1  ;;  %v1893_v53 = vmul.f32 %v1884_v52, %v1884_v52 }
0x152c   :  { %1895 = vrot.lane.b32.xlu0 %v1893_v53, %s3829_s1 }
0x1596   :  { %v1750_v59 = vpop.permute.xlu0 %1749 }
0x1597   :  { %v1752_v0 = vsel %vm936_vm10, %v1750_v59, 0.0 }
0x1598   :  { %1753 = vadd.xlane.f32.xlu1 %v1752_v0  ;;  %v1759_v1 = vpop.permute.xlu1 %1758 }
0x1599   :  { %v1761_v61 = vsel %vm936_vm10, %v1759_v1, 0.0 }
0x159a   :  { %v1887_v63 = vpop.permute.xlu0 %1886  ;;  %1762 = vadd.xlane.f32.xlu0 %v1761_v61 }
0x159b   :  { %v1889_v2 = vsel %vm806_vm8, %v1887_v63, 0.0 }
0x159c   :  { %1890 = vadd.xlane.f32.xlu1 %v1889_v2 }
0x159e   :  { %v1896_v6 = vpop.permute.xlu0 %1895 }
0x159f   :  { %v1898_v12 = vsel %vm806_vm8, %v1896_v6, 0.0 }
0x15a0   :  { %1899 = vadd.xlane.f32.xlu1 %v1898_v12 }
0x1625   :  { %v1754_v16 = vpop.xlane.xlu1 %1753 }
0x1626   :  { %v1755_v24 = vmul.f32 0.0625, %v1754_v16 }
0x1627   :  { %v1763_v9 = vpop.xlane.xlu0 %1762 }
0x1628   :  { %v1765_v27 = vsub.f32 %v1747_v46, %v1755_v24  ;;  %v1771_v55 = vmul.f32 %v1755_v24, %v1755_v24  ;;  %v1764_v37 = vmul.f32 0.0625, %v1763_v9 }
0x1629   :  { %v1891_v28 = vpop.xlane.xlu1 %1890 }
0x162a   :  { %v1892_v33 = vmul.f32 0.03125, %v1891_v28  ;;  %1767 = vrot.lane.b32.xlu0 %v1765_v27, %s3831_s16  ;;  %v1772_v31 = vsub.f32 %v1764_v37, %v1771_v55 }
0x162c   :  { %v1902_v35 = vsub.f32 %v1884_v52, %v1892_v33  ;;  %v1908_v41 = vmul.f32 %v1892_v33, %v1892_v33  ;;  %v1773_v50 = vadd.f32 1e-05, %v1772_v31 }
0x162d   :  { %v1900_v38 = vpop.xlane.xlu1 %1899 }
0x162e   :  { %1904 = vrot.lane.b32.xlu1 %v1902_v35, %s3829_s1  ;;  %v1901_v39 = vmul.f32 0.03125, %v1900_v38  ;;  %3659 = vrsqrt.f32 %v1773_v50 }
0x1630   :  { %v1909_v21 = vsub.f32 %v1901_v39, %v1908_v41 }
0x1632   :  { %v1910_v11 = vadd.f32 1e-05, %v1909_v21 }
0x1634   :  { %3661 = vrsqrt.f32 %v1910_v11 }
0x1638   :  { %v3660_v56 = vpop.eup %3659 }
0x163e   :  { %v3662_v57 = vpop.eup %3661 }
0x169c   :  { %v1768_v43 = vpop.permute.xlu0 %1767 }
0x169d   :  { %v1770_v44 = vmul.f32 %v1768_v43, %v4163_v29 }
0x169f   :  { %v1775_v14 = vmul.f32 %v3660_v56, %v1770_v44 }
0x16a0   :  { %v1905_v45 = vpop.permute.xlu1 %1904 }
0x16a1   :  { %v1907_v46 = vmul.f32 %v1905_v45, %v4108_v22  ;;  %v1776_v47 = vadd.f32 %v1775_v14, %v4168_v5 }
0x16a3   :  { %v1912_v48 = vmul.f32 %v3662_v57, %v1907_v46  ;;  %1915 = vrot.lane.b32.xlu0 %v1776_v47, %s3824_s9 }
0x16a5   :  { %v1913_v51 = vadd.f32 %v1912_v48, %v4113_v26 }
0x16a7   :  { %3310 = vmatmul.mubr.msk.f32.vlgmr.msra.gmra.mrb[12].mxu1 %vm230_vm5, %v1913_v51 }
0x16a8   :  { %3493 = vmatpush3.bf16.msra.mxu1 %v4090_v49  ;;  %3324 = vmatprep.mubr.msk.f32.mxu1 %vm3827_vm6, %v3828_v7 }
0x16a9   :  { %3494 = vmatprep.subr.bf16.mxu1 %v3826_v62 }
0x16ac   :  { %3496 = vmatpush3.bf16.msra.mxu1 %v4094_v10 }
0x16ad   :  { %3497 = vmatprep.subr.bf16.mxu1 %v3826_v62 }
0x16b0   :  { %3499 = vmatpush3.bf16.msra.mxu1 %v4098_v60 }
0x16b1   :  { %3515 = vmatprep.subr.bf16.mxu1 %v3826_v62 }
0x1715   :  { %v1916_v58 = vpop.permute.xlu0 %1915 }
0x1716   :  { %v1918_v52 = vsel %vm230_vm5, %v1913_v51, %v1916_v58 }
0x1717   :  { %3299 = vmatmul.mubr.msk.f32.vlgmr.msra.gmra.mrb[16].mxu0 %vm573_vm9, %v1918_v52 }
0x1718   :  { %3502 = vmatpush3.bf16.msra.mxu0 %v4016_v34  ;;  %3335 = vmatprep.mubr.msk.f32.mxu0 %vm3827_vm6, %v3828_v7 }
0x1719   :  { %3503 = vmatprep.subr.bf16.mxu0 %v3826_v62 }
0x171c   :  { %3505 = vmatpush3.bf16.msra.mxu0 %v4027_v36 }
0x171d   :  { %3506 = vmatprep.subr.bf16.mxu0 %v3826_v62 }
0x177a   :  { %v2123_v53 = vpop.f32.mrb[12].mxu1 }
0x177b   :  { %v2134_v59 = vadd.f32 %v2123_v53, %v4057_v54  ;;  %v3311_v0 = vpop.f32.mrb[13].mxu1  ;;  %v2127_v1 = vadd.f32 %v2123_v53, %v4073_v18 }
0x177d   :  { %2136 = vrot.lane.b32.xlu0 %v2134_v59, %s3823_s3  ;;  %v2999_v61 = vmul.f32 -1.442695, %v2127_v1 }
0x177f   :  { %3663 = vpow2.f32 %v2999_v61 }
0x1789   :  { %v3664_v63 = vpop.eup %3663 }
0x178a   :  { %v2131_v2 = vadd.f32 1.0, %v3664_v63 }
0x178c   :  { %3665 = vrcp.f32 %v2131_v2 }
0x1796   :  { %v3666_v24 = vpop.eup %3665 }
0x1797   :  { %v2146_v57 = vsub.f32 1.0, %v3666_v24 }
0x17ea   :  { %v1988_v6 = vpop.f32.mrb[16].mxu0 }
0x17eb   :  { %v1989_v12 = vadd.f32 %v1988_v6, %v4137_v4  ;;  %v3300_v16 = vpop.f32.mrb[17].mxu0 }
0x17ed   :  { %1999 = vrot.lane.b32.xlu1 %v1989_v12, %s3830_s15  ;;  %v2997_v33 = vmul.f32 -1.442695, %v1989_v12 }
0x17ef   :  { %v2137_v27 = vpop.permute.xlu0 %2136  ;;  %3667 = vpow2.f32 %v2997_v33 }
0x17f0   :  { %v2139_v28 = vmul.f32 %v3666_v24, %v2137_v27 }
0x17f2   :  { %2141 = vrot.lane.b32.xlu0 %v2139_v28, %s3823_s3 }
0x17f6   :  { %2015 = vrot.lane.b32.xlu0 %v1776_v47, %s3825_s10 }
0x17f9   :  { %v3668_v35 = vpop.eup %3667 }
0x17fa   :  { %2152 = vrot.lane.b32.xlu0 %v1913_v51, %s3824_s9  ;;  %v1995_v9 = vadd.f32 1.0, %v3668_v35 }
0x17fc   :  { %3669 = vrcp.f32 %v1995_v9 }
0x1806   :  { %v3670_v55 = vpop.eup %3669 }
0x1807   :  { %v2009_v44 = vsub.f32 1.0, %v3670_v55 }
0x185f   :  { %v2000_v37 = vpop.permute.xlu1 %1999 }
0x1860   :  { %v2002_v38 = vmul.f32 %v3670_v55, %v2000_v37 }
0x1862   :  { %2004 = vrot.lane.b32.xlu1 %v2002_v38, %s3824_s9 }
0x1864   :  { %v2142_v31 = vpop.permute.xlu0 %2141 }
0x1865   :  { %v2144_v50 = vadd.f32 %v2142_v31, %v4073_v18 }
0x1868   :  { %v2016_v43 = vpop.permute.xlu0 %2015 }
0x1869   :  { %v2018_v14 = vmul.f32 %v3670_v55, %v2016_v43 }
0x186c   :  { %v2153_v46 = vpop.permute.xlu0 %2152 }
0x186d   :  { %v2155_v51 = vmul.f32 %v3666_v24, %v2153_v46 }
0x18d4   :  { %v2005_v39 = vpop.permute.xlu1 %2004 }
0x18d5   :  { %v2007_v41 = vadd.f32 %v2005_v39, %v1989_v12 }
0x18d7   :  { %3671 = vtanh.f32 %v2007_v41 }
0x18d8   :  { %3673 = vtanh.f32 %v2144_v50 }
0x18e1   :  { %v3672_v21 = vpop.eup %3671 }
0x18e2   :  { %2011 = vrot.lane.b32.xlu1 %v3672_v21, %s3831_s16  ;;  %v3674_v11 = vpop.eup %3673 }
0x18e6   :  { %2148 = vrot.lane.b32.xlu1 %v3674_v11, %s3829_s1 }
0x1954   :  { %v2012_v56 = vpop.permute.xlu1 %2011 }
0x1955   :  { %v2014_v45 = vmul.f32 %v2012_v56, %v2009_v44 }
0x1957   :  { %v2019_v47 = vadd.f32 %v2018_v14, %v2014_v45 }
0x1958   :  { %v2149_v48 = vpop.permute.xlu1 %2148 }
0x1959   :  { %v2028_v58 = vmul.f32 %v2019_v47, %v2019_v47  ;;  %v2151_v18 = vmul.f32 %v2149_v48, %v2146_v57  ;;  %2021 = vrot.lane.b32.xlu1 %v2019_v47, %s3831_s16 }
0x195b   :  { %v2156_v52 = vadd.f32 %v2155_v51, %v2151_v18  ;;  %2030 = vrot.lane.b32.xlu0 %v2028_v58, %s3831_s16 }
0x195d   :  { %2158 = vrot.lane.b32.xlu1 %v2156_v52, %s3829_s1  ;;  %v2165_v53 = vmul.f32 %v2156_v52, %v2156_v52 }
0x1961   :  { %2167 = vrot.lane.b32.xlu1 %v2165_v53, %s3829_s1 }
0x19cb   :  { %v2022_v59 = vpop.permute.xlu1 %2021 }
0x19cc   :  { %v2024_v0 = vsel %vm936_vm10, %v2022_v59, 0.0 }
0x19cd   :  { %v2031_v1 = vpop.permute.xlu0 %2030  ;;  %2025 = vadd.xlane.f32.xlu0 %v2024_v0 }
0x19ce   :  { %v2033_v61 = vsel %vm936_vm10, %v2031_v1, 0.0 }
0x19cf   :  { %2034 = vadd.xlane.f32.xlu1 %v2033_v61  ;;  %v2159_v63 = vpop.permute.xlu1 %2158 }
0x19d0   :  { %v2161_v2 = vsel %vm806_vm8, %v2159_v63, 0.0 }
0x19d1   :  { %2162 = vadd.xlane.f32.xlu0 %v2161_v2 }
0x19d3   :  { %v2168_v6 = vpop.permute.xlu1 %2167 }
0x19d4   :  { %v2170_v12 = vsel %vm806_vm8, %v2168_v6, 0.0 }
0x19d5   :  { %2171 = vadd.xlane.f32.xlu1 %v2170_v12 }
0x1a5a   :  { %v2026_v16 = vpop.xlane.xlu0 %2025 }
0x1a5b   :  { %v2027_v24 = vmul.f32 0.0625, %v2026_v16 }
0x1a5c   :  { %v2035_v9 = vpop.xlane.xlu1 %2034 }
0x1a5d   :  { %v2037_v27 = vsub.f32 %v2019_v47, %v2027_v24  ;;  %v2043_v55 = vmul.f32 %v2027_v24, %v2027_v24  ;;  %v2036_v37 = vmul.f32 0.0625, %v2035_v9 }
0x1a5e   :  { %v2163_v28 = vpop.xlane.xlu0 %2162 }
0x1a5f   :  { %v2164_v33 = vmul.f32 0.03125, %v2163_v28  ;;  %2039 = vrot.lane.b32.xlu0 %v2037_v27, %s3831_s16  ;;  %v2044_v31 = vsub.f32 %v2036_v37, %v2043_v55 }
0x1a61   :  { %v2174_v35 = vsub.f32 %v2156_v52, %v2164_v33  ;;  %v2180_v41 = vmul.f32 %v2164_v33, %v2164_v33  ;;  %v2045_v50 = vadd.f32 1e-05, %v2044_v31 }
0x1a62   :  { %v2172_v38 = vpop.xlane.xlu1 %2171 }
0x1a63   :  { %2176 = vrot.lane.b32.xlu1 %v2174_v35, %s3829_s1  ;;  %v2173_v39 = vmul.f32 0.03125, %v2172_v38  ;;  %3675 = vrsqrt.f32 %v2045_v50 }
0x1a65   :  { %v2181_v21 = vsub.f32 %v2173_v39, %v2180_v41 }
0x1a67   :  { %v2182_v11 = vadd.f32 1e-05, %v2181_v21 }
0x1a69   :  { %3677 = vrsqrt.f32 %v2182_v11 }
0x1a6d   :  { %v3676_v56 = vpop.eup %3675 }
0x1a73   :  { %v3678_v57 = vpop.eup %3677 }
0x1ad1   :  { %v2040_v43 = vpop.permute.xlu0 %2039 }
0x1ad2   :  { %v2042_v44 = vmul.f32 %v2040_v43, %v4163_v29 }
0x1ad4   :  { %v2047_v14 = vmul.f32 %v3676_v56, %v2042_v44 }
0x1ad5   :  { %v2177_v45 = vpop.permute.xlu1 %2176 }
0x1ad6   :  { %v2048_v46 = vadd.f32 %v2047_v14, %v4168_v5  ;;  %v2179_v47 = vmul.f32 %v2177_v45, %v4108_v22 }
0x1ad8   :  { %v2184_v48 = vmul.f32 %v3678_v57, %v2179_v47  ;;  %2187 = vrot.lane.b32.xlu0 %v2048_v46, %s3824_s9 }
0x1ada   :  { %v2185_v51 = vadd.f32 %v2184_v48, %v4113_v26 }
0x1adc   :  { %3336 = vmatmul.mubr.msk.f32.vlgmr.msra.gmra.mrb[18].mxu0 %vm230_vm5, %v2185_v51 }
0x1add   :  { %3508 = vmatpush3.bf16.msra.mxu0 %v4090_v49  ;;  %3350 = vmatprep.mubr.msk.f32.mxu0 %vm3827_vm6, %v3828_v7 }
0x1ade   :  { %3509 = vmatprep.subr.bf16.mxu0 %v3826_v62 }
0x1ae1   :  { %3511 = vmatpush3.bf16.msra.mxu0 %v4094_v10 }
0x1ae2   :  { %3512 = vmatprep.subr.bf16.mxu0 %v3826_v62 }
0x1ae5   :  { %3514 = vmatpush3.bf16.msra.mxu0 %v4098_v60 }
0x1ae6   :  { %3530 = vmatprep.subr.bf16.mxu0 %v3826_v62 }
0x1b4a   :  { %v2188_v58 = vpop.permute.xlu0 %2187 }
0x1b4b   :  { %v2190_v18 = vsel %vm230_vm5, %v2185_v51, %v2188_v58 }
0x1b4c   :  { %3325 = vmatmul.mubr.msk.f32.vlgmr.msra.gmra.mrb[14].mxu1 %vm573_vm9, %v2190_v18 }
0x1b4d   :  { %3517 = vmatpush3.bf16.msra.mxu1 %v4016_v34  ;;  %3361 = vmatprep.mubr.msk.f32.mxu1 %vm3827_vm6, %v3828_v7 }
0x1b4e   :  { %3518 = vmatprep.subr.bf16.mxu1 %v3826_v62 }
0x1b51   :  { %3520 = vmatpush3.bf16.msra.mxu1 %v4027_v36 }
0x1b52   :  { %3521 = vmatprep.subr.bf16.mxu1 %v3826_v62 }
0x1baf   :  { %v2395_v52 = vpop.f32.mrb[18].mxu0 }
0x1bb0   :  { %v2406_v53 = vadd.f32 %v2395_v52, %v4057_v54  ;;  %v3337_v59 = vpop.f32.mrb[19].mxu0  ;;  %v2399_v0 = vadd.f32 %v2395_v52, %v4076_v19 }
0x1bb2   :  { %2408 = vrot.lane.b32.xlu1 %v2406_v53, %s3823_s3  ;;  %v3003_v1 = vmul.f32 -1.442695, %v2399_v0 }
0x1bb4   :  { %3679 = vpow2.f32 %v3003_v1 }
0x1bbe   :  { %v3680_v34 = vpop.eup %3679 }
0x1bbf   :  { %v2403_v61 = vadd.f32 1.0, %v3680_v34 }
0x1bc1   :  { %3681 = vrcp.f32 %v2403_v61 }
0x1bcb   :  { %v3682_v36 = vpop.eup %3681 }
0x1bcc   :  { %v2418_v45 = vsub.f32 1.0, %v3682_v36 }
0x1c1f   :  { %v2260_v63 = vpop.f32.mrb[14].mxu1 }
0x1c20   :  { %v2261_v2 = vadd.f32 %v2260_v63, %v4137_v4  ;;  %v3326_v6 = vpop.f32.mrb[15].mxu1 }
0x1c22   :  { %2271 = vrot.lane.b32.xlu0 %v2261_v2, %s3830_s15  ;;  %v3001_v24 = vmul.f32 -1.442695, %v2261_v2 }
0x1c24   :  { %v2409_v12 = vpop.permute.xlu1 %2408  ;;  %3683 = vpow2.f32 %v3001_v24 }
0x1c25   :  { %v2411_v16 = vmul.f32 %v3682_v36, %v2409_v12 }
0x1c27   :  { %2413 = vrot.lane.b32.xlu1 %v2411_v16, %s3823_s3 }
0x1c2b   :  { %2287 = vrot.lane.b32.xlu1 %v2048_v46, %s3825_s10 }
0x1c2e   :  { %v3684_v27 = vpop.eup %3683 }
0x1c2f   :  { %2424 = vrot.lane.b32.xlu1 %v2185_v51, %s3824_s9  ;;  %v2267_v28 = vadd.f32 1.0, %v3684_v27 }
0x1c31   :  { %3685 = vrcp.f32 %v2267_v28 }
0x1c3b   :  { %v3686_v33 = vpop.eup %3685 }
0x1c3c   :  { %v2281_v21 = vsub.f32 1.0, %v3686_v33 }
0x1c94   :  { %v2272_v35 = vpop.permute.xlu0 %2271 }
0x1c95   :  { %v2274_v9 = vmul.f32 %v3686_v33, %v2272_v35 }
0x1c97   :  { %2276 = vrot.lane.b32.xlu0 %v2274_v9, %s3824_s9 }
0x1c99   :  { %v2414_v55 = vpop.permute.xlu1 %2413 }
0x1c9a   :  { %v2416_v31 = vadd.f32 %v2414_v55, %v4076_v19 }
0x1c9d   :  { %v2288_v50 = vpop.permute.xlu1 %2287 }
0x1c9e   :  { %v2290_v43 = vmul.f32 %v3686_v33, %v2288_v50 }
0x1ca1   :  { %v2425_v56 = vpop.permute.xlu1 %2424 }
0x1ca2   :  { %v2427_v47 = vmul.f32 %v3682_v36, %v2425_v56 }
0x1d09   :  { %v2277_v37 = vpop.permute.xlu0 %2276 }
0x1d0a   :  { %v2279_v38 = vadd.f32 %v2277_v37, %v2261_v2 }
0x1d0c   :  { %3687 = vtanh.f32 %v2279_v38 }
0x1d0d   :  { %3689 = vtanh.f32 %v2416_v31 }
0x1d16   :  { %v3688_v39 = vpop.eup %3687 }
0x1d17   :  { %2283 = vrot.lane.b32.xlu0 %v3688_v39, %s3831_s16  ;;  %v3690_v41 = vpop.eup %3689 }
0x1d1b   :  { %2420 = vrot.lane.b32.xlu0 %v3690_v41, %s3829_s1 }
0x1d89   :  { %v2284_v11 = vpop.permute.xlu0 %2283 }
0x1d8a   :  { %v2286_v44 = vmul.f32 %v2284_v11, %v2281_v21 }
0x1d8c   :  { %v2291_v14 = vadd.f32 %v2290_v43, %v2286_v44 }
0x1d8d   :  { %v2421_v46 = vpop.permute.xlu0 %2420 }
0x1d8e   :  { %v2300_v57 = vmul.f32 %v2291_v14, %v2291_v14  ;;  %v2423_v19 = vmul.f32 %v2421_v46, %v2418_v45  ;;  %2293 = vrot.lane.b32.xlu0 %v2291_v14, %s3831_s16 }
0x1d90   :  { %v2428_v48 = vadd.f32 %v2427_v47, %v2423_v19  ;;  %2302 = vrot.lane.b32.xlu1 %v2300_v57, %s3831_s16 }
0x1d92   :  { %2430 = vrot.lane.b32.xlu0 %v2428_v48, %s3829_s1  ;;  %v2437_v51 = vmul.f32 %v2428_v48, %v2428_v48 }
0x1d96   :  { %2439 = vrot.lane.b32.xlu0 %v2437_v51, %s3829_s1 }
0x1e00   :  { %v2294_v58 = vpop.permute.xlu0 %2293 }
0x1e01   :  { %v2296_v18 = vsel %vm936_vm10, %v2294_v58, 0.0 }
0x1e02   :  { %2297 = vadd.xlane.f32.xlu1 %v2296_v18  ;;  %v2303_v52 = vpop.permute.xlu1 %2302 }
0x1e03   :  { %v2305_v53 = vsel %vm936_vm10, %v2303_v52, 0.0 }
0x1e04   :  { %v2431_v59 = vpop.permute.xlu0 %2430  ;;  %2306 = vadd.xlane.f32.xlu0 %v2305_v53 }
0x1e05   :  { %v2433_v0 = vsel %vm806_vm8, %v2431_v59, 0.0 }
0x1e06   :  { %2434 = vadd.xlane.f32.xlu1 %v2433_v0 }
0x1e08   :  { %v2440_v1 = vpop.permute.xlu0 %2439 }
0x1e09   :  { %v2442_v34 = vsel %vm806_vm8, %v2440_v1, 0.0 }
0x1e0a   :  { %2443 = vadd.xlane.f32.xlu1 %v2442_v34 }
0x1e8f   :  { %v2298_v61 = vpop.xlane.xlu1 %2297 }
0x1e90   :  { %v2299_v63 = vmul.f32 0.0625, %v2298_v61 }
0x1e91   :  { %v2307_v16 = vpop.xlane.xlu0 %2306 }
0x1e92   :  { %v2309_v2 = vsub.f32 %v2291_v14, %v2299_v63  ;;  %v2315_v24 = vmul.f32 %v2299_v63, %v2299_v63  ;;  %v2308_v27 = vmul.f32 0.0625, %v2307_v16 }
0x1e93   :  { %v2435_v6 = vpop.xlane.xlu1 %2434 }
0x1e94   :  { %v2436_v36 = vmul.f32 0.03125, %v2435_v6  ;;  %2311 = vrot.lane.b32.xlu0 %v2309_v2, %s3831_s16  ;;  %v2316_v33 = vsub.f32 %v2308_v27, %v2315_v24 }
0x1e96   :  { %v2446_v12 = vsub.f32 %v2428_v48, %v2436_v36  ;;  %v2452_v9 = vmul.f32 %v2436_v36, %v2436_v36  ;;  %v2317_v55 = vadd.f32 1e-05, %v2316_v33 }
0x1e97   :  { %v2444_v28 = vpop.xlane.xlu1 %2443 }
0x1e98   :  { %2448 = vrot.lane.b32.xlu1 %v2446_v12, %s3829_s1  ;;  %v2445_v35 = vmul.f32 0.03125, %v2444_v28  ;;  %3691 = vrsqrt.f32 %v2317_v55 }
0x1e9a   :  { %v2453_v37 = vsub.f32 %v2445_v35, %v2452_v9 }
0x1e9c   :  { %v2454_v38 = vadd.f32 1e-05, %v2453_v37 }
0x1e9e   :  { %3693 = vrsqrt.f32 %v2454_v38 }
0x1ea2   :  { %v3692_v41 = vpop.eup %3691 }
0x1ea8   :  { %v3694_v44 = vpop.eup %3693 }
0x1f06   :  { %v2312_v31 = vpop.permute.xlu0 %2311 }
0x1f07   :  { %v2314_v39 = vmul.f32 %v2312_v31, %v4163_v29 }
0x1f09   :  { %v2319_v50 = vmul.f32 %v3692_v41, %v2314_v39 }
0x1f0a   :  { %v2449_v21 = vpop.permute.xlu1 %2448 }
0x1f0b   :  { %v2320_v11 = vadd.f32 %v2319_v50, %v4168_v5  ;;  %v2451_v43 = vmul.f32 %v2449_v21, %v4108_v22 }
0x1f0d   :  { %v2456_v56 = vmul.f32 %v3694_v44, %v2451_v43  ;;  %2459 = vrot.lane.b32.xlu0 %v2320_v11, %s3824_s9 }
0x1f0f   :  { %v2457_v14 = vadd.f32 %v2456_v56, %v4113_v26 }
0x1f11   :  { %3362 = vmatmul.mubr.msk.f32.vlgmr.msra.gmra.mrb[16].mxu1 %vm230_vm5, %v2457_v14 }
0x1f12   :  { %3523 = vmatpush3.bf16.msra.mxu1 %v4090_v49  ;;  %3376 = vmatprep.mubr.msk.f32.mxu1 %vm3827_vm6, %v3828_v7 }
0x1f13   :  { %3524 = vmatprep.subr.bf16.mxu1 %v3826_v62 }
0x1f16   :  { %3526 = vmatpush3.bf16.msra.mxu1 %v4094_v10 }
0x1f17   :  { %3527 = vmatprep.subr.bf16.mxu1 %v3826_v62 }
0x1f1a   :  { %3529 = vmatpush3.bf16.msra.mxu1 %v4098_v60 }
0x1f7f   :  { %v2460_v45 = vpop.permute.xlu0 %2459 }
0x1f80   :  { %v2462_v46 = vsel %vm230_vm5, %v2457_v14, %v2460_v45 }
0x1f81   :  { %3351 = vmatmul.mubr.msk.f32.vlgmr.msra.gmra.mrb[20].mxu0 %vm573_vm9, %v2462_v46 }
0x1f82   :  { %3383 = vmatprep.mubr.msk.f32.mxu0 %vm3827_vm6, %v3828_v7 }
0x1fe4   :  { %v2667_v49 = vpop.f32.mrb[16].mxu1 }
0x1fe5   :  { %v2678_v47 = vadd.f32 %v2667_v49, %v4057_v54  ;;  %v3363_v57 = vpop.f32.mrb[17].mxu1  ;;  %v2671_v10 = vadd.f32 %v2667_v49, %v4079_v20 }
0x1fe7   :  { %2680 = vrot.lane.b32.xlu0 %v2678_v47, %s3823_s3  ;;  %v3007_v19 = vmul.f32 -1.442695, %v2671_v10 }
0x1fe9   :  { %3695 = vpow2.f32 %v3007_v19 }
0x1ff3   :  { %v3696_v62 = vpop.eup %3695 }
0x1ff4   :  { %v2675_v60 = vadd.f32 1.0, %v3696_v62 }
0x1ff6   :  { %3697 = vrcp.f32 %v2675_v60 }
0x2000   :  { %v3698_v7 = vpop.eup %3697 }
0x2001   :  { %v2690_v55 = vsub.f32 1.0, %v3698_v7 }
0x2054   :  { %v2532_v48 = vpop.f32.mrb[20].mxu0 }
0x2055   :  { %v2533_v51 = vadd.f32 %v2532_v48, %v4137_v4  ;;  %v3352_v58 = vpop.f32.mrb[21].mxu0 }
0x2057   :  { %2543 = vrot.lane.b32.xlu1 %v2533_v51, %s3830_s15  ;;  %v3005_v54 = vmul.f32 -1.442695, %v2533_v51 }
0x2059   :  { %v2681_v18 = vpop.permute.xlu0 %2680  ;;  %3699 = vpow2.f32 %v3005_v54 }
0x205a   :  { %v2683_v52 = vmul.f32 %v3698_v7, %v2681_v18 }
0x205c   :  { %2685 = vrot.lane.b32.xlu0 %v2683_v52, %s3823_s3 }
0x2060   :  { %2559 = vrot.lane.b32.xlu0 %v2320_v11, %s3825_s10 }
0x2063   :  { %v3700_v53 = vpop.eup %3699 }
0x2064   :  { %2696 = vrot.lane.b32.xlu0 %v2457_v14, %s3824_s9  ;;  %v2539_v59 = vadd.f32 1.0, %v3700_v53 }
0x2066   :  { %3701 = vrcp.f32 %v2539_v59 }
0x2070   :  { %v3702_v0 = vpop.eup %3701 }
0x2071   :  { %v2553_v24 = vsub.f32 1.0, %v3702_v0 }
0x20c9   :  { %v2544_v1 = vpop.permute.xlu1 %2543 }
0x20ca   :  { %v2546_v34 = vmul.f32 %v3702_v0, %v2544_v1 }
0x20cc   :  { %2548 = vrot.lane.b32.xlu1 %v2546_v34, %s3824_s9 }
0x20ce   :  { %v2686_v61 = vpop.permute.xlu0 %2685 }
0x20cf   :  { %v2688_v6 = vadd.f32 %v2686_v61, %v4079_v20 }
0x20d2   :  { %v2560_v16 = vpop.permute.xlu0 %2559 }
0x20d3   :  { %v2562_v28 = vmul.f32 %v3702_v0, %v2560_v16 }
0x20d6   :  { %v2697_v35 = vpop.permute.xlu0 %2696 }
0x20d7   :  { %v2699_v38 = vmul.f32 %v3698_v7, %v2697_v35 }
0x213e   :  { %v2549_v63 = vpop.permute.xlu1 %2548 }
0x213f   :  { %v2551_v2 = vadd.f32 %v2549_v63, %v2533_v51 }
0x2141   :  { %3703 = vtanh.f32 %v2551_v2 }
0x2142   :  { %3705 = vtanh.f32 %v2688_v6 }
0x214b   :  { %v3704_v36 = vpop.eup %3703 }
0x214c   :  { %2555 = vrot.lane.b32.xlu1 %v3704_v36, %s3831_s16  ;;  %v3706_v12 = vpop.eup %3705 }
0x2150   :  { %2692 = vrot.lane.b32.xlu1 %v3706_v12, %s3829_s1 }
0x21be   :  { %v2556_v27 = vpop.permute.xlu1 %2555 }
0x21bf   :  { %v2558_v33 = vmul.f32 %v2556_v27, %v2553_v24 }
0x21c1   :  { %v2563_v9 = vadd.f32 %v2562_v28, %v2558_v33 }
0x21c2   :  { %v2693_v37 = vpop.permute.xlu1 %2692 }
0x21c3   :  { %v2572_v31 = vmul.f32 %v2563_v9, %v2563_v9  ;;  %v2695_v20 = vmul.f32 %v2693_v37, %v2690_v55  ;;  %2565 = vrot.lane.b32.xlu1 %v2563_v9, %s3831_s16 }
0x21c5   :  { %v2700_v39 = vadd.f32 %v2699_v38, %v2695_v20  ;;  %2574 = vrot.lane.b32.xlu0 %v2572_v31, %s3831_s16 }
0x21c7   :  { %2702 = vrot.lane.b32.xlu1 %v2700_v39, %s3829_s1  ;;  %v2709_v41 = vmul.f32 %v2700_v39, %v2700_v39 }
0x21cb   :  { %2711 = vrot.lane.b32.xlu1 %v2709_v41, %s3829_s1 }
0x2235   :  { %v2566_v50 = vpop.permute.xlu1 %2565 }
0x2236   :  { %v2568_v21 = vsel %vm936_vm10, %v2566_v50, 0.0 }
0x2237   :  { %v2575_v11 = vpop.permute.xlu0 %2574  ;;  %2569 = vadd.xlane.f32.xlu0 %v2568_v21 }
0x2238   :  { %v2577_v43 = vsel %vm936_vm10, %v2575_v11, 0.0 }
0x2239   :  { %2578 = vadd.xlane.f32.xlu1 %v2577_v43  ;;  %v2703_v44 = vpop.permute.xlu1 %2702 }
0x223a   :  { %v2705_v56 = vsel %vm806_vm8, %v2703_v44, 0.0 }
0x223b   :  { %2706 = vadd.xlane.f32.xlu0 %v2705_v56 }
0x223d   :  { %v2712_v14 = vpop.permute.xlu1 %2711 }
0x223e   :  { %v2714_v45 = vsel %vm806_vm8, %v2712_v14, 0.0 }
0x223f   :  { %2715 = vadd.xlane.f32.xlu1 %v2714_v45 }
0x22c4   :  { %v2570_v46 = vpop.xlane.xlu0 %2569 }
0x22c5   :  { %v2571_v49 = vmul.f32 0.0625, %v2570_v46  ;;  %v541_v46 = vadd.f32 %v4054_v42, %v4048_v13 }
0x22c6   :  { %v2579_v62 = vpop.xlane.xlu1 %2578 }
0x22c7   :  { %v2581_v47 = vsub.f32 %v2563_v9, %v2571_v49  ;;  %v2587_v60 = vmul.f32 %v2571_v49, %v2571_v49  ;;  %v2580_v48 = vmul.f32 0.0625, %v2579_v62  ;;  %v549_v49 = vmul.f32 1.442695, %v541_v46 }
0x22c8   :  { %v2707_v57 = vpop.xlane.xlu0 %2706 }
0x22c9   :  { %v2708_v10 = vmul.f32 0.03125, %v2707_v57  ;;  %2583 = vrot.lane.b32.xlu0 %v2581_v47, %s3831_s16  ;;  %v2588_v51 = vsub.f32 %v2580_v48, %v2587_v60  ;;  %v2867_v47 = vld [vmem:[#allocation5 + $0x60] sm:$0xff]  ;;  %v2868_v57 = vld [vmem:[#allocation5 + $0x68] sm:$0xff] }
0x22cb   :  { %v2718_v19 = vsub.f32 %v2700_v39, %v2708_v10  ;;  %v2589_v58 = vadd.f32 1e-05, %v2588_v51  ;;  %v2724_v1 = vmul.f32 %v2708_v10, %v2708_v10  ;;  %v3531_v10 = vpack.c.bf16 %v2868_v57, %v2867_v47 }
0x22cc   :  { %v2716_v59 = vpop.xlane.xlu1 %2715 }
0x22cd   :  { %2720 = vrot.lane.b32.xlu1 %v2718_v19, %s3829_s1  ;;  %3707 = vrsqrt.f32 %v2589_v58  ;;  %v2717_v0 = vmul.f32 0.03125, %v2716_v59  ;;  %3532 = vmatpush3.bf16.msra.mxu0 %v3531_v10 }
0x22cf   :  { %v2725_v34 = vsub.f32 %v2717_v0, %v2724_v1  ;;  %v2865_v0 = vld [vmem:[%s4495_s4] sm:$0x3]  ;;  %s3832_s4 = smov [#allocation8]  }
0x22d0   :  { %s2955_s22 = sshll.u32 %s3832_s4, 4  ;;  %s2956_s22 = int_to_ptr.vmem [resolvable:$true] %s2955_s22 }
0x22d1   :  { %v2726_v61 = vadd.f32 1e-05, %v2725_v34  ;;  %s3790_s23 = scalar_lea.vmem %s2956_s22, 32  ;;  %p3795_p11 = scmp.lt.s32.totalorder %s2956_s22, %s2956_s22 }
0x22d2   :  { %p3791_p10 = scmp.ne.s32.totalorder %s2956_s22, %s3790_s23  ;;  %p3796_p12 = scmp.lt.s32.totalorder %s3790_s23, %s3790_s23 }
0x22d3   :  { %3709 = vrsqrt.f32 %v2726_v61 }
0x22d4   :  { %p3797_p13 = por %p3796_p12, %p3795_p11 }
0x22d6   :  { %p3798_p0 = pnand %p3797_p13, %p3791_p10 }
0x22d7   :  { %v3708_v52 = vpop.eup %3707 }
0x22dd   :  { %v3710_v6 = vpop.eup %3709 }
0x233b   :  { %v2584_v7 = vpop.permute.xlu0 %2583 }
0x233c   :  { %v2586_v18 = vmul.f32 %v2584_v7, %v4163_v29 }
0x233e   :  { %v2591_v54 = vmul.f32 %v3708_v52, %v2586_v18 }
0x233f   :  { %v2721_v63 = vpop.permute.xlu1 %2720 }
0x2340   :  { %v2592_v53 = vadd.f32 %v2591_v54, %v4168_v5  ;;  %v2723_v2 = vmul.f32 %v2721_v63, %v4108_v22  ;;  %v551_v54 = vmul.f32 1.442695, %v4052_v40 }
0x2342   :  { %2731 = vrot.lane.b32.xlu0 %v2592_v53, %s3824_s9  ;;  %v2728_v36 = vmul.f32 %v3710_v6, %v2723_v2  ;;  %v3723_v6 = vld [vmem:[#allocation7 + $0x8] sm:$0xff] }
0x2344   :  { %v2729_v12 = vadd.f32 %v2728_v36, %v4113_v26  ;;  %v2872_v36 = vrot.slane %v3723_v6, %v460_v8 }
0x23b4   :  { %v2732_v16 = vpop.permute.xlu0 %2731 }
0x23b5   :  { %v2734_v24 = vsel %vm230_vm5, %v2729_v12, %v2732_v16 }
0x23b6   :  { %3377 = vmatmul.mubr.msk.f32.vlgmr.msra.gmra.mrb[18].mxu1 %vm573_vm9, %v2734_v24 }
0x2489   :  { %v2804_v27 = vpop.f32.mrb[18].mxu1 }
0x248a   :  { %v2805_v28 = vadd.f32 %v2804_v27, %v4137_v4  ;;  %v3378_v33 = vpop.f32.mrb[19].mxu1 }
0x248c   :  { %2815 = vrot.lane.b32.xlu0 %v2805_v28, %s3830_s15  ;;  %v3009_v35 = vmul.f32 -1.442695, %v2805_v28 }
0x248e   :  { %3711 = vpow2.f32 %v3009_v35 }
0x2498   :  { %v3712_v9 = vpop.eup %3711 }
0x2499   :  { %v2811_v55 = vadd.f32 1.0, %v3712_v9 }
0x249b   :  { %3713 = vrcp.f32 %v2811_v55 }
0x24a5   :  { %v3714_v22 = vpop.eup %3713 }
0x24a6   :  { %v2825_v39 = vsub.f32 1.0, %v3714_v22 }
0x24fe   :  { %v2816_v37 = vpop.permute.xlu0 %2815 }
0x24ff   :  { %v2818_v38 = vmul.f32 %v3714_v22, %v2816_v37 }
0x2501   :  { %2820 = vrot.lane.b32.xlu1 %v2818_v38, %s3824_s9 }
0x2505   :  { %2831 = vrot.lane.b32.xlu1 %v2592_v53, %s3825_s10 }
0x2573   :  { %v2821_v26 = vpop.permute.xlu1 %2820 }
0x2574   :  { %v2823_v31 = vadd.f32 %v2821_v26, %v2805_v28 }
0x2576   :  { %3715 = vtanh.f32 %v2823_v31 }
0x2577   :  { %v2832_v4 = vpop.permute.xlu1 %2831  ;;  %3717 = vpow2.f32 %v549_v49 }
0x2578   :  { %v2834_v50 = vmul.f32 %v3714_v22, %v2832_v4 }
0x2580   :  { %v3716_v20 = vpop.eup %3715 }
0x2581   :  { %2827 = vrot.lane.b32.xlu0 %v3716_v20, %s3831_s16 }
0x25f3   :  { %v2828_v41 = vpop.permute.xlu0 %2827 }
0x25f4   :  { %v2830_v21 = vmul.f32 %v2828_v41, %v2825_v39 }
0x25f6   :  { %v2835_v11 = vadd.f32 %v2834_v50, %v2830_v21 }
0x25f8   :  { %v2844_v43 = vmul.f32 %v2835_v11, %v2835_v11  ;;  %2837 = vrot.lane.b32.xlu0 %v2835_v11, %s3831_s16 }
0x25fa   :  { %2846 = vrot.lane.b32.xlu1 %v2844_v43, %s3831_s16 }
0x266a   :  { %v2838_v44 = vpop.permute.xlu0 %2837 }
0x266b   :  { %v2840_v56 = vsel %vm936_vm10, %v2838_v44, 0.0 }
0x266c   :  { %2841 = vadd.xlane.f32.xlu0 %v2840_v56  ;;  %v2847_v14 = vpop.permute.xlu1 %2846 }
0x266d   :  { %v2849_v45 = vsel %vm936_vm10, %v2847_v14, 0.0 }
0x266e   :  { %2850 = vadd.xlane.f32.xlu1 %v2849_v45 }
0x267f   :  { %555 = vrot.lane.b32.xlu1 %v2973_v30, %s3825_s10 }
0x2683   :  { %563 = vrot.lane.b32.xlu1 %v3992_v17, %s3824_s9  ;;  %v3718_v17 = vpop.eup %3717 }
0x26f9   :  { %v2842_v19 = vpop.xlane.xlu0 %2841 }
0x26fa   :  { %v2843_v62 = vmul.f32 0.0625, %v2842_v19 }
0x26fb   :  { %v2851_v60 = vpop.xlane.xlu1 %2850 }
0x26fc   :  { %v2853_v48 = vsub.f32 %v2835_v11, %v2843_v62  ;;  %v2859_v51 = vmul.f32 %v2843_v62, %v2843_v62  ;;  %v2852_v58 = vmul.f32 0.0625, %v2851_v60 }
0x26fe   :  { %v2860_v23 = vsub.f32 %v2852_v58, %v2859_v51  ;;  %2855 = vrot.lane.b32.xlu0 %v2853_v48, %s3831_s16 }
0x26ff   :  { %v556_v30 = vpop.permute.xlu1 %555 }
0x2700   :  { %v569_v13 = vsel %vm122_vm2, %v3718_v17, %v556_v30  ;;  %v2861_v52 = vadd.f32 1e-05, %v2860_v23 }
0x2702   :  { %557 = vrot.lane.b32.xlu0 %v2974_v32, %s3825_s10  ;;  %3719 = vrsqrt.f32 %v2861_v52 }
0x2703   :  { %v564_v42 = vpop.permute.xlu1 %563  ;;  %3721 = vpow2.f32 %v551_v54 }
0x2704   :  { %v571_v7 = vsel %vm230_vm5, %v569_v13, %v564_v42 }
0x2705   :  { %v574_v18 = vsel %vm573_vm9, %v571_v7, 0.0 }
0x2706   :  { %576 = vst [vmem:[%s4496_s5] sm:$0xff] %v574_v18  ;;  %565 = vrot.lane.b32.xlu0 %v3990_v15, %s3824_s9 }
0x270c   :  { %v3720_v53 = vpop.eup %3719 }
0x270d   :  { %v3722_v61 = vpop.eup %3721 }
0x2770   :  { %v2856_v25 = vpop.permute.xlu0 %2855 }
0x2771   :  { %v2858_v32 = vmul.f32 %v2856_v25, %v4163_v29 }
0x2773   :  { %v2863_v59 = vmul.f32 %v3720_v53, %v2858_v32 }
0x2774   :  { %v558_v1 = vpop.permute.xlu0 %557 }
0x2775   :  { %v2864_v34 = vadd.f32 %v2863_v59, %v4168_v5  ;;  %v570_v15 = vsel %vm122_vm2, %v3722_v61, %v558_v1 }
0x2777   :  { %v2866_v63 = vmul.f32 %v2865_v0, %v2864_v34 }
0x2778   :  { %v566_v2 = vpop.permute.xlu0 %565 }
0x2779   :  { %v572_v40 = vsel %vm230_vm5, %v570_v15, %v566_v2  ;;  %3384 = vmatmul.mubr.msk.f32.vlgmr.msra.gmra.mrb[22].mxu0 %vm122_vm2, %v2866_v63 }
0x277a   :  { %v575_v29 = vsel %vm573_vm9, %v572_v40, 0.0 }
0x277b   :  { %577 = vst [vmem:[%s4496_s5 + $0x8] sm:$0xff] %v575_v29 }
0x284c   :  { %v2942_v5 = vpop.f32.mrb[22].mxu0 }
0x284d   :  { %v2943_v12 = vadd.f32 %v2942_v5, %v2872_v36  ;;  %v3385_v16 = vpop.f32.mrb[23].mxu0 }
0x284f   :  { %2946 = vst [vmem:[#allocation8] sm:$0x3] %v2943_v12 }
0x2850   :  { %3801 = shalt.err (!%p3798_p0)
}
0x2851   :  { %s3802_s26 = scalar_lea.hbm %s4497_s6, 32 }
0x2852   :  { %p3803_p1 = scmp.ne.s32.totalorder %s4497_s6, %s3802_s26  ;;  %p3806_p2 = scmp.lt.u32.totalorder %s3802_s26, %s4497_s6 }
0x2854   :  { %p3808_p3 = pnand %p3806_p2, %p3803_p1 }
0x2856   :  { %3811 = shalt.err (!%p3808_p3)
}
0x2857   :  { %2958 = dma.vmem_to_hbm [thread:$0]  %s2956_s22, 32, %s4497_s6, [#allocation4]  }
0x2858   :  { %3816 = dma.done.wait [#allocation4], 32  }
0x2859   :  { %3817 = vsyncadd [#allocation4], 4294967264 }
0x285a   :  { %2964 = vsyncpa [#allocation3], 1 }
0x285b   :  { %2965 = vsyncpa [#allocation6], 1 }
0x285c   :  { %2966 = vsyncpa [#allocation4], 1 }

</bundles_post_ra>
